<compile_context>
chip_gen: v5e
topology: v5e:2x2
jax: 0.10.0
libtpu: 0.0.40
codegen_flags: <defaults>
</compile_context>

<pallas_src>
import functools
import math

import jax
import jax.numpy as jnp
from jax.experimental import pallas as pl
from jax.experimental.pallas import tpu as pltpu


def cro_attn_kernel(e_ref, x_ref, wq_ref, bq_ref, wkv_ref, bkv_ref,
                    wm_ref, bm_ref, hm_ref, hmT_ref, chead_ref, sg_ref,
                    o_ref, *, num_heads, head_dim):
    f32 = jnp.float32
    C, BN = x_ref.shape           # channels on sublanes, BN = B*T*L on lanes
    H, D = num_heads, head_dim

    e = e_ref[...]                # (C, BN)
    x = x_ref[...]                # (C, BN)

    # --- projections: PyTorch Linear weights are (out, in), so y^T = W @ x^T.
    q_t = jnp.dot(wq_ref[...], e, preferred_element_type=f32) + bq_ref[...]      # (C, BN)
    kv_t = jnp.dot(wkv_ref[...], x, preferred_element_type=f32) + bkv_ref[...]   # (2C, BN)
    k_t = kv_t[:C]                # first num_heads head groups
    v_t = kv_t[C:]                # last num_heads head groups

    # --- per-head L2 norm along channels via the hoisted 0/1 head masks (MXU).
    hm = hm_ref[...]              # (H, C)
    hmT = hmT_ref[...]            # (C, H)

    def l2norm_heads(a_t):
        ss = jnp.dot(hm, a_t * a_t, preferred_element_type=f32)       # (H, BN)
        # matches F.normalize(dim=-1) with eps=1e-12: 1/max(||a||, eps)
        inv = jax.lax.rsqrt(jnp.maximum(ss, 1e-24))                   # EUP rsqrt
        return a_t * jnp.dot(hmT, inv, preferred_element_type=f32)    # (C, BN)

    qn_t = l2norm_heads(q_t) * (1.0 / math.sqrt(D))   # fold softmax scale into q (exact)
    kn_t = l2norm_heads(k_t)
    vn_t = l2norm_heads(v_t)

    qn = qn_t.T                   # (BN, C): the only explicit transpose

    chead = chead_ref[...]        # (1, C) int32: channel -> head id (hoisted)
    sg = sg_ref[...]              # (BN, BN) 0/1: same (batch, spatial-row t) group

    nt = (((1,), (1,)), ((), ()))  # contract last axis of both operands (A @ B^T)

    def head_step(h, attn):
        hmask = (chead == h).astype(f32)                               # (1, C), 1 vreg
        qh = qn * hmask                                                # (BN, C), other heads zeroed
        s = jnp.dot(qh, kn_t, preferred_element_type=f32)              # (BN, BN)
        # No max-subtraction: q, k unit-norm per head => |s| <= 1/sqrt(D), exp can't overflow.
        p = sg * jnp.exp(s)
        p = p * pl.reciprocal(jnp.sum(p, axis=-1, keepdims=True), approx=True)
        oh = jax.lax.dot_general(p, vn_t, nt, preferred_element_type=f32)   # (BN, C) == p @ v
        return attn + oh * hmask
    # TODO(synk): nn.Dropout on the pre-softmax scores is omitted (eval mode / identity).

    attn = jax.lax.fori_loop(0, H, head_step, jnp.zeros((BN, C), f32),
                             unroll=True)

    # output projection (y^T = Wm @ attn^T) + NCHW shortcut, stored directly in (C, BN).
    out = (jax.lax.dot_general(wm_ref[...], attn, nt, preferred_element_type=f32)
           + bm_ref[...] + x)
    o_ref[...] = out.astype(o_ref.dtype)


def cro_attention(e_nchw, x_nchw, params, num_heads=8):
    """Pallas implementation of CroAttention.forward(e, x). Inputs are NCHW.

    params follow the PyTorch Linear convention: weight (out, in), bias (out,).
    """
    wq, bq, wkv, bkv, wm, bm = params
    B, C, T, L = x_nchw.shape
    N = T * L
    BN = B * N
    H = num_heads
    D = C // H

    # Fuse the batch into the lane axis: (B, C, N) -> (C, B*N). The B<->C swap is a
    # tiny (~16 KiB) XLA transpose; everything downstream is lane-dense (BN = 128).
    e2 = jnp.transpose(e_nchw.reshape(B, C, N), (1, 0, 2)).reshape(C, BN)
    x2 = jnp.transpose(x_nchw.reshape(B, C, N), (1, 0, 2)).reshape(C, BN)

    bq2 = bq.reshape(C, 1)
    bkv2 = bkv.reshape(2 * C, 1)
    bm2 = bm.reshape(C, 1)

    # Hoisted constant masks: built once here, DMA'd once, VMEM-resident.
    chan_head = jnp.arange(C, dtype=jnp.int32) // D                      # channel -> head id
    hm = (chan_head[None, :] ==
          jnp.arange(H, dtype=jnp.int32)[:, None]).astype(jnp.float32)   # (H, C)
    hmT = hm.T                                                           # (C, H)
    chead = chan_head.reshape(1, C)                                      # (1, C) int32
    gid = jnp.arange(BN, dtype=jnp.int32) // L                           # token -> (batch, t) group
    sg = (gid[:, None] == gid[None, :]).astype(jnp.float32)              # (BN, BN)

    kernel = functools.partial(cro_attn_kernel, num_heads=H, head_dim=D)

    cost = pl.CostEstimate(
        flops=int(8 * C * C * BN + 4 * H * C * BN * BN + 12 * H * C * BN),
        transcendentals=int(H * BN * BN + 3 * H * BN),
        bytes_accessed=int(4 * (3 * C * BN + 4 * C * C + 5 * C
                                + 2 * H * C + C + BN * BN)),
    )

    vmem = pl.BlockSpec(memory_space=pltpu.MemorySpace.VMEM)

    out2 = pl.pallas_call(
        kernel,
        out_shape=jax.ShapeDtypeStruct((C, BN), x_nchw.dtype),
        in_specs=[vmem] * 12,
        out_specs=vmem,
        compiler_params=pltpu.CompilerParams(vmem_limit_bytes=16 * 1024 * 1024),
        cost_estimate=cost,
    )(e2, x2, wq, bq2, wkv, bkv2, wm, bm2, hm, hmT, chead, sg)

    return jnp.transpose(out2.reshape(C, B, N), (1, 0, 2)).reshape(B, C, T, L)


def _l2norm(a):
    n = jnp.sqrt(jnp.sum(a * a, axis=-1, keepdims=True))
    return a / jnp.maximum(n, 1e-12)


def reference(e_nchw, x_nchw, params, num_heads):
    """Pure-JAX mirror of the PyTorch forward (eval mode), for verification."""
    wq, bq, wkv, bkv, wm, bm = params
    x = jnp.transpose(x_nchw, (0, 2, 3, 1))
    e = jnp.transpose(e_nchw, (0, 2, 3, 1))
    b, t, l, c = x.shape
    d = c // num_heads
    q = e @ wq.T + bq
    kv = x @ wkv.T + bkv
    q = _l2norm(q.reshape(b, t, l, num_heads, d).transpose(0, 1, 3, 2, 4))
    kvr = kv.reshape(b, t, l, 2 * num_heads, d).transpose(0, 1, 3, 2, 4)
    k, v = _l2norm(kvr[:, :, :num_heads]), _l2norm(kvr[:, :, num_heads:])
    att = jax.nn.softmax((q @ jnp.swapaxes(k, -2, -1)) / math.sqrt(d), axis=-1)
    o = (att @ v).transpose(0, 1, 3, 2, 4).reshape(b, t, l, c)
    o = o @ wm.T + bm
    return jnp.transpose(o, (0, 3, 1, 2)) + x_nchw


if __name__ == "__main__":
    B, C, T, L = 2, 32, 8, 8     # in_planes=32, spatial (T, L) = (8, 8)
    NUM_HEADS = 8                # head_dim = 4

    key = jax.random.PRNGKey(0)
    k_e, k_x, k_wq, k_bq, k_wkv, k_bkv, k_wm, k_bm = jax.random.split(key, 8)

    # Inputs are NCHW, like the PyTorch module.
    e = jax.random.normal(k_e, (B, C, T, L), jnp.float32)
    x = jax.random.normal(k_x, (B, C, T, L), jnp.float32)

    # Deterministic synthetic parameters in PyTorch Linear layout: (out, in) / (out,).
    s = 1.0 / math.sqrt(C)
    params = (
        jax.random.normal(k_wq, (C, C), jnp.float32) * s,        # q.weight
        jax.random.normal(k_bq, (C,), jnp.float32) * s,          # q.bias
        jax.random.normal(k_wkv, (2 * C, C), jnp.float32) * s,   # kv.weight
        jax.random.normal(k_bkv, (2 * C,), jnp.float32) * s,     # kv.bias
        jax.random.normal(k_wm, (C, C), jnp.float32) * s,        # m.weight
        jax.random.normal(k_bm, (C,), jnp.float32) * s,          # m.bias
    )

    out = cro_attention(e, x, params, num_heads=NUM_HEADS)
    out = jax.block_until_ready(out)

    ref = reference(e, x, params, NUM_HEADS)
    assert out.shape == (B, C, T, L)
    # tolerance allows for the approximate (EUP) reciprocal in the softmax.
    max_err = float(jnp.max(jnp.abs(out - ref)))
    assert jnp.allclose(out, ref, rtol=2e-3, atol=2e-3), f"mismatch vs reference (max abs err {max_err})"

    print("KERNEL_OK")
</pallas_src>

<mosaic_0001>
module attributes {stable_mosaic.version = 11 : i64} {
  func.func @cro_attn_kernel(%arg0: memref<32x128xf32, #tpu.memory_space<vmem>>, %arg1: memref<32x128xf32, #tpu.memory_space<vmem>>, %arg2: memref<32x32xf32, #tpu.memory_space<vmem>>, %arg3: memref<32x1xf32, #tpu.memory_space<vmem>>, %arg4: memref<64x32xf32, #tpu.memory_space<vmem>>, %arg5: memref<64x1xf32, #tpu.memory_space<vmem>>, %arg6: memref<32x32xf32, #tpu.memory_space<vmem>>, %arg7: memref<32x1xf32, #tpu.memory_space<vmem>>, %arg8: memref<8x32xf32, #tpu.memory_space<vmem>>, %arg9: memref<32x8xf32, #tpu.memory_space<vmem>>, %arg10: memref<1x32xi32, #tpu.memory_space<vmem>>, %arg11: memref<128x128xf32, #tpu.memory_space<vmem>>, %arg12: memref<32x128xf32, #tpu.memory_space<vmem>>) attributes {dimension_semantics = [], scalar_prefetch = 0 : i64, scratch_operands = 0 : i64, tpu.core_type = #tpu.core_type<tc>} {
    %c0 = arith.constant 0 : index
    %c0_0 = arith.constant 0 : index
    %0 = vector.load %arg0[%c0, %c0_0] : memref<32x128xf32, #tpu.memory_space<vmem>>, vector<32x128xf32>
    %c0_1 = arith.constant 0 : index
    %c0_2 = arith.constant 0 : index
    %1 = vector.load %arg1[%c0_1, %c0_2] : memref<32x128xf32, #tpu.memory_space<vmem>>, vector<32x128xf32>
    %c0_3 = arith.constant 0 : index
    %c0_4 = arith.constant 0 : index
    %2 = vector.load %arg2[%c0_3, %c0_4] : memref<32x32xf32, #tpu.memory_space<vmem>>, vector<32x32xf32>
    %cst = arith.constant dense<0.000000e+00> : vector<32x128xf32>
    %3 = tpu.matmul %2, %0, %cst {dimension_numbers = #tpu.dot_dimension_numbers<[1], [0], [0], [1], [0, 0, 1, 1], [], []>} : vector<32x32xf32>, vector<32x128xf32>, vector<32x128xf32> -> vector<32x128xf32>
    %c0_5 = arith.constant 0 : index
    %c0_6 = arith.constant 0 : index
    %4 = vector.load %arg3[%c0_5, %c0_6] : memref<32x1xf32, #tpu.memory_space<vmem>>, vector<32x1xf32>
    %5 = vector.broadcast %4 : vector<32x1xf32> to vector<32x128xf32>
    %6 = arith.addf %3, %5 : vector<32x128xf32>
    %c0_7 = arith.constant 0 : index
    %c0_8 = arith.constant 0 : index
    %7 = vector.load %arg4[%c0_7, %c0_8] : memref<64x32xf32, #tpu.memory_space<vmem>>, vector<64x32xf32>
    %cst_9 = arith.constant dense<0.000000e+00> : vector<64x128xf32>
    %8 = tpu.matmul %7, %1, %cst_9 {dimension_numbers = #tpu.dot_dimension_numbers<[1], [0], [0], [1], [0, 0, 1, 1], [], []>} : vector<64x32xf32>, vector<32x128xf32>, vector<64x128xf32> -> vector<64x128xf32>
    %c0_10 = arith.constant 0 : index
    %c0_11 = arith.constant 0 : index
    %9 = vector.load %arg5[%c0_10, %c0_11] : memref<64x1xf32, #tpu.memory_space<vmem>>, vector<64x1xf32>
    %10 = vector.broadcast %9 : vector<64x1xf32> to vector<64x128xf32>
    %11 = arith.addf %8, %10 : vector<64x128xf32>
    %12 = vector.extract_strided_slice %11 {offsets = [0, 0], sizes = [32, 128], strides = [1, 1]} : vector<64x128xf32> to vector<32x128xf32>
    %13 = vector.extract_strided_slice %11 {offsets = [32, 0], sizes = [32, 128], strides = [1, 1]} : vector<64x128xf32> to vector<32x128xf32>
    %c0_12 = arith.constant 0 : index
    %c0_13 = arith.constant 0 : index
    %14 = vector.load %arg8[%c0_12, %c0_13] : memref<8x32xf32, #tpu.memory_space<vmem>>, vector<8x32xf32>
    %c0_14 = arith.constant 0 : index
    %c0_15 = arith.constant 0 : index
    %15 = vector.load %arg9[%c0_14, %c0_15] : memref<32x8xf32, #tpu.memory_space<vmem>>, vector<32x8xf32>
    %16 = arith.mulf %6, %6 : vector<32x128xf32>
    %cst_16 = arith.constant dense<0.000000e+00> : vector<8x128xf32>
    %17 = tpu.matmul %14, %16, %cst_16 {dimension_numbers = #tpu.dot_dimension_numbers<[1], [0], [0], [1], [0, 0, 1, 1], [], []>} : vector<8x32xf32>, vector<32x128xf32>, vector<8x128xf32> -> vector<8x128xf32>
    %cst_17 = arith.constant 1.000000e-24 : f32
    %18 = vector.broadcast %cst_17 : f32 to vector<8x128xf32>
    %19 = arith.maximumf %17, %18 : vector<8x128xf32>
    %20 = math.rsqrt %19 : vector<8x128xf32>
    %cst_18 = arith.constant dense<0.000000e+00> : vector<32x128xf32>
    %21 = tpu.matmul %15, %20, %cst_18 {dimension_numbers = #tpu.dot_dimension_numbers<[1], [0], [0], [1], [0, 0, 1, 1], [], []>} : vector<32x8xf32>, vector<8x128xf32>, vector<32x128xf32> -> vector<32x128xf32>
    %22 = arith.mulf %6, %21 : vector<32x128xf32>
    %cst_19 = arith.constant 5.000000e-01 : f32
    %23 = vector.broadcast %cst_19 : f32 to vector<32x128xf32>
    %24 = arith.mulf %22, %23 : vector<32x128xf32>
    %25 = arith.mulf %12, %12 : vector<32x128xf32>
    %cst_20 = arith.constant dense<0.000000e+00> : vector<8x128xf32>
    %26 = tpu.matmul %14, %25, %cst_20 {dimension_numbers = #tpu.dot_dimension_numbers<[1], [0], [0], [1], [0, 0, 1, 1], [], []>} : vector<8x32xf32>, vector<32x128xf32>, vector<8x128xf32> -> vector<8x128xf32>
    %cst_21 = arith.constant 1.000000e-24 : f32
    %27 = vector.broadcast %cst_21 : f32 to vector<8x128xf32>
    %28 = arith.maximumf %26, %27 : vector<8x128xf32>
    %29 = math.rsqrt %28 : vector<8x128xf32>
    %cst_22 = arith.constant dense<0.000000e+00> : vector<32x128xf32>
    %30 = tpu.matmul %15, %29, %cst_22 {dimension_numbers = #tpu.dot_dimension_numbers<[1], [0], [0], [1], [0, 0, 1, 1], [], []>} : vector<32x8xf32>, vector<8x128xf32>, vector<32x128xf32> -> vector<32x128xf32>
    %31 = arith.mulf %12, %30 : vector<32x128xf32>
    %32 = arith.mulf %13, %13 : vector<32x128xf32>
    %cst_23 = arith.constant dense<0.000000e+00> : vector<8x128xf32>
    %33 = tpu.matmul %14, %32, %cst_23 {dimension_numbers = #tpu.dot_dimension_numbers<[1], [0], [0], [1], [0, 0, 1, 1], [], []>} : vector<8x32xf32>, vector<32x128xf32>, vector<8x128xf32> -> vector<8x128xf32>
    %cst_24 = arith.constant 1.000000e-24 : f32
    %34 = vector.broadcast %cst_24 : f32 to vector<8x128xf32>
    %35 = arith.maximumf %33, %34 : vector<8x128xf32>
    %36 = math.rsqrt %35 : vector<8x128xf32>
    %cst_25 = arith.constant dense<0.000000e+00> : vector<32x128xf32>
    %37 = tpu.matmul %15, %36, %cst_25 {dimension_numbers = #tpu.dot_dimension_numbers<[1], [0], [0], [1], [0, 0, 1, 1], [], []>} : vector<32x8xf32>, vector<8x128xf32>, vector<32x128xf32> -> vector<32x128xf32>
    %38 = arith.mulf %13, %37 : vector<32x128xf32>
    %39 = tpu.transpose %24, [1, 0] : vector<32x128xf32> -> vector<128x32xf32>
    %c0_26 = arith.constant 0 : index
    %c0_27 = arith.constant 0 : index
    %40 = vector.load %arg10[%c0_26, %c0_27] : memref<1x32xi32, #tpu.memory_space<vmem>>, vector<1x32xi32>
    %c0_28 = arith.constant 0 : index
    %c0_29 = arith.constant 0 : index
    %41 = vector.load %arg11[%c0_28, %c0_29] : memref<128x128xf32, #tpu.memory_space<vmem>>, vector<128x128xf32>
    %cst_30 = arith.constant 0.000000e+00 : f32
    %42 = vector.broadcast %cst_30 : f32 to vector<128x32xf32>
    %c0_i32 = arith.constant 0 : i32
    %43 = vector.broadcast %c0_i32 : i32 to vector<1x32xi32>
    %44 = arith.cmpi eq, %40, %43 : vector<1x32xi32>
    %45 = arith.extui %44 : vector<1x32xi1> to vector<1x32xi32>
    %46 = arith.sitofp %45 : vector<1x32xi32> to vector<1x32xf32>
    %47 = vector.broadcast %46 : vector<1x32xf32> to vector<128x32xf32>
    %48 = arith.mulf %39, %47 : vector<128x32xf32>
    %cst_31 = arith.constant dense<0.000000e+00> : vector<128x128xf32>
    %49 = tpu.matmul %48, %31, %cst_31 {dimension_numbers = #tpu.dot_dimension_numbers<[1], [0], [0], [1], [0, 0, 1, 1], [], []>} : vector<128x32xf32>, vector<32x128xf32>, vector<128x128xf32> -> vector<128x128xf32>
    %50 = math.exp %49 : vector<128x128xf32>
    %51 = arith.mulf %41, %50 : vector<128x128xf32>
    %cst_32 = arith.constant dense<0.000000e+00> : vector<128xf32>
    %52 = vector.multi_reduction <add>, %51, %cst_32 [1] : vector<128x128xf32> to vector<128xf32>
    %53 = vector.shape_cast %52 : vector<128xf32> to vector<128x1xf32>
    %54 = tpu.reciprocal %53 {approx = true} : vector<128x1xf32> -> vector<128x1xf32>
    %55 = vector.broadcast %54 : vector<128x1xf32> to vector<128x128xf32>
    %56 = arith.mulf %51, %55 : vector<128x128xf32>
    %cst_33 = arith.constant dense<0.000000e+00> : vector<128x32xf32>
    %57 = tpu.matmul %56, %38, %cst_33 {dimension_numbers = #tpu.dot_dimension_numbers<[1], [1], [0], [0], [0, 0, 1, 0], [], []>} : vector<128x128xf32>, vector<32x128xf32>, vector<128x32xf32> -> vector<128x32xf32>
    %58 = vector.broadcast %46 : vector<1x32xf32> to vector<128x32xf32>
    %59 = arith.mulf %57, %58 : vector<128x32xf32>
    %60 = arith.addf %42, %59 : vector<128x32xf32>
    %c1_i32 = arith.constant 1 : i32
    %61 = vector.broadcast %c1_i32 : i32 to vector<1x32xi32>
    %62 = arith.cmpi eq, %40, %61 : vector<1x32xi32>
    %63 = arith.extui %62 : vector<1x32xi1> to vector<1x32xi32>
    %64 = arith.sitofp %63 : vector<1x32xi32> to vector<1x32xf32>
    %65 = vector.broadcast %64 : vector<1x32xf32> to vector<128x32xf32>
    %66 = arith.mulf %39, %65 : vector<128x32xf32>
    %cst_34 = arith.constant dense<0.000000e+00> : vector<128x128xf32>
    %67 = tpu.matmul %66, %31, %cst_34 {dimension_numbers = #tpu.dot_dimension_numbers<[1], [0], [0], [1], [0, 0, 1, 1], [], []>} : vector<128x32xf32>, vector<32x128xf32>, vector<128x128xf32> -> vector<128x128xf32>
    %68 = math.exp %67 : vector<128x128xf32>
    %69 = arith.mulf %41, %68 : vector<128x128xf32>
    %cst_35 = arith.constant dense<0.000000e+00> : vector<128xf32>
    %70 = vector.multi_reduction <add>, %69, %cst_35 [1] : vector<128x128xf32> to vector<128xf32>
    %71 = vector.shape_cast %70 : vector<128xf32> to vector<128x1xf32>
    %72 = tpu.reciprocal %71 {approx = true} : vector<128x1xf32> -> vector<128x1xf32>
    %73 = vector.broadcast %72 : vector<128x1xf32> to vector<128x128xf32>
    %74 = arith.mulf %69, %73 : vector<128x128xf32>
    %cst_36 = arith.constant dense<0.000000e+00> : vector<128x32xf32>
    %75 = tpu.matmul %74, %38, %cst_36 {dimension_numbers = #tpu.dot_dimension_numbers<[1], [1], [0], [0], [0, 0, 1, 0], [], []>} : vector<128x128xf32>, vector<32x128xf32>, vector<128x32xf32> -> vector<128x32xf32>
    %76 = vector.broadcast %64 : vector<1x32xf32> to vector<128x32xf32>
    %77 = arith.mulf %75, %76 : vector<128x32xf32>
    %78 = arith.addf %60, %77 : vector<128x32xf32>
    %c2_i32 = arith.constant 2 : i32
    %79 = vector.broadcast %c2_i32 : i32 to vector<1x32xi32>
    %80 = arith.cmpi eq, %40, %79 : vector<1x32xi32>
    %81 = arith.extui %80 : vector<1x32xi1> to vector<1x32xi32>
    %82 = arith.sitofp %81 : vector<1x32xi32> to vector<1x32xf32>
    %83 = vector.broadcast %82 : vector<1x32xf32> to vector<128x32xf32>
    %84 = arith.mulf %39, %83 : vector<128x32xf32>
    %cst_37 = arith.constant dense<0.000000e+00> : vector<128x128xf32>
    %85 = tpu.matmul %84, %31, %cst_37 {dimension_numbers = #tpu.dot_dimension_numbers<[1], [0], [0], [1], [0, 0, 1, 1], [], []>} : vector<128x32xf32>, vector<32x128xf32>, vector<128x128xf32> -> vector<128x128xf32>
    %86 = math.exp %85 : vector<128x128xf32>
    %87 = arith.mulf %41, %86 : vector<128x128xf32>
    %cst_38 = arith.constant dense<0.000000e+00> : vector<128xf32>
    %88 = vector.multi_reduction <add>, %87, %cst_38 [1] : vector<128x128xf32> to vector<128xf32>
    %89 = vector.shape_cast %88 : vector<128xf32> to vector<128x1xf32>
    %90 = tpu.reciprocal %89 {approx = true} : vector<128x1xf32> -> vector<128x1xf32>
    %91 = vector.broadcast %90 : vector<128x1xf32> to vector<128x128xf32>
    %92 = arith.mulf %87, %91 : vector<128x128xf32>
    %cst_39 = arith.constant dense<0.000000e+00> : vector<128x32xf32>
    %93 = tpu.matmul %92, %38, %cst_39 {dimension_numbers = #tpu.dot_dimension_numbers<[1], [1], [0], [0], [0, 0, 1, 0], [], []>} : vector<128x128xf32>, vector<32x128xf32>, vector<128x32xf32> -> vector<128x32xf32>
    %94 = vector.broadcast %82 : vector<1x32xf32> to vector<128x32xf32>
    %95 = arith.mulf %93, %94 : vector<128x32xf32>
    %96 = arith.addf %78, %95 : vector<128x32xf32>
    %c3_i32 = arith.constant 3 : i32
    %97 = vector.broadcast %c3_i32 : i32 to vector<1x32xi32>
    %98 = arith.cmpi eq, %40, %97 : vector<1x32xi32>
    %99 = arith.extui %98 : vector<1x32xi1> to vector<1x32xi32>
    %100 = arith.sitofp %99 : vector<1x32xi32> to vector<1x32xf32>
    %101 = vector.broadcast %100 : vector<1x32xf32> to vector<128x32xf32>
    %102 = arith.mulf %39, %101 : vector<128x32xf32>
    %cst_40 = arith.constant dense<0.000000e+00> : vector<128x128xf32>
    %103 = tpu.matmul %102, %31, %cst_40 {dimension_numbers = #tpu.dot_dimension_numbers<[1], [0], [0], [1], [0, 0, 1, 1], [], []>} : vector<128x32xf32>, vector<32x128xf32>, vector<128x128xf32> -> vector<128x128xf32>
    %104 = math.exp %103 : vector<128x128xf32>
    %105 = arith.mulf %41, %104 : vector<128x128xf32>
    %cst_41 = arith.constant dense<0.000000e+00> : vector<128xf32>
    %106 = vector.multi_reduction <add>, %105, %cst_41 [1] : vector<128x128xf32> to vector<128xf32>
    %107 = vector.shape_cast %106 : vector<128xf32> to vector<128x1xf32>
    %108 = tpu.reciprocal %107 {approx = true} : vector<128x1xf32> -> vector<128x1xf32>
    %109 = vector.broadcast %108 : vector<128x1xf32> to vector<128x128xf32>
    %110 = arith.mulf %105, %109 : vector<128x128xf32>
    %cst_42 = arith.constant dense<0.000000e+00> : vector<128x32xf32>
    %111 = tpu.matmul %110, %38, %cst_42 {dimension_numbers = #tpu.dot_dimension_numbers<[1], [1], [0], [0], [0, 0, 1, 0], [], []>} : vector<128x128xf32>, vector<32x128xf32>, vector<128x32xf32> -> vector<128x32xf32>
    %112 = vector.broadcast %100 : vector<1x32xf32> to vector<128x32xf32>
    %113 = arith.mulf %111, %112 : vector<128x32xf32>
    %114 = arith.addf %96, %113 : vector<128x32xf32>
    %c4_i32 = arith.constant 4 : i32
    %115 = vector.broadcast %c4_i32 : i32 to vector<1x32xi32>
    %116 = arith.cmpi eq, %40, %115 : vector<1x32xi32>
    %117 = arith.extui %116 : vector<1x32xi1> to vector<1x32xi32>
    %118 = arith.sitofp %117 : vector<1x32xi32> to vector<1x32xf32>
    %119 = vector.broadcast %118 : vector<1x32xf32> to vector<128x32xf32>
    %120 = arith.mulf %39, %119 : vector<128x32xf32>
    %cst_43 = arith.constant dense<0.000000e+00> : vector<128x128xf32>
    %121 = tpu.matmul %120, %31, %cst_43 {dimension_numbers = #tpu.dot_dimension_numbers<[1], [0], [0], [1], [0, 0, 1, 1], [], []>} : vector<128x32xf32>, vector<32x128xf32>, vector<128x128xf32> -> vector<128x128xf32>
    %122 = math.exp %121 : vector<128x128xf32>
    %123 = arith.mulf %41, %122 : vector<128x128xf32>
    %cst_44 = arith.constant dense<0.000000e+00> : vector<128xf32>
    %124 = vector.multi_reduction <add>, %123, %cst_44 [1] : vector<128x128xf32> to vector<128xf32>
    %125 = vector.shape_cast %124 : vector<128xf32> to vector<128x1xf32>
    %126 = tpu.reciprocal %125 {approx = true} : vector<128x1xf32> -> vector<128x1xf32>
    %127 = vector.broadcast %126 : vector<128x1xf32> to vector<128x128xf32>
    %128 = arith.mulf %123, %127 : vector<128x128xf32>
    %cst_45 = arith.constant dense<0.000000e+00> : vector<128x32xf32>
    %129 = tpu.matmul %128, %38, %cst_45 {dimension_numbers = #tpu.dot_dimension_numbers<[1], [1], [0], [0], [0, 0, 1, 0], [], []>} : vector<128x128xf32>, vector<32x128xf32>, vector<128x32xf32> -> vector<128x32xf32>
    %130 = vector.broadcast %118 : vector<1x32xf32> to vector<128x32xf32>
    %131 = arith.mulf %129, %130 : vector<128x32xf32>
    %132 = arith.addf %114, %131 : vector<128x32xf32>
    %c5_i32 = arith.constant 5 : i32
    %133 = vector.broadcast %c5_i32 : i32 to vector<1x32xi32>
    %134 = arith.cmpi eq, %40, %133 : vector<1x32xi32>
    %135 = arith.extui %134 : vector<1x32xi1> to vector<1x32xi32>
    %136 = arith.sitofp %135 : vector<1x32xi32> to vector<1x32xf32>
    %137 = vector.broadcast %136 : vector<1x32xf32> to vector<128x32xf32>
    %138 = arith.mulf %39, %137 : vector<128x32xf32>
    %cst_46 = arith.constant dense<0.000000e+00> : vector<128x128xf32>
    %139 = tpu.matmul %138, %31, %cst_46 {dimension_numbers = #tpu.dot_dimension_numbers<[1], [0], [0], [1], [0, 0, 1, 1], [], []>} : vector<128x32xf32>, vector<32x128xf32>, vector<128x128xf32> -> vector<128x128xf32>
    %140 = math.exp %139 : vector<128x128xf32>
    %141 = arith.mulf %41, %140 : vector<128x128xf32>
    %cst_47 = arith.constant dense<0.000000e+00> : vector<128xf32>
    %142 = vector.multi_reduction <add>, %141, %cst_47 [1] : vector<128x128xf32> to vector<128xf32>
    %143 = vector.shape_cast %142 : vector<128xf32> to vector<128x1xf32>
    %144 = tpu.reciprocal %143 {approx = true} : vector<128x1xf32> -> vector<128x1xf32>
    %145 = vector.broadcast %144 : vector<128x1xf32> to vector<128x128xf32>
    %146 = arith.mulf %141, %145 : vector<128x128xf32>
    %cst_48 = arith.constant dense<0.000000e+00> : vector<128x32xf32>
    %147 = tpu.matmul %146, %38, %cst_48 {dimension_numbers = #tpu.dot_dimension_numbers<[1], [1], [0], [0], [0, 0, 1, 0], [], []>} : vector<128x128xf32>, vector<32x128xf32>, vector<128x32xf32> -> vector<128x32xf32>
    %148 = vector.broadcast %136 : vector<1x32xf32> to vector<128x32xf32>
    %149 = arith.mulf %147, %148 : vector<128x32xf32>
    %150 = arith.addf %132, %149 : vector<128x32xf32>
    %c6_i32 = arith.constant 6 : i32
    %151 = vector.broadcast %c6_i32 : i32 to vector<1x32xi32>
    %152 = arith.cmpi eq, %40, %151 : vector<1x32xi32>
    %153 = arith.extui %152 : vector<1x32xi1> to vector<1x32xi32>
    %154 = arith.sitofp %153 : vector<1x32xi32> to vector<1x32xf32>
    %155 = vector.broadcast %154 : vector<1x32xf32> to vector<128x32xf32>
    %156 = arith.mulf %39, %155 : vector<128x32xf32>
    %cst_49 = arith.constant dense<0.000000e+00> : vector<128x128xf32>
    %157 = tpu.matmul %156, %31, %cst_49 {dimension_numbers = #tpu.dot_dimension_numbers<[1], [0], [0], [1], [0, 0, 1, 1], [], []>} : vector<128x32xf32>, vector<32x128xf32>, vector<128x128xf32> -> vector<128x128xf32>
    %158 = math.exp %157 : vector<128x128xf32>
    %159 = arith.mulf %41, %158 : vector<128x128xf32>
    %cst_50 = arith.constant dense<0.000000e+00> : vector<128xf32>
    %160 = vector.multi_reduction <add>, %159, %cst_50 [1] : vector<128x128xf32> to vector<128xf32>
    %161 = vector.shape_cast %160 : vector<128xf32> to vector<128x1xf32>
    %162 = tpu.reciprocal %161 {approx = true} : vector<128x1xf32> -> vector<128x1xf32>
    %163 = vector.broadcast %162 : vector<128x1xf32> to vector<128x128xf32>
    %164 = arith.mulf %159, %163 : vector<128x128xf32>
    %cst_51 = arith.constant dense<0.000000e+00> : vector<128x32xf32>
    %165 = tpu.matmul %164, %38, %cst_51 {dimension_numbers = #tpu.dot_dimension_numbers<[1], [1], [0], [0], [0, 0, 1, 0], [], []>} : vector<128x128xf32>, vector<32x128xf32>, vector<128x32xf32> -> vector<128x32xf32>
    %166 = vector.broadcast %154 : vector<1x32xf32> to vector<128x32xf32>
    %167 = arith.mulf %165, %166 : vector<128x32xf32>
    %168 = arith.addf %150, %167 : vector<128x32xf32>
    %c7_i32 = arith.constant 7 : i32
    %169 = vector.broadcast %c7_i32 : i32 to vector<1x32xi32>
    %170 = arith.cmpi eq, %40, %169 : vector<1x32xi32>
    %171 = arith.extui %170 : vector<1x32xi1> to vector<1x32xi32>
    %172 = arith.sitofp %171 : vector<1x32xi32> to vector<1x32xf32>
    %173 = vector.broadcast %172 : vector<1x32xf32> to vector<128x32xf32>
    %174 = arith.mulf %39, %173 : vector<128x32xf32>
    %cst_52 = arith.constant dense<0.000000e+00> : vector<128x128xf32>
    %175 = tpu.matmul %174, %31, %cst_52 {dimension_numbers = #tpu.dot_dimension_numbers<[1], [0], [0], [1], [0, 0, 1, 1], [], []>} : vector<128x32xf32>, vector<32x128xf32>, vector<128x128xf32> -> vector<128x128xf32>
    %176 = math.exp %175 : vector<128x128xf32>
    %177 = arith.mulf %41, %176 : vector<128x128xf32>
    %cst_53 = arith.constant dense<0.000000e+00> : vector<128xf32>
    %178 = vector.multi_reduction <add>, %177, %cst_53 [1] : vector<128x128xf32> to vector<128xf32>
    %179 = vector.shape_cast %178 : vector<128xf32> to vector<128x1xf32>
    %180 = tpu.reciprocal %179 {approx = true} : vector<128x1xf32> -> vector<128x1xf32>
    %181 = vector.broadcast %180 : vector<128x1xf32> to vector<128x128xf32>
    %182 = arith.mulf %177, %181 : vector<128x128xf32>
    %cst_54 = arith.constant dense<0.000000e+00> : vector<128x32xf32>
    %183 = tpu.matmul %182, %38, %cst_54 {dimension_numbers = #tpu.dot_dimension_numbers<[1], [1], [0], [0], [0, 0, 1, 0], [], []>} : vector<128x128xf32>, vector<32x128xf32>, vector<128x32xf32> -> vector<128x32xf32>
    %184 = vector.broadcast %172 : vector<1x32xf32> to vector<128x32xf32>
    %185 = arith.mulf %183, %184 : vector<128x32xf32>
    %186 = arith.addf %168, %185 : vector<128x32xf32>
    %c8_i32 = arith.constant 8 : i32
    %c0_55 = arith.constant 0 : index
    %c0_56 = arith.constant 0 : index
    %187 = vector.load %arg6[%c0_55, %c0_56] : memref<32x32xf32, #tpu.memory_space<vmem>>, vector<32x32xf32>
    %cst_57 = arith.constant dense<0.000000e+00> : vector<32x128xf32>
    %188 = tpu.matmul %187, %186, %cst_57 {dimension_numbers = #tpu.dot_dimension_numbers<[1], [1], [0], [0], [0, 0, 1, 0], [], []>} : vector<32x32xf32>, vector<128x32xf32>, vector<32x128xf32> -> vector<32x128xf32>
    %c0_58 = arith.constant 0 : index
    %c0_59 = arith.constant 0 : index
    %189 = vector.load %arg7[%c0_58, %c0_59] : memref<32x1xf32, #tpu.memory_space<vmem>>, vector<32x1xf32>
    %190 = vector.broadcast %189 : vector<32x1xf32> to vector<32x128xf32>
    %191 = arith.addf %188, %190 : vector<32x128xf32>
    %192 = arith.addf %191, %1 : vector<32x128xf32>
    %c0_60 = arith.constant 0 : index
    %c0_61 = arith.constant 0 : index
    %193 = vector.load %arg12[%c0_60, %c0_61] : memref<32x128xf32, #tpu.memory_space<vmem>>, vector<32x128xf32>
    tpu.vector_store %arg12[%c0_60, %c0_61], %192 {strides = array<i32>} : memref<32x128xf32, #tpu.memory_space<vmem>>, vector<32x128xf32>,
    return
  }
}

</mosaic_0001>

<bundles_post_ra>
// kernel: tpu_custom_call.1
= control target key start
LH: loop header
LB: loop body
LE: loop exit
PB: predicated region body
PF: predicated region fallthrough
CT: control target
= control target key end

     0   :  { %v4169_v6 = vmov 0   ;;  %vm78_vm0 = vcmask 261120   ;;  %s6259_s0 = inlined_call_operand.vmem [shape: f32[32,128], index: 0, kind: input, shape index: {}]   ;;  %s6260_s1 = inlined_call_operand.vmem [shape: f32[32,128], index: 1, kind: input, shape index: {}]   ;;  %s6261_s2 = inlined_call_operand.vmem [shape: f32[32,32], index: 2, kind: input, shape index: {}]   ;;  %s6262_s3 = inlined_call_operand.vmem [shape: f32[32,1], index: 3, kind: input, shape index: {}]   ;;  %s6263_s4 = inlined_call_operand.vmem [shape: f32[64,32], index: 4, kind: input, shape index: {}]   ;;  %s6264_s5 = inlined_call_operand.vmem [shape: f32[64,1], index: 5, kind: input, shape index: {}]   ;;  %s6265_s6 = inlined_call_operand.vmem [shape: f32[32,32], index: 6, kind: input, shape index: {}]   ;;  %s6266_s7 = inlined_call_operand.vmem [shape: f32[32,1], index: 7, kind: input, shape index: {}]   ;;  %s6267_s8 = inlined_call_operand.vmem [shape: f32[8,32], index: 8, kind: input, shape index: {}]   ;;  %s6268_s9 = inlined_call_operand.vmem [shape: f32[32,8], index: 9, kind: input, shape index: {}]   ;;  %s6269_s10 = inlined_call_operand.vmem [shape: s32[1,32], index: 10, kind: input, shape index: {}]   ;;  %s6270_s11 = inlined_call_operand.vmem [shape: f32[128,128], index: 11, kind: input, shape index: {}]   ;;  %s6271_s12 = inlined_call_operand.hbm [shape: f32[32,128], index: 12, kind: output, shape index: {}]  }
   0x1   :  { %v45_v0 = vld [vmem:[%s6259_s0 + $0x18] sm:$0xff]  ;;  %v44_v2 = vld [vmem:[%s6259_s0 + $0x10] sm:$0xff]  ;;  %v43_v4 = vld [vmem:[%s6259_s0 + $0x8] sm:$0xff]  ;;  %3603 = vset.pattern.permute.xlu1 %v4169_v6  ;;  %3602 = vset.pattern.permute.xlu0 %v4169_v6 }
   0x2   :  { %v49_v1 = vld [vmem:[%s6260_s1 + $0x18] sm:$0xff]  ;;  %103 = vmatpush.msra.mxu0 %v45_v0  ;;  %v48_v3 = vld [vmem:[%s6260_s1 + $0x10] sm:$0xff]  ;;  %v47_v5 = vld [vmem:[%s6260_s1 + $0x8] sm:$0xff]  ;;  %3604 = vset.pattern.permute.xlu2 %v4169_v6 }
   0x3   :  { %212 = vmatpush.msra.mxu1 %v49_v1  ;;  %v55_v7 = vld [vmem:[%s6262_s3 + $0x8] sm:$0xff]  ;;  %v57_v8 = vld [vmem:[%s6262_s3 + $0x18] sm:$0xff]  ;;  %v42_v9 = vld [vmem:[%s6259_s0] sm:$0xff] }
   0x4   :  { %104 = vmatpush.msra.mxu0 %v44_v2  ;;  %v46_v10 = vld [vmem:[%s6260_s1] sm:$0xff]  ;;  %65 = vperm.xlu1 %3603, %v55_v7  }
   0x5   :  { %213 = vmatpush.msra.mxu1 %v48_v3  ;;  %75 = vperm.xlu0 %3602, %v57_v8   ;;  %v50_v11 = vld [vmem:[%s6261_s2] sm:$0xff] }
   0x6   :  { %105 = vmatpush.msra.mxu0 %v43_v4  ;;  %v120_v12 = vld [vmem:[%s6263_s4] sm:$0xff] }
   0x7   :  { %214 = vmatpush.msra.mxu1 %v47_v5 }
   0x8   :  { %106 = vmatpush.msra.mxu0 %v42_v9 }
   0x9   :  { %215 = vmatpush.msra.mxu1 %v46_v10  ;;  %3414 = vmatmul.msk.f32.vlgmr.msra.gmra.mxu0 %vm78_vm0, %v50_v11 }
   0xa   :  { %3418 = vmatmul.msk.f32.vlgmr.msra.gmra.mxu1 %vm78_vm0, %v120_v12 }
   0xb   :  { %17 = vsyncpa [#allocation3], 0  ;;  %v54_v13 = vld [vmem:[%s6262_s3] sm:$0xff]  ;;  %v56_v14 = vld [vmem:[%s6262_s3 + $0x10] sm:$0xff]  ;;  %vm284_vm4 = vcmask 64512   ;;  %s4171_s18 = smov [#allocation2]  }
   0xc   :  { %60 = vperm.xlu1 %3603, %v54_v13   ;;  %v51_v15 = vld [vmem:[%s6261_s2 + $0x8] sm:$0xff]  ;;  %v128_v18 = vld [vmem:[%s6264_s5] sm:$0xff]  ;;  %v52_v19 = vld [vmem:[%s6261_s2 + $0x10] sm:$0xff]  ;;  %s3400_s3 = sshll.u32 %s4171_s18, 4  ;;  %s3402_s21 = sshll.u32 %s6271_s12, 4  ;;  %s3401_s3 = int_to_ptr.vmem [resolvable:$true] %s3400_s3  ;;  %s3403_s21 = int_to_ptr.hbm [resolvable:$true] %s3402_s21 }
   0xd   :  { %70 = vperm.xlu0 %3602, %v56_v14   ;;  %v121_v16 = vld [vmem:[%s6263_s4 + $0x8] sm:$0xff]  ;;  %v122_v20 = vld [vmem:[%s6263_s4 + $0x10] sm:$0xff]  ;;  %v131_v21 = vld [vmem:[%s6264_s5 + $0x18] sm:$0xff]  ;;  %s4173_s24 = smov 8  }
   0xe   :  { %v129_v17 = vld [vmem:[%s6264_s5 + $0x8] sm:$0xff]  ;;  %v134_v22 = vld [vmem:[%s6264_s5 + $0x30] sm:$0xff]  ;;  %153 = vperm.xlu2 %3604, %v131_v21   ;;  %v53_v24 = vld [vmem:[%s6261_s2 + $0x18] sm:$0xff] }
   0xf   :  { %v133_v23 = vld [vmem:[%s6264_s5 + $0x28] sm:$0xff]  ;;  %v123_v25 = vld [vmem:[%s6263_s4 + $0x18] sm:$0xff]  ;;  %v130_v26 = vld [vmem:[%s6264_s5 + $0x10] sm:$0xff] }
  0x10   :  { %v124_v27 = vld [vmem:[%s6263_s4 + $0x20] sm:$0xff]  ;;  %v125_v28 = vld [vmem:[%s6263_s4 + $0x28] sm:$0xff]  ;;  %v126_v29 = vld [vmem:[%s6263_s4 + $0x30] sm:$0xff] }
  0x11   :  { %3415 = vmatmul.msk.f32.gmra.mxu0 %vm78_vm0, %v51_v15  ;;  %v127_v30 = vld [vmem:[%s6263_s4 + $0x38] sm:$0xff]  ;;  %v132_v34 = vld [vmem:[%s6264_s5 + $0x20] sm:$0xff] }
  0x12   :  { %3419 = vmatmul.msk.f32.gmra.mxu1 %vm78_vm0, %v121_v16  ;;  %v135_v31 = vld [vmem:[%s6264_s5 + $0x38] sm:$0xff]  ;;  %v4370_v57 = vld [vmem:[%s6267_s8] sm:$0xff] }
  0x14   :  { %138 = vperm.xlu1 %3603, %v128_v18   ;;  %v4391_v18 = vld [vmem:[%s6268_s9] sm:$0xff] }
  0x15   :  { %143 = vperm.xlu0 %3602, %v129_v17  }
  0x16   :  { %148 = vperm.xlu2 %3604, %v130_v26  }
  0x19   :  { %3416 = vmatmul.msk.f32.gmra.mxu0 %vm78_vm0, %v52_v19 }
  0x1a   :  { %3420 = vmatmul.msk.f32.gmra.mxu1 %vm78_vm0, %v122_v20 }
  0x1c   :  { %163 = vperm.xlu1 %3603, %v133_v23  }
  0x1d   :  { %168 = vperm.xlu0 %3602, %v134_v22  }
  0x1e   :  { %173 = vperm.xlu2 %3604, %v135_v31  }
  0x21   :  { %3417 = vmatmul.msk.f32.gmra.mxu0 %vm78_vm0, %v53_v24 }
  0x22   :  { %3421 = vmatmul.msk.f32.gmra.mxu1 %vm78_vm0, %v123_v25 }
  0x26   :  { %158 = vperm.xlu2 %3604, %v132_v34  }
  0x2a   :  { %3422 = vmatmul.msk.f32.gmra.mxu1 %vm78_vm0, %v124_v27 }
  0x32   :  { %3423 = vmatmul.msk.f32.gmra.mxu1 %vm78_vm0, %v125_v28  ;;  %v4402_v28 = vld [vmem:[%s6268_s9 + $0x8] sm:$0xff] }
  0x3a   :  { %3424 = vmatmul.msk.f32.gmra.mxu1 %vm78_vm0, %v126_v29 }
  0x42   :  { %3425 = vmatmul.msk.f32.gmra.mxu1 %vm78_vm0, %v127_v30 }
  0x68   :  { %v154_v41 = vpop.permute.xlu2 %153 }
  0x70   :  { %v149_v50 = vpop.permute.xlu2 %148 }
  0x76   :  { %v66_v38 = vpop.permute.xlu1 %65 }
  0x77   :  { %v76_v37 = vpop.permute.xlu0 %75 }
  0x78   :  { %v174_v15 = vpop.permute.xlu2 %173 }
  0x7e   :  { %v61_v46 = vpop.permute.xlu1 %60 }
  0x7f   :  { %v71_v42 = vpop.permute.xlu0 %70 }
  0x80   :  { %v159_v30 = vpop.permute.xlu2 %158 }
  0x86   :  { %v108_v32 = vpop.f32.mrf.mxu0  ;;  %v139_v62 = vpop.permute.xlu1 %138 }
  0x87   :  { %v217_v33 = vpop.f32.mrf.mxu1  ;;  %v4355_v51 = vadd.f32 %v108_v32, %v61_v46  ;;  %v144_v59 = vpop.permute.xlu0 %143 }
  0x88   :  { %v4380_v63 = vadd.f32 %v217_v33, %v139_v62 }
  0x89   :  { %v246_v56 = vmul.f32 %v4355_v51, %v4355_v51 }
  0x8a   :  { %v334_v1 = vmul.f32 %v4380_v63, %v4380_v63 }
  0x8e   :  { %v111_v35 = vpop.f32.mrf.mxu0  ;;  %v164_v29 = vpop.permute.xlu1 %163 }
  0x8f   :  { %v220_v36 = vpop.f32.mrf.mxu1  ;;  %v4351_v47 = vadd.f32 %v111_v35, %v66_v38  ;;  %v169_v25 = vpop.permute.xlu0 %168  ;;  %v4423_v38 = vld [vmem:[%s6268_s9 + $0x10] sm:$0xff] }
  0x90   :  { %v4374_v60 = vadd.f32 %v220_v36, %v144_v59 }
  0x91   :  { %v247_v55 = vmul.f32 %v4351_v47, %v4351_v47 }
  0x92   :  { %v335_v0 = vmul.f32 %v4374_v60, %v4374_v60 }
  0x96   :  { %v114_v39 = vpop.f32.mrf.mxu0 }
  0x97   :  { %v223_v40 = vpop.f32.mrf.mxu1  ;;  %v4347_v44 = vadd.f32 %v114_v39, %v71_v42  ;;  %v245_v39 = vld [vmem:[%s6268_s9 + $0x18] sm:$0xff] }
  0x98   :  { %v4361_v54 = vadd.f32 %v223_v40, %v149_v50 }
  0x99   :  { %v248_v53 = vmul.f32 %v4347_v44, %v4347_v44 }
  0x9a   :  { %v336_v61 = vmul.f32 %v4361_v54, %v4361_v54 }
  0x9e   :  { %v117_v43 = vpop.f32.mrf.mxu0 }
  0x9f   :  { %v4349_v45 = vadd.f32 %v117_v43, %v76_v37  ;;  %v226_v49 = vpop.f32.mrf.mxu1 }
  0xa0   :  { %v4357_v52 = vadd.f32 %v226_v49, %v154_v41 }
  0xa1   :  { %v249_v48 = vmul.f32 %v4349_v45, %v4349_v45 }
  0xa2   :  { %v337_v58 = vmul.f32 %v4357_v52, %v4357_v52 }
  0xa3   :  { %265 = vmatpush.msra.mxu2 %v249_v48 }
  0xa5   :  { %266 = vmatpush.msra.mxu2 %v248_v53 }
  0xa7   :  { %267 = vmatpush.msra.mxu2 %v247_v55  ;;  %v229_v2 = vpop.f32.mrf.mxu1 }
  0xa8   :  { %v4414_v35 = vadd.f32 %v229_v2, %v159_v30 }
  0xa9   :  { %268 = vmatpush.msra.mxu2 %v246_v56 }
  0xaa   :  { %3426 = vmatmul.msk.f32.vlgmr.msra.gmra.mxu2 %vm78_vm0, %v4370_v57  ;;  %v402_v37 = vmul.f32 %v4414_v35, %v4414_v35 }
  0xab   :  { %350 = vmatpush.msrb.mxu2 %v337_v58 }
  0xad   :  { %351 = vmatpush.msrb.mxu2 %v336_v61 }
  0xaf   :  { %352 = vmatpush.msrb.mxu2 %v335_v0  ;;  %v232_v5 = vpop.f32.mrf.mxu1 }
  0xb0   :  { %v4404_v32 = vadd.f32 %v232_v5, %v164_v29  ;;  %v502_v5 = vld [vmem:[%s6269_s10] sm:$0x1] }
  0xb1   :  { %353 = vmatpush.msrb.mxu2 %v334_v1  ;;  %vm1207_vm11 = vcmp.eq.s32.totalorder %v502_v5, 2  ;;  %vm1551_vm12 = vcmp.eq.s32.totalorder %v502_v5, 3  ;;  %vm1895_vm13 = vcmp.eq.s32.totalorder %v502_v5, 4  ;;  %vm2239_vm14 = vcmp.eq.s32.totalorder %v502_v5, 5 }
  0xb2   :  { %3431 = vmatmul.msk.f32.vlgmr.msrb.gmra.mxu2 %vm78_vm0, %v4370_v57  ;;  %v403_v36 = vmul.f32 %v4404_v32, %v4404_v32  ;;  %vm2583_vm15 = vcmp.eq.s32.totalorder %v502_v5, 6 }
  0xb7   :  { %v235_v11 = vpop.f32.mrf.mxu1 }
  0xb8   :  { %v4397_v27 = vadd.f32 %v235_v11, %v169_v25 }
  0xba   :  { %v404_v34 = vmul.f32 %v4397_v27, %v4397_v27 }
  0xbf   :  { %v238_v21 = vpop.f32.mrf.mxu1 }
  0xc0   :  { %v4395_v24 = vadd.f32 %v238_v21, %v174_v15 }
  0xc2   :  { %v405_v33 = vmul.f32 %v4395_v24, %v4395_v24 }
 0x12d   :  { %v270_v3 = vpop.f32.mrf.mxu2 }
 0x12e   :  { %v273_v4 = vmax.f32 %v270_v3, 1e-24 }
 0x130   :  { %3605 = vrsqrt.f32 %v273_v4  ;;  %vm280_vm2 = vweird.f32 %v273_v4 }
 0x135   :  { %v355_v6 = vpop.f32.mrf.mxu2 }
 0x136   :  { %v3606_v7 = vpop.eup %3605  ;;  %v358_v8 = vmax.f32 %v355_v6, 1e-24  ;;  %v4170_v6 = vmov 0.0  }
 0x137   :  { %v275_v9 = vmul.f32 %v3606_v7, %v273_v4  ;;  %vm281_vm1 = vweird.f32 %v3606_v7  ;;  %v4488_v11 = vsel %vm2583_vm15, 1.0, %v4170_v6 }
 0x138   :  { %3607 = vrsqrt.f32 %v358_v8  ;;  %vm282_vm3 = vmor %vm280_vm2, %vm281_vm1  ;;  %vm365_vm5 = vweird.f32 %v358_v8  ;;  %6369 = vst [vmem:[#allocation5_spill] sm:$0xff] %v4488_v11  ;;  %vm2927_vm1 = vcmp.eq.s32.totalorder %v502_v5, 7  ;;  %vm519_vm2 = vcmp.eq.s32.totalorder %v502_v5, 0 }
 0x139   :  { %v276_v10 = vmul.f32 %v3606_v7, %v275_v9  ;;  %v4484_v9 = vsel %vm1895_vm13, 1.0, %v4170_v6 }
 0x13b   :  { %v277_v12 = vmul.f32 0.5, %v276_v10  ;;  %v4486_v10 = vsel %vm2239_vm14, 1.0, %v4170_v6 }
 0x13d   :  { %v278_v13 = vsub.f32 1.5, %v277_v12  ;;  %v4490_v12 = vsel %vm2927_vm1, 1.0, %v4170_v6 }
 0x13e   :  { %v3608_v14 = vpop.eup %3607  ;;  %6370 = vst [vmem:[#allocation6_spill] sm:$0xff] %v4490_v12 }
 0x13f   :  { %v360_v16 = vmul.f32 %v3608_v14, %v358_v8  ;;  %v279_v17 = vmul.f32 %v3606_v7, %v278_v13  ;;  %vm366_vm6 = vweird.f32 %v3608_v14  ;;  %v4482_v8 = vsel %vm1551_vm12, 1.0, %v4170_v6 }
 0x140   :  { %vm367_vm7 = vmor %vm365_vm5, %vm366_vm6  ;;  %v3441_v13 = vsel %vm519_vm2, 1.0, %v4170_v6 }
 0x141   :  { %v361_v19 = vmul.f32 %v3608_v14, %v360_v16  ;;  %v283_v20 = vsel %vm282_vm3, %v3606_v7, %v279_v17  ;;  %v4480_v7 = vsel %vm1207_vm11, 1.0, %v4170_v6  ;;  %vm863_vm3 = vcmp.eq.s32.totalorder %v502_v5, 1 }
 0x142   :  { %312 = vmatpush.msra.mxu3 %v283_v20  ;;  %v4492_v15 = vperm.slane %v3441_v13, 0 }
 0x143   :  { %v362_v22 = vmul.f32 0.5, %v361_v19  ;;  %3427 = vmatmul.msk.f32.vlgmr.msra.gmra.mxu3 %vm284_vm4, %v4391_v18 }
 0x144   :  { %6371 = vst [vmem:[#allocation7_spill] sm:$0xff] %v4492_v15 }
 0x145   :  { %v363_v23 = vsub.f32 1.5, %v362_v22 }
 0x147   :  { %v364_v26 = vmul.f32 %v3608_v14, %v363_v23 }
 0x149   :  { %v368_v31 = vsel %vm367_vm7, %v3608_v14, %v364_v26  ;;  %v3458_v14 = vsel %vm863_vm3, 1.0, %v4170_v6 }
 0x14a   :  { %384 = vmatpush.msra.mxu2 %v368_v31  ;;  %v4494_v16 = vperm.slane %v3458_v14, 0 }
 0x14b   :  { %3428 = vmatmul.msk.f32.gmra.mxu3 %vm284_vm4, %v4402_v28  ;;  %3432 = vmatmul.msk.f32.vlgmr.msra.gmra.mxu2 %vm284_vm4, %v4391_v18 }
 0x14c   :  { %418 = vmatpush.msrb.mxu2 %v405_v33  ;;  %6372 = vst [vmem:[#allocation8_spill] sm:$0xff] %v4494_v16 }
 0x14e   :  { %419 = vmatpush.msrb.mxu2 %v404_v34 }
 0x150   :  { %420 = vmatpush.msrb.mxu2 %v403_v36 }
 0x152   :  { %421 = vmatpush.msrb.mxu2 %v402_v37 }
 0x153   :  { %3429 = vmatmul.msk.f32.gmra.mxu3 %vm284_vm4, %v4423_v38  ;;  %3433 = vmatmul.msk.f32.gmra.mxu2 %vm284_vm4, %v4402_v28 }
 0x15b   :  { %3430 = vmatmul.msk.f32.gmra.mxu3 %vm284_vm4, %v245_v39  ;;  %3434 = vmatmul.msk.f32.gmra.mxu2 %vm284_vm4, %v4423_v38 }
 0x163   :  { %3435 = vmatmul.msk.f32.gmra.mxu2 %vm284_vm4, %v245_v39 }
 0x16b   :  { %3436 = vmatmul.msk.f32.vlgmr.msrb.gmra.mxu2 %vm78_vm0, %v4370_v57 }
 0x1c6   :  { %v314_v40 = vpop.f32.mrf.mxu3 }
 0x1c7   :  { %v326_v41 = vmul.f32 %v314_v40, %v4355_v51 }
 0x1c9   :  { %v330_v42 = vmul.f32 0.5, %v326_v41 }
 0x1cb   :  { %470 = vxpose.xlu0.b32.start [1/4] (short) %v330_v42, 128 }
 0x1ce   :  { %v317_v43 = vpop.f32.mrf.mxu3  ;;  %v386_v46 = vpop.f32.mrf.mxu2 }
 0x1cf   :  { %v327_v48 = vmul.f32 %v317_v43, %v4351_v47 }
 0x1d1   :  { %v331_v49 = vmul.f32 0.5, %v327_v48 }
 0x1d3   :  { %471 = vxpose.xlu0.b32.cont [2/4] (short) %v331_v49, 128 }
 0x1d6   :  { %v320_v50 = vpop.f32.mrf.mxu3  ;;  %v389_v53 = vpop.f32.mrf.mxu2 }
 0x1d7   :  { %v328_v55 = vmul.f32 %v320_v50, %v4347_v44  ;;  %v4450_v0 = vmul.f32 %v389_v53, %v4374_v60  ;;  %v4454_v44 = vmul.f32 %v386_v46, %v4380_v63 }
 0x1d9   :  { %v332_v56 = vmul.f32 0.5, %v328_v55 }
 0x1db   :  { %472 = vxpose.xlu0.b32.cont [3/4] (short) %v332_v56, 128 }
 0x1de   :  { %v323_v58 = vpop.f32.mrf.mxu3  ;;  %v392_v59 = vpop.f32.mrf.mxu2 }
 0x1df   :  { %v329_v57 = vmul.f32 %v323_v58, %v4349_v45  ;;  %v4446_v47 = vmul.f32 %v392_v59, %v4361_v54 }
 0x1e1   :  { %v333_v61 = vmul.f32 0.5, %v329_v57 }
 0x1e3   :  { %473 = vxpose.xlu0.b32.end [4/4] (short) %v333_v61, 128 }
 0x1e6   :  { %v395_v51 = vpop.f32.mrf.mxu2 }
 0x1e7   :  { %v4443_v62 = vmul.f32 %v395_v51, %v4357_v52 }
 0x1e9   :  { %601 = vmatpush.msrb.mxu3 %v4443_v62 }
 0x1eb   :  { %602 = vmatpush.msrb.mxu3 %v4446_v47 }
 0x1ed   :  { %603 = vmatpush.msrb.mxu3 %v4450_v0 }
 0x1ee   :  { %v423_v45 = vpop.f32.mrf.mxu2 }
 0x1ef   :  { %v426_v1 = vmax.f32 %v423_v45, 1e-24  ;;  %604 = vmatpush.msrb.mxu3 %v4454_v44 }
 0x1f1   :  { %1289 = vmatpush.msra.mxu3 %v4443_v62  ;;  %3609 = vrsqrt.f32 %v426_v1  ;;  %vm433_vm8 = vweird.f32 %v426_v1 }
 0x1f3   :  { %1290 = vmatpush.msra.mxu3 %v4446_v47 }
 0x1f5   :  { %1291 = vmatpush.msra.mxu3 %v4450_v0 }
 0x1f7   :  { %1292 = vmatpush.msra.mxu3 %v4454_v44  ;;  %v3610_v52 = vpop.eup %3609 }
 0x1f8   :  { %v428_v54 = vmul.f32 %v3610_v52, %v426_v1  ;;  %vm434_vm9 = vweird.f32 %v3610_v52 }
 0x1f9   :  { %vm435_vm10 = vmor %vm433_vm8, %vm434_vm9 }
 0x1fa   :  { %v429_v60 = vmul.f32 %v3610_v52, %v428_v54 }
 0x1fc   :  { %v430_v63 = vmul.f32 0.5, %v429_v60 }
 0x1fe   :  { %v431_v2 = vsub.f32 1.5, %v430_v63 }
 0x200   :  { %v432_v3 = vmul.f32 %v3610_v52, %v431_v2 }
 0x202   :  { %v436_v4 = vsel %vm435_vm10, %v3610_v52, %v432_v3 }
 0x203   :  { %452 = vmatpush.msrb.mxu0 %v436_v4 }
 0x204   :  { %3437 = vmatmul.msk.f32.vlgmr.msrb.gmra.mxu0 %vm284_vm4, %v4391_v18 }
 0x205   :  { %945 = vmatpush.msra.mxu0 %v4443_v62 }
 0x207   :  { %946 = vmatpush.msra.mxu0 %v4446_v47 }
 0x209   :  { %947 = vmatpush.msra.mxu0 %v4450_v0 }
 0x20b   :  { %948 = vmatpush.msra.mxu0 %v4454_v44 }
 0x20c   :  { %3438 = vmatmul.msk.f32.gmra.mxu0 %vm284_vm4, %v4402_v28 }
 0x20d   :  { %1633 = vmatpush.msrb.mxu0 %v4443_v62 }
 0x20f   :  { %1634 = vmatpush.msrb.mxu0 %v4446_v47 }
 0x211   :  { %1635 = vmatpush.msrb.mxu0 %v4450_v0 }
 0x213   :  { %1636 = vmatpush.msrb.mxu0 %v4454_v44 }
 0x214   :  { %3439 = vmatmul.msk.f32.gmra.mxu0 %vm284_vm4, %v4423_v38 }
 0x21c   :  { %3440 = vmatmul.msk.f32.gmra.mxu0 %vm284_vm4, %v245_v39 }
 0x26f   :  { %v4496_v17 = vpop.trf.xlu0 }
 0x270   :  { %6373 = vst [vmem:[#allocation9_spill] sm:$0xff] %v4496_v17  ;;  %v525_v18 = vmul.f32 %v4492_v15, %v4496_v17  ;;  %v869_v19 = vmul.f32 %v4494_v16, %v4496_v17 }
 0x272   :  { %3442 = vmatmul.msk.f32.vlgmr.msrb.gmra.mxu3 %vm78_vm0, %v525_v18  ;;  %3459 = vmatmul.msk.f32.vlgmr.msra.gmra.mxu0 %vm78_vm0, %v869_v19 }
 0x273   :  { %1977 = vmatpush.msrb.mxu3 %v4443_v62  ;;  %2321 = vmatpush.msra.mxu0 %v4443_v62 }
 0x275   :  { %1978 = vmatpush.msrb.mxu3 %v4446_v47  ;;  %2322 = vmatpush.msra.mxu0 %v4446_v47 }
 0x277   :  { %1979 = vmatpush.msrb.mxu3 %v4450_v0  ;;  %2323 = vmatpush.msra.mxu0 %v4450_v0  ;;  %v4510_v20 = vpop.trf.xlu0 }
 0x278   :  { %6374 = vst [vmem:[#allocation10_spill] sm:$0xff] %v4510_v20  ;;  %v526_v21 = vmul.f32 %v4492_v15, %v4510_v20  ;;  %v870_v22 = vmul.f32 %v4494_v16, %v4510_v20 }
 0x279   :  { %1980 = vmatpush.msrb.mxu3 %v4454_v44  ;;  %2324 = vmatpush.msra.mxu0 %v4454_v44 }
 0x27a   :  { %3443 = vmatmul.msk.f32.gmra.mxu3 %vm78_vm0, %v526_v21  ;;  %3460 = vmatmul.msk.f32.gmra.mxu0 %vm78_vm0, %v870_v22 }
 0x27f   :  { %v4520_v23 = vpop.trf.xlu0 }
 0x280   :  { %v527_v25 = vmul.f32 %v4492_v15, %v4520_v23  ;;  %v871_v26 = vmul.f32 %v4494_v16, %v4520_v23 }
 0x281   :  { %v454_v28 = vpop.f32.mrf.mxu0 }
 0x282   :  { %3444 = vmatmul.msk.f32.gmra.mxu3 %vm78_vm0, %v527_v25  ;;  %3461 = vmatmul.msk.f32.gmra.mxu0 %vm78_vm0, %v871_v26  ;;  %v4661_v25 = vperm.slane %v4480_v7, 0  ;;  %v4664_v26 = vperm.slane %v4482_v8, 0 }
 0x284   :  { %6381 = vst [vmem:[#allocation17_spill] sm:$0xff] %v4661_v25 }
 0x285   :  { %6382 = vst [vmem:[#allocation18_spill] sm:$0xff] %v4664_v26 }
 0x287   :  { %v4528_v29 = vpop.trf.xlu0 }
 0x288   :  { %6375 = vst [vmem:[#allocation11_spill] sm:$0xff] %v4528_v29  ;;  %v528_v30 = vmul.f32 %v4492_v15, %v4528_v29  ;;  %v872_v31 = vmul.f32 %v4494_v16, %v4528_v29 }
 0x289   :  { %v457_v33 = vpop.f32.mrf.mxu0 }
 0x28a   :  { %3445 = vmatmul.msk.f32.gmra.mxu3 %vm78_vm0, %v528_v30  ;;  %3462 = vmatmul.msk.f32.gmra.mxu0 %vm78_vm0, %v872_v31  ;;  %v1213_v30 = vmul.f32 %v4661_v25, %v4496_v17  ;;  %v1557_v31 = vmul.f32 %v4664_v26, %v4496_v17 }
 0x28f   :  { %v4536_v34 = vpop.trf.xlu0 }
 0x290   :  { %v529_v36 = vmul.f32 %v4492_v15, %v4536_v34  ;;  %v873_v37 = vmul.f32 %v4494_v16, %v4536_v34 }
 0x291   :  { %v460_v38 = vpop.f32.mrf.mxu0 }
 0x292   :  { %3446 = vmatmul.msk.f32.gmra.mxu3 %vm78_vm0, %v529_v36  ;;  %3463 = vmatmul.msk.f32.gmra.mxu0 %vm78_vm0, %v873_v37  ;;  %v4558_v46 = vmul.f32 %v460_v38, %v4397_v27  ;;  %v4576_v27 = vmul.f32 %v454_v28, %v4414_v35  ;;  %v1214_v36 = vmul.f32 %v4661_v25, %v4510_v20 }
 0x293   :  { %v1558_v37 = vmul.f32 %v4664_v26, %v4510_v20 }
 0x297   :  { %v4544_v39 = vpop.trf.xlu0 }
 0x298   :  { %v530_v40 = vmul.f32 %v4492_v15, %v4544_v39  ;;  %v874_v41 = vmul.f32 %v4494_v16, %v4544_v39 }
 0x299   :  { %v463_v42 = vpop.f32.mrf.mxu0 }
 0x29a   :  { %3447 = vmatmul.msk.f32.gmra.mxu3 %vm78_vm0, %v530_v40  ;;  %3464 = vmatmul.msk.f32.gmra.mxu0 %vm78_vm0, %v874_v41  ;;  %v4553_v43 = vmul.f32 %v463_v42, %v4395_v24  ;;  %v4571_v24 = vmul.f32 %v457_v33, %v4404_v32  ;;  %v1559_v42 = vmul.f32 %v4664_v26, %v4520_v23 }
 0x29c   :  { %778 = vmatpush.xpose.msra.mxu2 %v4553_v43  ;;  %1122 = vmatpush.xpose.msrb.mxu1 %v4553_v43 }
 0x29f   :  { %v4560_v48 = vpop.trf.xlu0 }
 0x2a0   :  { %v531_v49 = vmul.f32 %v4492_v15, %v4560_v48  ;;  %v875_v50 = vmul.f32 %v4494_v16, %v4560_v48  ;;  %779 = vmatpush.xpose.msra.mxu2 %v4558_v46  ;;  %1123 = vmatpush.xpose.msrb.mxu1 %v4558_v46 }
 0x2a2   :  { %3448 = vmatmul.msk.f32.gmra.mxu3 %vm78_vm0, %v531_v49  ;;  %3465 = vmatmul.msk.f32.gmra.mxu0 %vm78_vm0, %v875_v50 }
 0x2a4   :  { %780 = vmatpush.xpose.msra.mxu2 %v4571_v24  ;;  %1124 = vmatpush.xpose.msrb.mxu1 %v4571_v24 }
 0x2a7   :  { %v4578_v53 = vpop.trf.xlu0 }
 0x2a8   :  { %v532_v55 = vmul.f32 %v4492_v15, %v4578_v53  ;;  %v876_v56 = vmul.f32 %v4494_v16, %v4578_v53  ;;  %781 = vmatpush.xpose.msra.mxu2 %v4576_v27  ;;  %1125 = vmatpush.xpose.msrb.mxu1 %v4576_v27 }
 0x2aa   :  { %3449 = vmatmul.msk.f32.gmra.mxu3 %vm78_vm0, %v532_v55  ;;  %3466 = vmatmul.msk.f32.gmra.mxu0 %vm78_vm0, %v876_v56 }
 0x2ac   :  { %1466 = vmatpush.xpose.msrb.mxu2 %v4553_v43  ;;  %1810 = vmatpush.xpose.msra.mxu1 %v4553_v43 }
 0x2af   :  { %v4592_v32 = vpop.trf.xlu0 }
 0x2b0   :  { %1467 = vmatpush.xpose.msrb.mxu2 %v4558_v46  ;;  %1811 = vmatpush.xpose.msra.mxu1 %v4558_v46  ;;  %v533_v35 = vmul.f32 %v4492_v15, %v4592_v32  ;;  %v877_v58 = vmul.f32 %v4494_v16, %v4592_v32 }
 0x2b2   :  { %3450 = vmatmul.msk.f32.gmra.mxu3 %vm78_vm0, %v533_v35  ;;  %3467 = vmatmul.msk.f32.gmra.mxu0 %vm78_vm0, %v877_v58  ;;  %v4704_v35 = vld [vmem:[%s6270_s11 + $0x8] sm:$0xff] }
 0x2b4   :  { %1468 = vmatpush.xpose.msrb.mxu2 %v4571_v24  ;;  %1812 = vmatpush.xpose.msra.mxu1 %v4571_v24 }
 0x2b7   :  { %v4604_v59 = vpop.trf.xlu0 }
 0x2b8   :  { %1469 = vmatpush.xpose.msrb.mxu2 %v4576_v27  ;;  %1813 = vmatpush.xpose.msra.mxu1 %v4576_v27  ;;  %v534_v57 = vmul.f32 %v4492_v15, %v4604_v59  ;;  %v878_v61 = vmul.f32 %v4494_v16, %v4604_v59 }
 0x2ba   :  { %3451 = vmatmul.msk.f32.gmra.mxu3 %vm78_vm0, %v534_v57  ;;  %3468 = vmatmul.msk.f32.gmra.mxu0 %vm78_vm0, %v878_v61  ;;  %v1216_v61 = vmul.f32 %v4661_v25, %v4528_v29 }
 0x2bf   :  { %v4612_v51 = vpop.trf.xlu0 }
 0x2c0   :  { %v535_v45 = vmul.f32 %v4492_v15, %v4612_v51  ;;  %v879_v1 = vmul.f32 %v4494_v16, %v4612_v51 }
 0x2c2   :  { %3452 = vmatmul.msk.f32.gmra.mxu3 %vm78_vm0, %v535_v45  ;;  %3469 = vmatmul.msk.f32.gmra.mxu0 %vm78_vm0, %v879_v1  ;;  %v1560_v45 = vmul.f32 %v4664_v26, %v4528_v29 }
 0x2c7   :  { %v4620_v52 = vpop.trf.xlu0 }
 0x2c8   :  { %6376 = vst [vmem:[#allocation12_spill] sm:$0xff] %v4620_v52  ;;  %v536_v54 = vmul.f32 %v4492_v15, %v4620_v52  ;;  %v880_v60 = vmul.f32 %v4494_v16, %v4620_v52 }
 0x2ca   :  { %3453 = vmatmul.msk.f32.gmra.mxu3 %vm78_vm0, %v536_v54  ;;  %3470 = vmatmul.msk.f32.gmra.mxu0 %vm78_vm0, %v880_v60  ;;  %v4719_v60 = vld [vmem:[%s6270_s11 + $0x10] sm:$0xff] }
 0x2cf   :  { %v4628_v63 = vpop.trf.xlu0 }
 0x2d0   :  { %6377 = vst [vmem:[#allocation13_spill] sm:$0xff] %v4628_v63  ;;  %v537_v2 = vmul.f32 %v4492_v15, %v4628_v63  ;;  %v881_v3 = vmul.f32 %v4494_v16, %v4628_v63 }
 0x2d2   :  { %3454 = vmatmul.msk.f32.gmra.mxu3 %vm78_vm0, %v537_v2  ;;  %3471 = vmatmul.msk.f32.gmra.mxu0 %vm78_vm0, %v881_v3 }
 0x2d7   :  { %v4636_v4 = vpop.trf.xlu0 }
 0x2d8   :  { %6378 = vst [vmem:[#allocation14_spill] sm:$0xff] %v4636_v4  ;;  %v538_v5 = vmul.f32 %v4492_v15, %v4636_v4  ;;  %v882_v6 = vmul.f32 %v4494_v16, %v4636_v4 }
 0x2da   :  { %3455 = vmatmul.msk.f32.gmra.mxu3 %vm78_vm0, %v538_v5  ;;  %3472 = vmatmul.msk.f32.gmra.mxu0 %vm78_vm0, %v882_v6 }
 0x2df   :  { %v4644_v13 = vpop.trf.xlu0 }
 0x2e0   :  { %6379 = vst [vmem:[#allocation15_spill] sm:$0xff] %v4644_v13  ;;  %v539_v14 = vmul.f32 %v4492_v15, %v4644_v13  ;;  %v883_v18 = vmul.f32 %v4494_v16, %v4644_v13 }
 0x2e2   :  { %3456 = vmatmul.msk.f32.gmra.mxu3 %vm78_vm0, %v539_v14  ;;  %3473 = vmatmul.msk.f32.gmra.mxu0 %vm78_vm0, %v883_v18 }
 0x2e7   :  { %v4652_v19 = vpop.trf.xlu0 }
 0x2e8   :  { %6380 = vst [vmem:[#allocation16_spill] sm:$0xff] %v4652_v19  ;;  %v540_v21 = vmul.f32 %v4492_v15, %v4652_v19  ;;  %v884_v22 = vmul.f32 %v4494_v16, %v4652_v19 }
 0x2ea   :  { %3457 = vmatmul.msk.f32.gmra.mxu3 %vm78_vm0, %v540_v21  ;;  %3474 = vmatmul.msk.f32.gmra.mxu0 %vm78_vm0, %v884_v22  ;;  %v1217_v22 = vmul.f32 %v4661_v25, %v4536_v34 }
 0x2ef   :  { %v950_v28 = vpop.f32.mrf.mxu0 }
 0x2f0   :  { %v998_v49 = vmul.f32 1.442695, %v950_v28  ;;  %v1561_v28 = vmul.f32 %v4664_v26, %v4536_v34 }
 0x2f2   :  { %3476 = vmatmul.msk.f32.vlgmr.msra.gmra.mxu3 %vm78_vm0, %v1213_v30  ;;  %3493 = vmatmul.msk.f32.vlgmr.msrb.gmra.mxu0 %vm78_vm0, %v1557_v31 }
 0x2f3   :  { %2665 = vmatpush.msra.mxu3 %v4443_v62  ;;  %3009 = vmatpush.msrb.mxu0 %v4443_v62 }
 0x2f5   :  { %v606_v7 = vpop.f32.mrf.mxu3  ;;  %2666 = vmatpush.msra.mxu3 %v4446_v47  ;;  %3010 = vmatpush.msrb.mxu0 %v4446_v47 }
 0x2f6   :  { %v654_v8 = vmul.f32 1.442695, %v606_v7  ;;  %v4738_v7 = vld [vmem:[%s6270_s11 + $0x18] sm:$0xff] }
 0x2f7   :  { %v953_v33 = vpop.f32.mrf.mxu0  ;;  %2667 = vmatpush.msra.mxu3 %v4450_v0  ;;  %3011 = vmatpush.msrb.mxu0 %v4450_v0  ;;  %v4689_v0 = vld [vmem:[%s6270_s11] sm:$0xff] }
 0x2f8   :  { %3611 = vpow2.f32 %v654_v8  ;;  %v1000_v1 = vmul.f32 1.442695, %v953_v33 }
 0x2f9   :  { %2668 = vmatpush.msra.mxu3 %v4454_v44  ;;  %3012 = vmatpush.msrb.mxu0 %v4454_v44  ;;  %v1215_v44 = vmul.f32 %v4661_v25, %v4520_v23 }
 0x2fa   :  { %3477 = vmatmul.msk.f32.gmra.mxu3 %vm78_vm0, %v1214_v36  ;;  %3494 = vmatmul.msk.f32.gmra.mxu0 %vm78_vm0, %v1558_v37 }
 0x2fd   :  { %v609_v62 = vpop.f32.mrf.mxu3 }
 0x2fe   :  { %v3612_v47 = vpop.eup %3611  ;;  %v656_v38 = vmul.f32 1.442695, %v609_v62 }
 0x2ff   :  { %v956_v40 = vpop.f32.mrf.mxu0  ;;  %v4692_v41 = vmul.f32 %v3612_v47, %v4689_v0 }
 0x300   :  { %3613 = vpow2.f32 %v656_v38  ;;  %v1002_v21 = vmul.f32 1.442695, %v956_v40  ;;  %v1218_v38 = vmul.f32 %v4661_v25, %v4544_v39  ;;  %v1562_v40 = vmul.f32 %v4664_v26, %v4544_v39 }
 0x301   :  { %702 = vadd.xlane.f32.xlu1 %v4692_v41  ;;  %3615 = vpow2.f32 %v998_v49 }
 0x302   :  { %3478 = vmatmul.msk.f32.gmra.mxu3 %vm78_vm0, %v1215_v44  ;;  %3495 = vmatmul.msk.f32.gmra.mxu0 %vm78_vm0, %v1559_v42 }
 0x305   :  { %v612_v50 = vpop.f32.mrf.mxu3 }
 0x306   :  { %v3614_v55 = vpop.eup %3613  ;;  %v658_v56 = vmul.f32 1.442695, %v612_v50  ;;  %v4757_v50 = vld [vmem:[%s6270_s11 + $0x20] sm:$0xff] }
 0x307   :  { %v959_v58 = vpop.f32.mrf.mxu0  ;;  %v4707_v57 = vmul.f32 %v3614_v55, %v4704_v35  ;;  %v3616_v54 = vpop.eup %3615 }
 0x308   :  { %3617 = vpow2.f32 %v658_v56  ;;  %v4722_v14 = vmul.f32 %v3616_v54, %v4689_v0  ;;  %v1004_v30 = vmul.f32 1.442695, %v959_v58 }
 0x309   :  { %704 = vadd.xlane.f32.xlu2 %v4707_v57  ;;  %3619 = vpow2.f32 %v1000_v1 }
 0x30a   :  { %3479 = vmatmul.msk.f32.gmra.mxu3 %vm78_vm0, %v1216_v61  ;;  %3496 = vmatmul.msk.f32.gmra.mxu0 %vm78_vm0, %v1560_v45 }
 0x30d   :  { %v615_v2 = vpop.f32.mrf.mxu3 }
 0x30e   :  { %v3618_v3 = vpop.eup %3617  ;;  %v660_v5 = vmul.f32 1.442695, %v615_v2  ;;  %v1219_v2 = vmul.f32 %v4661_v25, %v4560_v48 }
 0x30f   :  { %v962_v6 = vpop.f32.mrf.mxu0  ;;  %v4725_v18 = vmul.f32 %v3618_v3, %v4719_v60  ;;  %v3620_v31 = vpop.eup %3619  ;;  %v1563_v3 = vmul.f32 %v4664_v26, %v4560_v48 }
 0x310   :  { %3621 = vpow2.f32 %v660_v5  ;;  %v4741_v62 = vmul.f32 %v3620_v31, %v4704_v35  ;;  %v1006_v44 = vmul.f32 1.442695, %v962_v6 }
 0x311   :  { %1046 = vadd.xlane.f32.xlu2 %v4722_v14  ;;  %706 = vadd.xlane.f32.xlu1 %v4725_v18  ;;  %3623 = vpow2.f32 %v1002_v21  ;;  %v4780_v21 = vld [vmem:[%s6270_s11 + $0x28] sm:$0xff] }
 0x312   :  { %3480 = vmatmul.msk.f32.gmra.mxu3 %vm78_vm0, %v1217_v22  ;;  %3497 = vmatmul.msk.f32.gmra.mxu0 %vm78_vm0, %v1561_v28  ;;  %3625 = vpow2.f32 %v1004_v30 }
 0x315   :  { %v618_v8 = vpop.f32.mrf.mxu3 }
 0x316   :  { %v3622_v33 = vpop.eup %3621  ;;  %v662_v36 = vmul.f32 1.442695, %v618_v8 }
 0x317   :  { %v965_v37 = vpop.f32.mrf.mxu0  ;;  %v4744_v47 = vmul.f32 %v3622_v33, %v4738_v7  ;;  %v3624_v42 = vpop.eup %3623 }
 0x318   :  { %3627 = vpow2.f32 %v662_v36  ;;  %v3626_v49 = vpop.eup %3625  ;;  %v4760_v45 = vmul.f32 %v3624_v42, %v4719_v60  ;;  %v1008_v5 = vmul.f32 1.442695, %v965_v37  ;;  %v1220_v36 = vmul.f32 %v4661_v25, %v4578_v53 }
 0x319   :  { %1048 = vadd.xlane.f32.xlu2 %v4741_v62  ;;  %708 = vadd.xlane.f32.xlu1 %v4744_v47  ;;  %3629 = vpow2.f32 %v1006_v44  ;;  %v4763_v1 = vmul.f32 %v3626_v49, %v4738_v7  ;;  %v1564_v37 = vmul.f32 %v4664_v26, %v4578_v53  ;;  %v4799_v44 = vld [vmem:[%s6270_s11 + $0x30] sm:$0xff] }
 0x31a   :  { %3481 = vmatmul.msk.f32.gmra.mxu3 %vm78_vm0, %v1218_v38  ;;  %3498 = vmatmul.msk.f32.gmra.mxu0 %vm78_vm0, %v1562_v40 }
 0x31d   :  { %v621_v55 = vpop.f32.mrf.mxu3 }
 0x31e   :  { %v3628_v56 = vpop.eup %3627  ;;  %v664_v58 = vmul.f32 1.442695, %v621_v55 }
 0x31f   :  { %v968_v61 = vpop.f32.mrf.mxu0  ;;  %v4766_v54 = vmul.f32 %v3628_v56, %v4757_v50  ;;  %v3630_v6 = vpop.eup %3629 }
 0x320   :  { %3631 = vpow2.f32 %v664_v58  ;;  %v4783_v31 = vmul.f32 %v3630_v6, %v4757_v50  ;;  %v1010_v38 = vmul.f32 1.442695, %v968_v61 }
 0x321   :  { %1050 = vadd.xlane.f32.xlu2 %v4760_v45  ;;  %1052 = vadd.xlane.f32.xlu1 %v4763_v1  ;;  %3633 = vpow2.f32 %v1008_v5 }
 0x322   :  { %710 = vadd.xlane.f32.xlu0 %v4766_v54  ;;  %3482 = vmatmul.msk.f32.gmra.mxu3 %vm78_vm0, %v1219_v2  ;;  %v1221_v2 = vmul.f32 %v4661_v25, %v4592_v32 }
 0x323   :  { %3499 = vmatmul.msk.f32.gmra.mxu0 %vm78_vm0, %v1563_v3  ;;  %v1565_v3 = vmul.f32 %v4664_v26, %v4592_v32 }
 0x325   :  { %v624_v22 = vpop.f32.mrf.mxu3 }
 0x326   :  { %v3632_v28 = vpop.eup %3631  ;;  %v666_v30 = vmul.f32 1.442695, %v624_v22  ;;  %v4818_v22 = vld [vmem:[%s6270_s11 + $0x38] sm:$0xff] }
 0x327   :  { %v4786_v8 = vmul.f32 %v3632_v28, %v4780_v21  ;;  %v971_v33 = vpop.f32.mrf.mxu0  ;;  %v3634_v40 = vpop.eup %3633 }
 0x328   :  { %3635 = vpow2.f32 %v666_v30  ;;  %v4802_v56 = vmul.f32 %v3634_v40, %v4780_v21  ;;  %v1012_v5 = vmul.f32 1.442695, %v971_v33  ;;  %v1222_v40 = vmul.f32 %v4661_v25, %v4604_v59 }
 0x329   :  { %1054 = vadd.xlane.f32.xlu1 %v4783_v31  ;;  %712 = vadd.xlane.f32.xlu2 %v4786_v8  ;;  %3637 = vpow2.f32 %v1010_v38 }
 0x32a   :  { %3483 = vmatmul.msk.f32.gmra.mxu3 %vm78_vm0, %v1220_v36 }
 0x32b   :  { %3500 = vmatmul.msk.f32.gmra.mxu0 %vm78_vm0, %v1564_v37 }
 0x32d   :  { %v627_v49 = vpop.f32.mrf.mxu3 }
 0x32e   :  { %v3636_v42 = vpop.eup %3635  ;;  %v668_v55 = vmul.f32 1.442695, %v627_v49 }
 0x32f   :  { %v4805_v58 = vmul.f32 %v3636_v42, %v4799_v44  ;;  %v974_v61 = vpop.f32.mrf.mxu0  ;;  %v3638_v6 = vpop.eup %3637  ;;  %v1566_v42 = vmul.f32 %v4664_v26, %v4604_v59 }
 0x330   :  { %3639 = vpow2.f32 %v668_v55  ;;  %v4821_v37 = vmul.f32 %v3638_v6, %v4799_v44  ;;  %v1014_v49 = vmul.f32 1.442695, %v974_v61 }
 0x331   :  { %1056 = vadd.xlane.f32.xlu1 %v4802_v56  ;;  %714 = vadd.xlane.f32.xlu2 %v4805_v58  ;;  %3641 = vpow2.f32 %v1012_v5 }
 0x332   :  { %3484 = vmatmul.msk.f32.gmra.mxu3 %vm78_vm0, %v1221_v2  ;;  %v4837_v2 = vld [vmem:[%s6270_s11 + $0x40] sm:$0xff] }
 0x333   :  { %3501 = vmatmul.msk.f32.gmra.mxu0 %vm78_vm0, %v1565_v3 }
 0x335   :  { %v630_v28 = vpop.f32.mrf.mxu3 }
 0x336   :  { %v3640_v30 = vpop.eup %3639  ;;  %v670_v36 = vmul.f32 1.442695, %v630_v28 }
 0x337   :  { %v977_v38 = vpop.f32.mrf.mxu0  ;;  %v4824_v33 = vmul.f32 %v3640_v30, %v4818_v22  ;;  %v3642_v55 = vpop.eup %3641 }
 0x338   :  { %3643 = vpow2.f32 %v670_v36  ;;  %v4840_v28 = vmul.f32 %v3642_v55, %v4818_v22  ;;  %v1223_v36 = vmul.f32 %v4661_v25, %v4612_v51  ;;  %v4856_v55 = vld [vmem:[%s6270_s11 + $0x48] sm:$0xff] }
 0x339   :  { %1058 = vadd.xlane.f32.xlu1 %v4821_v37  ;;  %716 = vadd.xlane.f32.xlu2 %v4824_v33  ;;  %3645 = vpow2.f32 %v1014_v49 }
 0x33a   :  { %3485 = vmatmul.msk.f32.gmra.mxu3 %vm78_vm0, %v1222_v40  ;;  %v1567_v40 = vmul.f32 %v4664_v26, %v4612_v51 }
 0x33b   :  { %3502 = vmatmul.msk.f32.gmra.mxu0 %vm78_vm0, %v1566_v42  ;;  %v1016_v42 = vmul.f32 1.442695, %v977_v38 }
 0x33d   :  { %v633_v3 = vpop.f32.mrf.mxu3 }
 0x33e   :  { %v3644_v5 = vpop.eup %3643  ;;  %v672_v6 = vmul.f32 1.442695, %v633_v3 }
 0x33f   :  { %v980_v61 = vpop.f32.mrf.mxu0  ;;  %v4843_v30 = vmul.f32 %v3644_v5, %v4837_v2  ;;  %v3646_v49 = vpop.eup %3645 }
 0x340   :  { %3647 = vpow2.f32 %v672_v6  ;;  %v4859_v15 = vmul.f32 %v3646_v49, %v4837_v2 }
 0x341   :  { %1060 = vadd.xlane.f32.xlu1 %v4840_v28  ;;  %718 = vadd.xlane.f32.xlu2 %v4843_v30  ;;  %3649 = vpow2.f32 %v1016_v42  ;;  %v1018_v42 = vmul.f32 1.442695, %v980_v61 }
 0x342   :  { %3486 = vmatmul.msk.f32.gmra.mxu3 %vm78_vm0, %v1223_v36  ;;  %6383 = vst [vmem:[#allocation19_spill] sm:$0xff] %v4859_v15  ;;  %v1224_v36 = vmul.f32 %v4661_v25, %v4620_v52 }
 0x343   :  { %3503 = vmatmul.msk.f32.gmra.mxu0 %vm78_vm0, %v1567_v40  ;;  %v1568_v40 = vmul.f32 %v4664_v26, %v4620_v52 }
 0x345   :  { %v636_v3 = vpop.f32.mrf.mxu3 }
 0x346   :  { %v3648_v5 = vpop.eup %3647  ;;  %v674_v6 = vmul.f32 1.442695, %v636_v3  ;;  %v4875_v3 = vld [vmem:[%s6270_s11 + $0x50] sm:$0xff] }
 0x347   :  { %v983_v38 = vpop.f32.mrf.mxu0  ;;  %v4862_v16 = vmul.f32 %v3648_v5, %v4856_v55  ;;  %v3650_v49 = vpop.eup %3649  ;;  %6384 = vst [vmem:[#allocation20_spill] sm:$0xff] %v4875_v3 }
 0x348   :  { %3651 = vpow2.f32 %v674_v6  ;;  %v4878_v11 = vmul.f32 %v3650_v49, %v4856_v55 }
 0x349   :  { %1062 = vadd.xlane.f32.xlu1 %v4859_v15  ;;  %720 = vadd.xlane.f32.xlu2 %v4862_v16  ;;  %3653 = vpow2.f32 %v1018_v42  ;;  %v1020_v42 = vmul.f32 1.442695, %v983_v38 }
 0x34a   :  { %3487 = vmatmul.msk.f32.gmra.mxu3 %vm78_vm0, %v1224_v36  ;;  %6385 = vst [vmem:[#allocation21_spill] sm:$0xff] %v4878_v11  ;;  %v1225_v36 = vmul.f32 %v4661_v25, %v4628_v63 }
 0x34b   :  { %3504 = vmatmul.msk.f32.gmra.mxu0 %vm78_vm0, %v1568_v40  ;;  %v1569_v40 = vmul.f32 %v4664_v26, %v4628_v63 }
 0x34d   :  { %v639_v5 = vpop.f32.mrf.mxu3 }
 0x34e   :  { %v3652_v6 = vpop.eup %3651  ;;  %v676_v12 = vmul.f32 1.442695, %v639_v5 }
 0x34f   :  { %v986_v61 = vpop.f32.mrf.mxu0  ;;  %v4881_v15 = vmul.f32 %v3652_v6, %v4875_v3  ;;  %v3654_v49 = vpop.eup %3653 }
 0x350   :  { %3655 = vpow2.f32 %v676_v12  ;;  %v4894_v12 = vld [vmem:[%s6270_s11 + $0x58] sm:$0xff]  ;;  %v4897_v52 = vmul.f32 %v3654_v49, %v4875_v3 }
 0x351   :  { %1064 = vadd.xlane.f32.xlu1 %v4878_v11  ;;  %722 = vadd.xlane.f32.xlu2 %v4881_v15  ;;  %6386 = vst [vmem:[#allocation22_spill] sm:$0xff] %v4894_v12  ;;  %3657 = vpow2.f32 %v1020_v42  ;;  %v1022_v42 = vmul.f32 1.442695, %v986_v61 }
 0x352   :  { %3488 = vmatmul.msk.f32.gmra.mxu3 %vm78_vm0, %v1225_v36  ;;  %6387 = vst [vmem:[#allocation23_spill] sm:$0xff] %v4897_v52  ;;  %v1226_v36 = vmul.f32 %v4661_v25, %v4636_v4 }
 0x353   :  { %3505 = vmatmul.msk.f32.gmra.mxu0 %vm78_vm0, %v1569_v40  ;;  %v1570_v40 = vmul.f32 %v4664_v26, %v4636_v4 }
 0x355   :  { %v642_v5 = vpop.f32.mrf.mxu3 }
 0x356   :  { %v3656_v6 = vpop.eup %3655  ;;  %v678_v11 = vmul.f32 1.442695, %v642_v5 }
 0x357   :  { %v989_v38 = vpop.f32.mrf.mxu0  ;;  %v4900_v63 = vmul.f32 %v3656_v6, %v4894_v12  ;;  %v3658_v49 = vpop.eup %3657 }
 0x358   :  { %3659 = vpow2.f32 %v678_v11  ;;  %v4913_v11 = vld [vmem:[%s6270_s11 + $0x60] sm:$0xff]  ;;  %v4916_v3 = vmul.f32 %v3658_v49, %v4894_v12 }
 0x359   :  { %1066 = vadd.xlane.f32.xlu1 %v4897_v52  ;;  %724 = vadd.xlane.f32.xlu2 %v4900_v63  ;;  %3661 = vpow2.f32 %v1022_v42  ;;  %v1024_v42 = vmul.f32 1.442695, %v989_v38 }
 0x35a   :  { %3489 = vmatmul.msk.f32.gmra.mxu3 %vm78_vm0, %v1226_v36  ;;  %6388 = vst [vmem:[#allocation24_spill] sm:$0xff] %v4916_v3  ;;  %v1227_v36 = vmul.f32 %v4661_v25, %v4644_v13 }
 0x35b   :  { %3506 = vmatmul.msk.f32.gmra.mxu0 %vm78_vm0, %v1570_v40  ;;  %v1571_v40 = vmul.f32 %v4664_v26, %v4644_v13 }
 0x35d   :  { %v645_v5 = vpop.f32.mrf.mxu3 }
 0x35e   :  { %v3660_v6 = vpop.eup %3659  ;;  %v680_v52 = vmul.f32 1.442695, %v645_v5 }
 0x35f   :  { %v992_v61 = vpop.f32.mrf.mxu0  ;;  %v4919_v4 = vmul.f32 %v3660_v6, %v4913_v11  ;;  %v3662_v49 = vpop.eup %3661 }
 0x360   :  { %3663 = vpow2.f32 %v680_v52  ;;  %v4932_v52 = vld [vmem:[%s6270_s11 + $0x68] sm:$0xff]  ;;  %v4935_v12 = vmul.f32 %v3662_v49, %v4913_v11 }
 0x361   :  { %1068 = vadd.xlane.f32.xlu1 %v4916_v3  ;;  %726 = vadd.xlane.f32.xlu2 %v4919_v4  ;;  %3665 = vpow2.f32 %v1024_v42  ;;  %v1026_v42 = vmul.f32 1.442695, %v992_v61 }
 0x362   :  { %3490 = vmatmul.msk.f32.gmra.mxu3 %vm78_vm0, %v1227_v36  ;;  %6389 = vst [vmem:[#allocation25_spill] sm:$0xff] %v4935_v12  ;;  %v1228_v36 = vmul.f32 %v4661_v25, %v4652_v19 }
 0x363   :  { %3507 = vmatmul.msk.f32.gmra.mxu0 %vm78_vm0, %v1571_v40  ;;  %v1572_v40 = vmul.f32 %v4664_v26, %v4652_v19 }
 0x365   :  { %v648_v5 = vpop.f32.mrf.mxu3 }
 0x366   :  { %v3664_v6 = vpop.eup %3663  ;;  %v682_v3 = vmul.f32 1.442695, %v648_v5  ;;  %v4954_v5 = vperm.slane %v4484_v9, 0 }
 0x367   :  { %v995_v38 = vpop.f32.mrf.mxu0  ;;  %v4938_v13 = vmul.f32 %v3664_v6, %v4932_v52  ;;  %v3666_v49 = vpop.eup %3665  ;;  %v4957_v6 = vperm.slane %v4486_v10, 0 }
 0x368   :  { %3667 = vpow2.f32 %v682_v3  ;;  %v4951_v3 = vld [vmem:[%s6270_s11 + $0x70] sm:$0xff]  ;;  %6391 = vst [vmem:[#allocation27_spill] sm:$0xff] %v4954_v5  ;;  %v1901_v9 = vmul.f32 %v4954_v5, %v4496_v17 }
 0x369   :  { %1070 = vadd.xlane.f32.xlu1 %v4935_v12  ;;  %728 = vadd.xlane.f32.xlu2 %v4938_v13  ;;  %6390 = vst [vmem:[#allocation26_spill] sm:$0xff] %v4951_v3  ;;  %3669 = vpow2.f32 %v1026_v42  ;;  %v2245_v10 = vmul.f32 %v4957_v6, %v4496_v17  ;;  %v1028_v42 = vmul.f32 1.442695, %v995_v38 }
 0x36a   :  { %3491 = vmatmul.msk.f32.gmra.mxu3 %vm78_vm0, %v1228_v36  ;;  %6392 = vst [vmem:[#allocation28_spill] sm:$0xff] %v4957_v6  ;;  %v4960_v36 = vmul.f32 %v3666_v49, %v4932_v52 }
 0x36b   :  { %3508 = vmatmul.msk.f32.gmra.mxu0 %vm78_vm0, %v1572_v40 }
 0x36c   :  { %6393 = vst [vmem:[#allocation29_spill] sm:$0xff] %v4960_v36 }
 0x36d   :  { %v651_v61 = vpop.f32.mrf.mxu3 }
 0x36e   :  { %v3668_v26 = vpop.eup %3667  ;;  %v684_v25 = vmul.f32 1.442695, %v651_v61 }
 0x36f   :  { %v1638_v40 = vpop.f32.mrf.mxu0  ;;  %v4963_v12 = vmul.f32 %v3668_v26, %v4951_v3  ;;  %v3670_v49 = vpop.eup %3669 }
 0x370   :  { %3671 = vpow2.f32 %v684_v25  ;;  %v4976_v25 = vld [vmem:[%s6270_s11 + $0x78] sm:$0xff]  ;;  %v4979_v17 = vmul.f32 %v3670_v49, %v4951_v3 }
 0x371   :  { %6394 = vst [vmem:[#allocation30_spill] sm:$0xff] %v4963_v12  ;;  %1072 = vadd.xlane.f32.xlu1 %v4960_v36  ;;  %730 = vadd.xlane.f32.xlu2 %v4963_v12 }
 0x372   :  { %3510 = vmatmul.msk.f32.vlgmr.msrb.gmra.mxu3 %vm78_vm0, %v1901_v9  ;;  %6395 = vst [vmem:[#allocation31_spill] sm:$0xff] %v4979_v17 }
 0x373   :  { %3527 = vmatmul.msk.f32.vlgmr.msra.gmra.mxu0 %vm78_vm0, %v2245_v10  ;;  %v1902_v10 = vmul.f32 %v4954_v5, %v4510_v20 }
 0x374   :  { %v703_v61 = vpop.xlane.xlu1 %702 }
 0x375   :  { %3673 = vrcp.f32 %v703_v61  ;;  %v1294_v26 = vpop.f32.mrf.mxu3  ;;  %v2246_v61 = vmul.f32 %v4957_v6, %v4510_v20 }
 0x376   :  { %v3672_v36 = vpop.eup %3671  ;;  %3675 = vpow2.f32 %v1028_v42  ;;  %v1342_v19 = vmul.f32 1.442695, %v1294_v26  ;;  %v1686_v26 = vmul.f32 1.442695, %v1638_v40 }
 0x377   :  { %v1641_v38 = vpop.f32.mrf.mxu0  ;;  %v4982_v9 = vmul.f32 %v3672_v36, %v4976_v25 }
 0x378   :  { %3677 = vpow2.f32 %v1342_v19 }
 0x379   :  { %6396 = vst [vmem:[#allocation32_spill] sm:$0xff] %v4982_v9  ;;  %1074 = vadd.xlane.f32.xlu1 %v4979_v17  ;;  %732 = vadd.xlane.f32.xlu2 %v4982_v9 }
 0x37a   :  { %3511 = vmatmul.msk.f32.gmra.mxu3 %vm78_vm0, %v1902_v10 }
 0x37b   :  { %v3674_v42 = vpop.eup %3673  ;;  %3528 = vmatmul.msk.f32.gmra.mxu0 %vm78_vm0, %v2246_v61  ;;  %v1688_v61 = vmul.f32 1.442695, %v1641_v38 }
 0x37c   :  { %v705_v49 = vpop.xlane.xlu2 %704  ;;  %v750_v36 = vmul.f32 %v3674_v42, %v4692_v41  ;;  %v3676_v19 = vpop.eup %3675  ;;  %v1903_v41 = vmul.f32 %v4954_v5, %v4520_v23 }
 0x37d   :  { %3679 = vrcp.f32 %v705_v49  ;;  %v1297_v17 = vpop.f32.mrf.mxu3  ;;  %v4998_v40 = vmul.f32 %v3676_v19, %v4976_v25 }
 0x37e   :  { %782 = vmatmul.f32.vlgmr.msra.gmra.mxu2 %v750_v36  ;;  %v3678_v3 = vpop.eup %3677  ;;  %3681 = vpow2.f32 %v1686_v26  ;;  %v1344_v12 = vmul.f32 1.442695, %v1297_v17  ;;  %v2247_v17 = vmul.f32 %v4957_v6, %v4520_v23 }
 0x37f   :  { %2154 = vmatpush.xpose.msra.mxu2 %v4553_v43  ;;  %v1644_v20 = vpop.f32.mrf.mxu0  ;;  %v4995_v9 = vmul.f32 %v3678_v3, %v4689_v0 }
 0x380   :  { %3683 = vpow2.f32 %v1344_v12 }
 0x381   :  { %1390 = vadd.xlane.f32.xlu1 %v4995_v9  ;;  %1076 = vadd.xlane.f32.xlu2 %v4998_v40 }
 0x382   :  { %3512 = vmatmul.msk.f32.gmra.mxu3 %vm78_vm0, %v1903_v41 }
 0x383   :  { %v3680_v10 = vpop.eup %3679  ;;  %2155 = vmatpush.xpose.msra.mxu2 %v4558_v46  ;;  %3529 = vmatmul.msk.f32.gmra.mxu0 %vm78_vm0, %v2247_v17 }
 0x384   :  { %v1047_v3 = vpop.xlane.xlu2 %1046  ;;  %v707_v12 = vpop.xlane.xlu1 %706  ;;  %v751_v42 = vmul.f32 %v3680_v10, %v4707_v57  ;;  %v1904_v57 = vmul.f32 %v4954_v5, %v4528_v29  ;;  %v2248_v10 = vmul.f32 %v4957_v6, %v4528_v29 }
 0x385   :  { %v3682_v26 = vpop.eup %3681  ;;  %3685 = vrcp.f32 %v1047_v3  ;;  %v1300_v49 = vpop.f32.mrf.mxu3  ;;  %v1690_v3 = vmul.f32 1.442695, %v1644_v20 }
 0x386   :  { %3687 = vrcp.f32 %v707_v12  ;;  %785 = vmatmul.f32.gmra.mxu2 %v751_v42  ;;  %v3684_v36 = vpop.eup %3683  ;;  %v1346_v19 = vmul.f32 1.442695, %v1300_v49  ;;  %v5012_v41 = vmul.f32 %v3682_v26, %v4689_v0 }
 0x387   :  { %3689 = vpow2.f32 %v1688_v61  ;;  %2156 = vmatpush.xpose.msra.mxu2 %v4571_v24  ;;  %v1647_v38 = vpop.f32.mrf.mxu0  ;;  %v5015_v17 = vmul.f32 %v3684_v36, %v4704_v35 }
 0x388   :  { %6397 = vst [vmem:[#allocation33_spill] sm:$0xff] %v5012_v41  ;;  %3691 = vpow2.f32 %v1346_v19 }
 0x389   :  { %1734 = vadd.xlane.f32.xlu1 %v5012_v41  ;;  %1392 = vadd.xlane.f32.xlu2 %v5015_v17 }
 0x38a   :  { %3513 = vmatmul.msk.f32.gmra.mxu3 %vm78_vm0, %v1904_v57 }
 0x38b   :  { %v3686_v61 = vpop.eup %3685  ;;  %2157 = vmatpush.xpose.msra.mxu2 %v4576_v27  ;;  %3530 = vmatmul.msk.f32.gmra.mxu0 %vm78_vm0, %v2248_v10 }
 0x38c   :  { %v3688_v0 = vpop.eup %3687  ;;  %v1049_v12 = vpop.xlane.xlu2 %1048  ;;  %v1094_v26 = vmul.f32 %v3686_v61, %v4722_v14  ;;  %v1905_v14 = vmul.f32 %v4954_v5, %v4536_v34  ;;  %v2249_v61 = vmul.f32 %v4957_v6, %v4536_v34 }
 0x38d   :  { %v709_v42 = vpop.xlane.xlu1 %708  ;;  %v3690_v49 = vpop.eup %3689  ;;  %3693 = vrcp.f32 %v1049_v12  ;;  %v752_v36 = vmul.f32 %v3688_v0, %v4725_v18  ;;  %v1692_v18 = vmul.f32 1.442695, %v1647_v38 }
 0x38e   :  { %3695 = vrcp.f32 %v709_v42  ;;  %v1303_v19 = vpop.f32.mrf.mxu3  ;;  %1126 = vmatmul.f32.vlgmr.msrb.gmra.mxu1 %v1094_v26  ;;  %v3692_v41 = vpop.eup %3691  ;;  %v5030_v10 = vmul.f32 %v3690_v49, %v4704_v35 }
 0x38f   :  { %3697 = vpow2.f32 %v1690_v3  ;;  %v1348_v20 = vmul.f32 1.442695, %v1303_v19  ;;  %788 = vmatmul.f32.gmra.mxu2 %v752_v36  ;;  %2498 = vmatpush.xpose.msrb.mxu1 %v4553_v43  ;;  %v1650_v57 = vpop.f32.mrf.mxu0  ;;  %v5033_v29 = vmul.f32 %v3692_v41, %v4719_v60 }
 0x391   :  { %3699 = vpow2.f32 %v1348_v20  ;;  %1736 = vadd.xlane.f32.xlu1 %v5030_v10  ;;  %1394 = vadd.xlane.f32.xlu2 %v5033_v29 }
 0x392   :  { %3514 = vmatmul.msk.f32.gmra.mxu3 %vm78_vm0, %v1905_v14 }
 0x393   :  { %v3694_v3 = vpop.eup %3693  ;;  %2499 = vmatpush.xpose.msrb.mxu1 %v4558_v46  ;;  %3531 = vmatmul.msk.f32.gmra.mxu0 %vm78_vm0, %v2249_v61 }
 0x394   :  { %v3696_v35 = vpop.eup %3695  ;;  %v1051_v41 = vpop.xlane.xlu2 %1050  ;;  %v1095_v12 = vmul.f32 %v3694_v3, %v4741_v62  ;;  %v1694_v3 = vmul.f32 1.442695, %v1650_v57 }
 0x395   :  { %v1053_v0 = vpop.xlane.xlu1 %1052  ;;  %v3698_v38 = vpop.eup %3697  ;;  %3701 = vrcp.f32 %v1051_v41  ;;  %v753_v26 = vmul.f32 %v3696_v35, %v4744_v47  ;;  %v1906_v47 = vmul.f32 %v4954_v5, %v4544_v39 }
 0x396   :  { %v711_v42 = vpop.xlane.xlu0 %710  ;;  %3703 = vpow2.f32 %v1692_v18  ;;  %v1306_v49 = vpop.f32.mrf.mxu3  ;;  %1129 = vmatmul.f32.gmra.mxu1 %v1095_v12  ;;  %v5048_v14 = vmul.f32 %v3698_v38, %v4719_v60  ;;  %v2250_v18 = vmul.f32 %v4957_v6, %v4544_v39 }
 0x397   :  { %v3700_v36 = vpop.eup %3699  ;;  %3705 = vrcp.f32 %v711_v42  ;;  %v1350_v19 = vmul.f32 1.442695, %v1306_v49  ;;  %791 = vmatmul.f32.gmra.mxu2 %v753_v26  ;;  %2500 = vmatpush.xpose.msrb.mxu1 %v4571_v24  ;;  %v1653_v20 = vpop.f32.mrf.mxu0 }
 0x398   :  { %v5051_v62 = vmul.f32 %v3700_v36, %v4738_v7 }
 0x399   :  { %3707 = vpow2.f32 %v1350_v19  ;;  %1738 = vadd.xlane.f32.xlu1 %v5048_v14 }
 0x39a   :  { %1396 = vadd.xlane.f32.xlu2 %v5051_v62  ;;  %3709 = vrcp.f32 %v1053_v0  ;;  %3515 = vmatmul.msk.f32.gmra.mxu3 %vm78_vm0, %v1906_v47 }
 0x39b   :  { %v3702_v61 = vpop.eup %3701  ;;  %2501 = vmatpush.xpose.msrb.mxu1 %v4576_v27  ;;  %3532 = vmatmul.msk.f32.gmra.mxu0 %vm78_vm0, %v2250_v18  ;;  %v1696_v18 = vmul.f32 1.442695, %v1653_v20 }
 0x39c   :  { %v3704_v60 = vpop.eup %3703  ;;  %v713_v41 = vpop.xlane.xlu2 %712  ;;  %v1096_v12 = vmul.f32 %v3702_v61, %v4760_v45  ;;  %v1907_v45 = vmul.f32 %v4954_v5, %v4560_v48 }
 0x39d   :  { %v1055_v35 = vpop.xlane.xlu1 %1054  ;;  %v3706_v38 = vpop.eup %3705  ;;  %3711 = vrcp.f32 %v713_v41  ;;  %v5065_v36 = vmul.f32 %v3704_v60, %v4738_v7 }
 0x39e   :  { %v1309_v42 = vpop.f32.mrf.mxu3  ;;  %v754_v26 = vmul.f32 %v3706_v38, %v4766_v54  ;;  %1132 = vmatmul.f32.gmra.mxu1 %v1096_v12  ;;  %3713 = vpow2.f32 %v1694_v3  ;;  %v2251_v54 = vmul.f32 %v4957_v6, %v4560_v48 }
 0x39f   :  { %v3708_v49 = vpop.eup %3707  ;;  %v1352_v57 = vmul.f32 1.442695, %v1309_v42 }
 0x3a0   :  { %794 = vmatmul.f32.gmra.mxu2 %v754_v26  ;;  %v1656_v0 = vpop.f32.mrf.mxu0  ;;  %v5068_v19 = vmul.f32 %v3708_v49, %v4757_v50  ;;  %v3710_v47 = vpop.eup %3709 }
 0x3a1   :  { %3715 = vpow2.f32 %v1352_v57  ;;  %1740 = vadd.xlane.f32.xlu1 %v5065_v36  ;;  %v1097_v60 = vmul.f32 %v3710_v47, %v4763_v1  ;;  %v1908_v1 = vmul.f32 %v4954_v5, %v4578_v53  ;;  %v1698_v47 = vmul.f32 1.442695, %v1656_v0 }
 0x3a2   :  { %1398 = vadd.xlane.f32.xlu2 %v5068_v19  ;;  %3717 = vrcp.f32 %v1055_v35  ;;  %3516 = vmatmul.msk.f32.gmra.mxu3 %vm78_vm0, %v1907_v45 }
 0x3a3   :  { %v3712_v7 = vpop.eup %3711  ;;  %3533 = vmatmul.msk.f32.gmra.mxu0 %vm78_vm0, %v2251_v54 }
 0x3a4   :  { %v715_v3 = vpop.xlane.xlu2 %714  ;;  %v3714_v41 = vpop.eup %3713  ;;  %v755_v12 = vmul.f32 %v3712_v7, %v4786_v8  ;;  %v2252_v8 = vmul.f32 %v4957_v6, %v4578_v53 }
 0x3a5   :  { %v1057_v61 = vpop.xlane.xlu1 %1056  ;;  %3719 = vrcp.f32 %v715_v3  ;;  %v5081_v35 = vmul.f32 %v3714_v41, %v4757_v50 }
 0x3a6   :  { %v1312_v38 = vpop.f32.mrf.mxu3  ;;  %1135 = vmatmul.f32.gmra.mxu1 %v1097_v60  ;;  %3721 = vpow2.f32 %v1696_v18 }
 0x3a7   :  { %v3716_v42 = vpop.eup %3715  ;;  %v1354_v26 = vmul.f32 1.442695, %v1312_v38 }
 0x3a8   :  { %797 = vmatmul.f32.gmra.mxu2 %v755_v12  ;;  %v1659_v20 = vpop.f32.mrf.mxu0  ;;  %v5084_v49 = vmul.f32 %v3716_v42, %v4780_v21  ;;  %v3718_v57 = vpop.eup %3717 }
 0x3a9   :  { %3723 = vpow2.f32 %v1354_v26  ;;  %1742 = vadd.xlane.f32.xlu1 %v5081_v35  ;;  %v1098_v54 = vmul.f32 %v3718_v57, %v4783_v31  ;;  %v1909_v31 = vmul.f32 %v4954_v5, %v4592_v32  ;;  %v1700_v26 = vmul.f32 1.442695, %v1659_v20 }
 0x3aa   :  { %1400 = vadd.xlane.f32.xlu2 %v5084_v49  ;;  %3725 = vrcp.f32 %v1057_v61  ;;  %3517 = vmatmul.msk.f32.gmra.mxu3 %vm78_vm0, %v1908_v1 }
 0x3ab   :  { %v3720_v50 = vpop.eup %3719  ;;  %3534 = vmatmul.msk.f32.gmra.mxu0 %vm78_vm0, %v2252_v8 }
 0x3ac   :  { %v3722_v18 = vpop.eup %3721  ;;  %v717_v7 = vpop.xlane.xlu2 %716  ;;  %v756_v3 = vmul.f32 %v3720_v50, %v4805_v58  ;;  %v2253_v58 = vmul.f32 %v4957_v6, %v4592_v32 }
 0x3ad   :  { %v1059_v45 = vpop.xlane.xlu1 %1058  ;;  %3727 = vrcp.f32 %v717_v7  ;;  %v5097_v61 = vmul.f32 %v3722_v18, %v4780_v21 }
 0x3ae   :  { %v1315_v60 = vpop.f32.mrf.mxu3  ;;  %1138 = vmatmul.f32.gmra.mxu1 %v1098_v54  ;;  %3729 = vpow2.f32 %v1698_v47 }
 0x3af   :  { %v3724_v41 = vpop.eup %3723  ;;  %v1356_v12 = vmul.f32 1.442695, %v1315_v60 }
 0x3b0   :  { %800 = vmatmul.f32.gmra.mxu2 %v756_v3  ;;  %v1662_v0 = vpop.f32.mrf.mxu0  ;;  %v5100_v38 = vmul.f32 %v3724_v41, %v4799_v44  ;;  %v3726_v42 = vpop.eup %3725 }
 0x3b1   :  { %3731 = vpow2.f32 %v1356_v12  ;;  %1744 = vadd.xlane.f32.xlu1 %v5097_v61  ;;  %v1099_v1 = vmul.f32 %v3726_v42, %v4802_v56  ;;  %v1910_v56 = vmul.f32 %v4954_v5, %v4604_v59  ;;  %v1702_v41 = vmul.f32 1.442695, %v1662_v0 }
 0x3b2   :  { %1402 = vadd.xlane.f32.xlu2 %v5100_v38  ;;  %3733 = vrcp.f32 %v1059_v45  ;;  %3518 = vmatmul.msk.f32.gmra.mxu3 %vm78_vm0, %v1909_v31 }
 0x3b3   :  { %v3728_v21 = vpop.eup %3727  ;;  %3535 = vmatmul.msk.f32.gmra.mxu0 %vm78_vm0, %v2253_v58 }
 0x3b4   :  { %v3730_v8 = vpop.eup %3729  ;;  %v719_v47 = vpop.xlane.xlu2 %718  ;;  %v757_v50 = vmul.f32 %v3728_v21, %v4824_v33  ;;  %v2254_v33 = vmul.f32 %v4957_v6, %v4604_v59 }
 0x3b5   :  { %v1061_v57 = vpop.xlane.xlu1 %1060  ;;  %3735 = vrcp.f32 %v719_v47  ;;  %v5113_v45 = vmul.f32 %v3730_v8, %v4799_v44 }
 0x3b6   :  { %v1318_v54 = vpop.f32.mrf.mxu3  ;;  %1141 = vmatmul.f32.gmra.mxu1 %v1099_v1  ;;  %3737 = vpow2.f32 %v1700_v26 }
 0x3b7   :  { %v3732_v18 = vpop.eup %3731  ;;  %v1358_v7 = vmul.f32 1.442695, %v1318_v54 }
 0x3b8   :  { %803 = vmatmul.f32.gmra.mxu2 %v757_v50  ;;  %v1665_v20 = vpop.f32.mrf.mxu0  ;;  %v5116_v3 = vmul.f32 %v3732_v18, %v4818_v22  ;;  %v3734_v60 = vpop.eup %3733 }
 0x3b9   :  { %3739 = vpow2.f32 %v1358_v7  ;;  %1746 = vadd.xlane.f32.xlu1 %v5113_v45  ;;  %v1100_v42 = vmul.f32 %v3734_v60, %v4821_v37  ;;  %v1911_v37 = vmul.f32 %v4954_v5, %v4612_v51  ;;  %v1704_v54 = vmul.f32 1.442695, %v1665_v20 }
 0x3ba   :  { %1404 = vadd.xlane.f32.xlu2 %v5116_v3  ;;  %3741 = vrcp.f32 %v1061_v57  ;;  %3519 = vmatmul.msk.f32.gmra.mxu3 %vm78_vm0, %v1910_v56 }
 0x3bb   :  { %v3736_v44 = vpop.eup %3735  ;;  %3536 = vmatmul.msk.f32.gmra.mxu0 %vm78_vm0, %v2254_v33 }
 0x3bc   :  { %v3738_v31 = vpop.eup %3737  ;;  %v721_v58 = vpop.xlane.xlu2 %720  ;;  %v758_v26 = vmul.f32 %v3736_v44, %v4843_v30  ;;  %v2255_v30 = vmul.f32 %v4957_v6, %v4612_v51 }
 0x3bd   :  { %v1063_v12 = vpop.xlane.xlu1 %1062  ;;  %3743 = vrcp.f32 %v721_v58  ;;  %v5129_v57 = vmul.f32 %v3738_v31, %v4818_v22 }
 0x3be   :  { %v1321_v21 = vpop.f32.mrf.mxu3  ;;  %1144 = vmatmul.f32.gmra.mxu1 %v1100_v42  ;;  %3745 = vpow2.f32 %v1702_v41 }
 0x3bf   :  { %v3740_v1 = vpop.eup %3739  ;;  %v1360_v8 = vmul.f32 1.442695, %v1321_v21 }
 0x3c0   :  { %806 = vmatmul.f32.gmra.mxu2 %v758_v26  ;;  %v1668_v0 = vpop.f32.mrf.mxu0  ;;  %v5132_v47 = vmul.f32 %v3740_v1, %v4837_v2  ;;  %v3742_v50 = vpop.eup %3741 }
 0x3c1   :  { %3747 = vpow2.f32 %v1360_v8  ;;  %1748 = vadd.xlane.f32.xlu1 %v5129_v57  ;;  %v1101_v7 = vmul.f32 %v3742_v50, %v4840_v28  ;;  %v6398_v28 = vld [vmem:[#allocation12_spill] sm:$0xff]  ;;  %v1706_v21 = vmul.f32 1.442695, %v1668_v0  ;;  %v6399_v8 = vld [vmem:[#allocation19_spill] sm:$0xff] }
 0x3c2   :  { %1406 = vadd.xlane.f32.xlu2 %v5132_v47  ;;  %3749 = vrcp.f32 %v1063_v12  ;;  %3520 = vmatmul.msk.f32.gmra.mxu3 %vm78_vm0, %v1911_v37  ;;  %v1912_v26 = vmul.f32 %v4954_v5, %v6398_v28 }
 0x3c3   :  { %v3744_v22 = vpop.eup %3743  ;;  %3537 = vmatmul.msk.f32.gmra.mxu0 %vm78_vm0, %v2255_v30 }
 0x3c4   :  { %v3746_v60 = vpop.eup %3745  ;;  %v723_v56 = vpop.xlane.xlu2 %722  ;;  %v759_v33 = vmul.f32 %v3744_v22, %v4862_v16  ;;  %v2256_v16 = vmul.f32 %v4957_v6, %v6398_v28 }
 0x3c5   :  { %v1065_v18 = vpop.xlane.xlu1 %1064  ;;  %3751 = vrcp.f32 %v723_v56  ;;  %v5145_v12 = vmul.f32 %v3746_v60, %v4837_v2  ;;  %v6400_v56 = vld [vmem:[#allocation20_spill] sm:$0xff] }
 0x3c6   :  { %v1324_v41 = vpop.f32.mrf.mxu3  ;;  %1147 = vmatmul.f32.gmra.mxu1 %v1101_v7  ;;  %3753 = vpow2.f32 %v1704_v54 }
 0x3c7   :  { %v3748_v44 = vpop.eup %3747  ;;  %v1362_v42 = vmul.f32 1.442695, %v1324_v41 }
 0x3c8   :  { %809 = vmatmul.f32.gmra.mxu2 %v759_v33  ;;  %v1671_v20 = vpop.f32.mrf.mxu0  ;;  %v5148_v31 = vmul.f32 %v3748_v44, %v4856_v55  ;;  %v3750_v58 = vpop.eup %3749  ;;  %v6401_v44 = vld [vmem:[#allocation13_spill] sm:$0xff] }
 0x3c9   :  { %3755 = vpow2.f32 %v1362_v42  ;;  %1750 = vadd.xlane.f32.xlu1 %v5145_v12  ;;  %v1102_v50 = vmul.f32 %v3750_v58, %v6399_v8  ;;  %v1913_v42 = vmul.f32 %v4954_v5, %v6401_v44  ;;  %v1708_v58 = vmul.f32 1.442695, %v1671_v20 }
 0x3ca   :  { %1408 = vadd.xlane.f32.xlu2 %v5148_v31  ;;  %3757 = vrcp.f32 %v1065_v18  ;;  %3521 = vmatmul.msk.f32.gmra.mxu3 %vm78_vm0, %v1912_v26 }
 0x3cb   :  { %v3752_v2 = vpop.eup %3751  ;;  %3538 = vmatmul.msk.f32.gmra.mxu0 %vm78_vm0, %v2256_v16  ;;  %v6402_v16 = vld [vmem:[#allocation21_spill] sm:$0xff] }
 0x3cc   :  { %v3754_v37 = vpop.eup %3753  ;;  %v725_v30 = vpop.xlane.xlu2 %724  ;;  %v760_v54 = vmul.f32 %v3752_v2, %v4881_v15  ;;  %v2257_v15 = vmul.f32 %v4957_v6, %v6401_v44 }
 0x3cd   :  { %v1067_v1 = vpop.xlane.xlu1 %1066  ;;  %3759 = vrcp.f32 %v725_v30  ;;  %v5161_v18 = vmul.f32 %v3754_v37, %v4856_v55 }
 0x3ce   :  { %v1327_v22 = vpop.f32.mrf.mxu3  ;;  %1150 = vmatmul.f32.gmra.mxu1 %v1102_v50  ;;  %3761 = vpow2.f32 %v1706_v21 }
 0x3cf   :  { %v3756_v7 = vpop.eup %3755  ;;  %v1364_v60 = vmul.f32 1.442695, %v1327_v22  ;;  %v6403_v22 = vld [vmem:[#allocation22_spill] sm:$0xff] }
 0x3d0   :  { %812 = vmatmul.f32.gmra.mxu2 %v760_v54  ;;  %v1674_v0 = vpop.f32.mrf.mxu0  ;;  %v5164_v33 = vmul.f32 %v3756_v7, %v6400_v56  ;;  %v3758_v41 = vpop.eup %3757 }
 0x3d1   :  { %3763 = vpow2.f32 %v1364_v60  ;;  %1752 = vadd.xlane.f32.xlu1 %v5161_v18  ;;  %v1103_v21 = vmul.f32 %v3758_v41, %v6402_v16  ;;  %v6404_v41 = vld [vmem:[#allocation14_spill] sm:$0xff] }
 0x3d2   :  { %1410 = vadd.xlane.f32.xlu2 %v5164_v33  ;;  %3765 = vrcp.f32 %v1067_v1  ;;  %3522 = vmatmul.msk.f32.gmra.mxu3 %vm78_vm0, %v1913_v42  ;;  %v1914_v42 = vmul.f32 %v4954_v5, %v6404_v41 }
 0x3d3   :  { %v3760_v55 = vpop.eup %3759  ;;  %3539 = vmatmul.msk.f32.gmra.mxu0 %vm78_vm0, %v2257_v15  ;;  %v1710_v15 = vmul.f32 1.442695, %v1674_v0 }
 0x3d4   :  { %v3762_v2 = vpop.eup %3761  ;;  %v727_v8 = vpop.xlane.xlu2 %726  ;;  %v761_v50 = vmul.f32 %v3760_v55, %v4900_v63  ;;  %v2258_v63 = vmul.f32 %v4957_v6, %v6404_v41  ;;  %v6405_v55 = vld [vmem:[#allocation23_spill] sm:$0xff] }
 0x3d5   :  { %v1069_v26 = vpop.xlane.xlu1 %1068  ;;  %3767 = vrcp.f32 %v727_v8  ;;  %v5177_v1 = vmul.f32 %v3762_v2, %v6400_v56 }
 0x3d6   :  { %v1330_v37 = vpop.f32.mrf.mxu3  ;;  %1153 = vmatmul.f32.gmra.mxu1 %v1103_v21  ;;  %3769 = vpow2.f32 %v1708_v58 }
 0x3d7   :  { %v3764_v30 = vpop.eup %3763  ;;  %v1366_v54 = vmul.f32 1.442695, %v1330_v37 }
 0x3d8   :  { %815 = vmatmul.f32.gmra.mxu2 %v761_v50  ;;  %v1677_v20 = vpop.f32.mrf.mxu0  ;;  %v5180_v7 = vmul.f32 %v3764_v30, %v6403_v22  ;;  %v3766_v60 = vpop.eup %3765 }
 0x3d9   :  { %3771 = vpow2.f32 %v1366_v54  ;;  %1754 = vadd.xlane.f32.xlu1 %v5177_v1  ;;  %v1104_v16 = vmul.f32 %v3766_v60, %v6405_v55  ;;  %v6406_v60 = vld [vmem:[#allocation15_spill] sm:$0xff]  ;;  %v6407_v55 = vld [vmem:[#allocation24_spill] sm:$0xff] }
 0x3da   :  { %1412 = vadd.xlane.f32.xlu2 %v5180_v7  ;;  %3773 = vrcp.f32 %v1069_v26  ;;  %3523 = vmatmul.msk.f32.gmra.mxu3 %vm78_vm0, %v1914_v42 }
 0x3db   :  { %v3768_v56 = vpop.eup %3767  ;;  %3540 = vmatmul.msk.f32.gmra.mxu0 %vm78_vm0, %v2258_v63  ;;  %v1915_v63 = vmul.f32 %v4954_v5, %v6406_v60 }
 0x3dc   :  { %v3770_v21 = vpop.eup %3769  ;;  %v729_v2 = vpop.xlane.xlu2 %728  ;;  %v762_v8 = vmul.f32 %v3768_v56, %v4919_v4  ;;  %v2259_v4 = vmul.f32 %v4957_v6, %v6406_v60 }
 0x3dd   :  { %v1071_v58 = vpop.xlane.xlu1 %1070  ;;  %3775 = vrcp.f32 %v729_v2  ;;  %v5193_v26 = vmul.f32 %v3770_v21, %v6403_v22 }
 0x3de   :  { %v1333_v50 = vpop.f32.mrf.mxu3  ;;  %1156 = vmatmul.f32.gmra.mxu1 %v1104_v16  ;;  %3777 = vpow2.f32 %v1710_v15  ;;  %v1712_v15 = vmul.f32 1.442695, %v1677_v20 }
 0x3df   :  { %v3772_v37 = vpop.eup %3771  ;;  %v1368_v30 = vmul.f32 1.442695, %v1333_v50 }
 0x3e0   :  { %818 = vmatmul.f32.gmra.mxu2 %v762_v8  ;;  %v1680_v0 = vpop.f32.mrf.mxu0  ;;  %v5196_v54 = vmul.f32 %v3772_v37, %v4913_v11  ;;  %v3774_v42 = vpop.eup %3773 }
 0x3e1   :  { %3779 = vpow2.f32 %v1368_v30  ;;  %1756 = vadd.xlane.f32.xlu1 %v5193_v26  ;;  %v1105_v16 = vmul.f32 %v3774_v42, %v6407_v55  ;;  %v6409_v42 = vld [vmem:[#allocation16_spill] sm:$0xff] }
 0x3e2   :  { %1414 = vadd.xlane.f32.xlu2 %v5196_v54  ;;  %3781 = vrcp.f32 %v1071_v58  ;;  %3524 = vmatmul.msk.f32.gmra.mxu3 %vm78_vm0, %v1915_v63  ;;  %v1916_v55 = vmul.f32 %v4954_v5, %v6409_v42  ;;  %v6412_v5 = vld [vmem:[#allocation5_spill] sm:$0xff] }
 0x3e3   :  { %v3776_v22 = vpop.eup %3775  ;;  %3541 = vmatmul.msk.f32.gmra.mxu0 %vm78_vm0, %v2259_v4 }
 0x3e4   :  { %v3778_v21 = vpop.eup %3777  ;;  %v731_v2 = vpop.xlane.xlu2 %730  ;;  %v763_v8 = vmul.f32 %v3776_v22, %v4938_v13  ;;  %v2260_v13 = vmul.f32 %v4957_v6, %v6409_v42  ;;  %v1714_v22 = vmul.f32 1.442695, %v1680_v0 }
 0x3e5   :  { %v1073_v56 = vpop.xlane.xlu1 %1072  ;;  %3783 = vrcp.f32 %v731_v2  ;;  %v5209_v58 = vmul.f32 %v3778_v21, %v4913_v11  ;;  %v6410_v21 = vld [vmem:[#allocation25_spill] sm:$0xff] }
 0x3e6   :  { %v1336_v50 = vpop.f32.mrf.mxu3  ;;  %1159 = vmatmul.f32.gmra.mxu1 %v1105_v16  ;;  %3785 = vpow2.f32 %v1712_v15 }
 0x3e7   :  { %v3780_v37 = vpop.eup %3779  ;;  %v1370_v30 = vmul.f32 1.442695, %v1336_v50  ;;  %6408 = vst [vmem:[#allocation12_spill] sm:$0xff] %v5209_v58 }
 0x3e8   :  { %821 = vmatmul.f32.gmra.mxu2 %v763_v8  ;;  %v1683_v20 = vpop.f32.mrf.mxu0  ;;  %v5212_v63 = vmul.f32 %v3780_v37, %v4932_v52  ;;  %v3782_v4 = vpop.eup %3781  ;;  %v6411_v37 = vld [vmem:[#allocation30_spill] sm:$0xff] }
 0x3e9   :  { %3787 = vpow2.f32 %v1370_v30  ;;  %1758 = vadd.xlane.f32.xlu1 %v5209_v58  ;;  %v1716_v15 = vmul.f32 1.442695, %v1683_v20  ;;  %v1106_v2 = vmul.f32 %v3782_v4, %v6410_v21  ;;  %v5225_v58 = vperm.slane %v6412_v5, 0  ;;  %v6417_v21 = vld [vmem:[#allocation26_spill] sm:$0xff] }
 0x3ea   :  { %1416 = vadd.xlane.f32.xlu2 %v5212_v63  ;;  %3789 = vrcp.f32 %v1073_v56  ;;  %3525 = vmatmul.msk.f32.gmra.mxu3 %vm78_vm0, %v1916_v55  ;;  %v6414_v56 = vld [vmem:[#allocation6_spill] sm:$0xff] }
 0x3eb   :  { %v3784_v11 = vpop.eup %3783  ;;  %3542 = vmatmul.msk.f32.gmra.mxu0 %vm78_vm0, %v2260_v13  ;;  %6413 = vst [vmem:[#allocation19_spill] sm:$0xff] %v5225_v58  ;;  %v5228_v20 = vperm.slane %v6414_v56, 0 }
 0x3ec   :  { %v3786_v8 = vpop.eup %3785  ;;  %v733_v50 = vpop.xlane.xlu2 %732  ;;  %v764_v30 = vmul.f32 %v3784_v11, %v6411_v37 }
 0x3ed   :  { %v1075_v16 = vpop.xlane.xlu1 %1074  ;;  %3791 = vrcp.f32 %v733_v50  ;;  %6415 = vst [vmem:[#allocation20_spill] sm:$0xff] %v5228_v20  ;;  %v5231_v4 = vmul.f32 %v3786_v8, %v4932_v52  ;;  %v6419_v50 = vld [vmem:[#allocation9_spill] sm:$0xff] }
 0x3ee   :  { %v1339_v6 = vpop.f32.mrf.mxu3  ;;  %1162 = vmatmul.f32.gmra.mxu1 %v1106_v2  ;;  %3793 = vpow2.f32 %v1716_v15  ;;  %v2589_v2 = vmul.f32 %v5225_v58, %v6419_v50 }
 0x3ef   :  { %v3788_v55 = vpop.eup %3787  ;;  %v1372_v0 = vmul.f32 1.442695, %v1339_v6  ;;  %3795 = vpow2.f32 %v1714_v22  ;;  %6416 = vst [vmem:[#allocation13_spill] sm:$0xff] %v5231_v4  ;;  %v2933_v6 = vmul.f32 %v5228_v20, %v6419_v50  ;;  %v6420_v22 = vld [vmem:[#allocation29_spill] sm:$0xff] }
 0x3f0   :  { %824 = vmatmul.f32.gmra.mxu2 %v764_v30  ;;  %v2326_v13 = vpop.f32.mrf.mxu0  ;;  %v5234_v11 = vmul.f32 %v3788_v55, %v6417_v21  ;;  %v3790_v5 = vpop.eup %3789  ;;  %v6421_v55 = vld [vmem:[#allocation32_spill] sm:$0xff] }
 0x3f1   :  { %3797 = vpow2.f32 %v1372_v0  ;;  %1760 = vadd.xlane.f32.xlu1 %v5231_v4  ;;  %v2374_v15 = vmul.f32 1.442695, %v2326_v13  ;;  %v1107_v8 = vmul.f32 %v3790_v5, %v6420_v22 }
 0x3f2   :  { %6418 = vst [vmem:[#allocation21_spill] sm:$0xff] %v5234_v11  ;;  %1418 = vadd.xlane.f32.xlu2 %v5234_v11  ;;  %3799 = vrcp.f32 %v1075_v16  ;;  %3544 = vmatmul.msk.f32.vlgmr.msra.gmra.mxu3 %vm78_vm0, %v2589_v2 }
 0x3f3   :  { %v3792_v52 = vpop.eup %3791  ;;  %3561 = vmatmul.msk.f32.vlgmr.msrb.gmra.mxu0 %vm78_vm0, %v2933_v6 }
 0x3f4   :  { %v3794_v37 = vpop.eup %3793  ;;  %v1077_v56 = vpop.xlane.xlu2 %1076  ;;  %v765_v0 = vmul.f32 %v3792_v52, %v6421_v55  ;;  %v6422_v52 = vld [vmem:[#allocation10_spill] sm:$0xff] }
 0x3f5   :  { %v1391_v30 = vpop.xlane.xlu1 %1390  ;;  %v3796_v4 = vpop.eup %3795  ;;  %v5247_v50 = vmul.f32 %v3794_v37, %v4976_v25  ;;  %v2590_v22 = vmul.f32 %v5225_v58, %v6422_v52 }
 0x3f6   :  { %3801 = vrcp.f32 %v1391_v30  ;;  %v1982_v11 = vpop.f32.mrf.mxu3  ;;  %1165 = vmatmul.f32.gmra.mxu1 %v1107_v8  ;;  %v5253_v6 = vmul.f32 %v3796_v4, %v6417_v21 }
 0x3f7   :  { %v3798_v42 = vpop.eup %3797  ;;  %3803 = vpow2.f32 %v2374_v15  ;;  %v2030_v16 = vmul.f32 1.442695, %v1982_v11  ;;  %v2934_v11 = vmul.f32 %v5228_v20, %v6422_v52 }
 0x3f8   :  { %827 = vmatmul.f32.gmra.mxu2 %v765_v0  ;;  %v2329_v13 = vpop.f32.mrf.mxu0  ;;  %v5250_v2 = vmul.f32 %v3798_v42, %v4976_v25  ;;  %v3800_v5 = vpop.eup %3799  ;;  %v6423_v42 = vld [vmem:[#allocation31_spill] sm:$0xff] }
 0x3f9   :  { %3805 = vpow2.f32 %v2030_v16  ;;  %1764 = vadd.xlane.f32.xlu1 %v5247_v50  ;;  %v1108_v4 = vmul.f32 %v3800_v5, %v6423_v42  ;;  %v2935_v42 = vmul.f32 %v5228_v20, %v4520_v23 }
 0x3fa   :  { %1420 = vadd.xlane.f32.xlu0 %v5250_v2  ;;  %3807 = vrcp.f32 %v1077_v56  ;;  %1762 = vadd.xlane.f32.xlu2 %v5253_v6  ;;  %v5269_v56 = vld [vmem:[%s6270_s11] sm:$0xff] }
 0x3fb   :  { %3545 = vmatmul.msk.f32.gmra.mxu3 %vm78_vm0, %v2590_v22  ;;  %3562 = vmatmul.msk.f32.gmra.mxu0 %vm78_vm0, %v2934_v11  ;;  %v2591_v11 = vmul.f32 %v5225_v58, %v4520_v23 }
 0x3fc   :  { %v3802_v25 = vpop.eup %3801  ;;  %v1393_v8 = vpop.xlane.xlu2 %1392 }
 0x3fd   :  { %v3804_v21 = vpop.eup %3803  ;;  %v1735_v15 = vpop.xlane.xlu1 %1734  ;;  %v1438_v37 = vmul.f32 %v3802_v25, %v4995_v9  ;;  %3809 = vrcp.f32 %v1393_v8  ;;  %v2376_v25 = vmul.f32 1.442695, %v2329_v13 }
 0x3fe   :  { %v1985_v30 = vpop.f32.mrf.mxu3  ;;  %1168 = vmatmul.f32.gmra.mxu1 %v1108_v4  ;;  %v5272_v16 = vmul.f32 %v5269_v56, %v3804_v21 }
 0x3ff   :  { %v3806_v55 = vpop.eup %3805  ;;  %v2032_v0 = vmul.f32 1.442695, %v1985_v30 }
 0x400   :  { %1470 = vmatmul.f32.vlgmr.msrb.gmra.mxu2 %v1438_v37  ;;  %6424 = vst [vmem:[#allocation22_spill] sm:$0xff] %v5272_v16  ;;  %v5275_v5 = vmul.f32 %v5269_v56, %v3806_v55  ;;  %v3808_v52 = vpop.eup %3807  ;;  %v2332_v9 = vpop.f32.mrf.mxu0 }
 0x401   :  { %3811 = vpow2.f32 %v2032_v0  ;;  %2842 = vmatpush.xpose.msrb.mxu2 %v4553_v43  ;;  %v5278_v22 = vpop.f32.mrf.mxu2  ;;  %2422 = vadd.xlane.f32.xlu1 %v5272_v16  ;;  %v1109_v4 = vmul.f32 %v3808_v52, %v4998_v40 }
 0x402   :  { %2078 = vadd.xlane.f32.xlu0 %v5275_v5  ;;  %3813 = vrcp.f32 %v1735_v15  ;;  %v5294_v15 = vld [vmem:[%s6270_s11 + $0x8] sm:$0xff] }
 0x403   :  { %3546 = vmatmul.msk.f32.gmra.mxu3 %vm78_vm0, %v2591_v11  ;;  %3563 = vmatmul.msk.f32.gmra.mxu0 %vm78_vm0, %v2935_v42  ;;  %v3810_v21 = vpop.eup %3809  ;;  %3815 = vpow2.f32 %v2376_v25  ;;  %v2378_v42 = vmul.f32 1.442695, %v2332_v9 }
 0x404   :  { %v1395_v37 = vpop.xlane.xlu2 %1394  ;;  %v1439_v30 = vmul.f32 %v3810_v21, %v5015_v17  ;;  %v6426_v17 = vld [vmem:[#allocation11_spill] sm:$0xff] }
 0x405   :  { %2843 = vmatpush.xpose.msrb.mxu2 %v4558_v46  ;;  %v1737_v8 = vpop.xlane.xlu1 %1736  ;;  %3817 = vrcp.f32 %v1395_v37  ;;  %v2592_v25 = vmul.f32 %v5225_v58, %v6426_v17 }
 0x406   :  { %v1988_v13 = vpop.f32.mrf.mxu3  ;;  %1171 = vmatmul.f32.gmra.mxu1 %v1109_v4  ;;  %v2936_v4 = vmul.f32 %v5228_v20, %v6426_v17 }
 0x407   :  { %v3812_v55 = vpop.eup %3811  ;;  %v2034_v23 = vmul.f32 1.442695, %v1988_v13  ;;  %v6427_v13 = vld [vmem:[#allocation33_spill] sm:$0xff] }
 0x408   :  { %1473 = vmatmul.f32.gmra.mxu2 %v1439_v30  ;;  %v5297_v40 = vmul.f32 %v5294_v15, %v3812_v55  ;;  %v3814_v0 = vpop.eup %3813  ;;  %v2335_v52 = vpop.f32.mrf.mxu0 }
 0x409   :  { %3819 = vpow2.f32 %v2034_v23  ;;  %2844 = vmatpush.xpose.msrb.mxu2 %v4571_v24  ;;  %v5300_v11 = vpop.f32.mrf.mxu2  ;;  %v3816_v37 = vpop.eup %3815  ;;  %v1782_v30 = vmul.f32 %v3814_v0, %v6427_v13  ;;  %v5318_v0 = vld [vmem:[%s6270_s11 + $0x10] sm:$0xff]  ;;  %v2380_v13 = vmul.f32 1.442695, %v2335_v52 }
 0x40a   :  { %6425 = vst [vmem:[#allocation14_spill] sm:$0xff] %v5300_v11  ;;  %2080 = vadd.xlane.f32.xlu2 %v5297_v40  ;;  %3821 = vrcp.f32 %v1737_v8 }
 0x40b   :  { %3547 = vmatmul.msk.f32.gmra.mxu3 %vm78_vm0, %v2592_v25  ;;  %v5308_v21 = vpop.f32.mrf.mxu1  ;;  %3564 = vmatmul.msk.f32.gmra.mxu0 %vm78_vm0, %v2936_v4  ;;  %v3818_v55 = vpop.eup %3817  ;;  %3823 = vpow2.f32 %v2378_v42  ;;  %v5324_v42 = vmul.f32 %v5294_v15, %v3816_v37 }
 0x40c   :  { %v1440_v11 = vmul.f32 %v3818_v55, %v5033_v29 }
 0x40d   :  { %2845 = vmatpush.xpose.msrb.mxu2 %v4576_v27  ;;  %v1739_v23 = vpop.xlane.xlu1 %1738  ;;  %v1397_v9 = vpop.xlane.xlu2 %1396  ;;  %6428 = vst [vmem:[#allocation23_spill] sm:$0xff] %v5324_v42 }
 0x40e   :  { %v1991_v16 = vpop.f32.mrf.mxu3  ;;  %1814 = vmatmul.f32.vlgmr.msra.gmra.mxu1 %v1782_v30  ;;  %3825 = vrcp.f32 %v1397_v9 }
 0x40f   :  { %v3820_v8 = vpop.eup %3819  ;;  %v2036_v17 = vmul.f32 1.442695, %v1991_v16  ;;  %3186 = vmatpush.xpose.msra.mxu1 %v4553_v43  ;;  %v2593_v16 = vmul.f32 %v5225_v58, %v4536_v34 }
 0x410   :  { %1476 = vmatmul.f32.gmra.mxu2 %v1440_v11  ;;  %v5321_v25 = vmul.f32 %v5318_v0, %v3820_v8  ;;  %v3822_v4 = vpop.eup %3821  ;;  %v2338_v29 = vpop.f32.mrf.mxu0  ;;  %v2937_v11 = vmul.f32 %v5228_v20, %v4536_v34 }
 0x411   :  { %3827 = vpow2.f32 %v2036_v17  ;;  %v3824_v30 = vpop.eup %3823  ;;  %v1783_v52 = vmul.f32 %v3822_v4, %v5030_v10 }
 0x412   :  { %v5328_v43 = vpop.f32.mrf.mxu2  ;;  %2082 = vadd.xlane.f32.xlu0 %v5321_v25  ;;  %2424 = vadd.xlane.f32.xlu2 %v5324_v42  ;;  %3829 = vrcp.f32 %v1739_v23  ;;  %v5351_v4 = vmul.f32 %v5318_v0, %v3824_v30 }
 0x413   :  { %3548 = vmatmul.msk.f32.gmra.mxu3 %vm78_vm0, %v2593_v16  ;;  %3187 = vmatpush.xpose.msra.mxu1 %v4558_v46  ;;  %v5336_v37 = vpop.f32.mrf.mxu1  ;;  %3831 = vpow2.f32 %v2380_v13  ;;  %v5345_v46 = vld [vmem:[%s6270_s11 + $0x18] sm:$0xff]  ;;  %v2594_v13 = vmul.f32 %v5225_v58, %v4544_v39 }
 0x414   :  { %3565 = vmatmul.msk.f32.gmra.mxu0 %vm78_vm0, %v2937_v11  ;;  %v3826_v55 = vpop.eup %3825  ;;  %v2382_v11 = vmul.f32 1.442695, %v2338_v29 }
 0x415   :  { %v1741_v9 = vpop.xlane.xlu1 %1740  ;;  %v1399_v8 = vpop.xlane.xlu2 %1398  ;;  %v1441_v42 = vmul.f32 %v3826_v55, %v5051_v62 }
 0x416   :  { %v1994_v17 = vpop.f32.mrf.mxu3  ;;  %1817 = vmatmul.f32.gmra.mxu1 %v1783_v52  ;;  %3833 = vrcp.f32 %v1399_v8 }
 0x417   :  { %v3828_v34 = vpop.eup %3827  ;;  %v2038_v23 = vmul.f32 1.442695, %v1994_v17  ;;  %3188 = vmatpush.xpose.msra.mxu1 %v4571_v24 }
 0x418   :  { %1479 = vmatmul.f32.gmra.mxu2 %v1441_v42  ;;  %v5348_v10 = vmul.f32 %v5345_v46, %v3828_v34  ;;  %v3830_v16 = vpop.eup %3829  ;;  %v2341_v62 = vpop.f32.mrf.mxu0  ;;  %v2938_v42 = vmul.f32 %v5228_v20, %v4544_v39 }
 0x419   :  { %3835 = vpow2.f32 %v2038_v23  ;;  %v3832_v52 = vpop.eup %3831  ;;  %v1784_v29 = vmul.f32 %v3830_v16, %v5048_v14 }
 0x41a   :  { %v5355_v24 = vpop.f32.mrf.mxu2  ;;  %2084 = vadd.xlane.f32.xlu1 %v5348_v10  ;;  %2426 = vadd.xlane.f32.xlu0 %v5351_v4  ;;  %3837 = vrcp.f32 %v1741_v9 }
 0x41b   :  { %3549 = vmatmul.msk.f32.gmra.mxu3 %vm78_vm0, %v2594_v13  ;;  %3189 = vmatpush.xpose.msra.mxu1 %v4576_v27  ;;  %v5363_v30 = vpop.f32.mrf.mxu1  ;;  %3839 = vpow2.f32 %v2382_v11  ;;  %v5369_v27 = vmul.f32 %v5345_v46, %v3832_v52  ;;  %v5374_v13 = vld [vmem:[%s6270_s11 + $0x20] sm:$0xff]  ;;  %v2939_v52 = vmul.f32 %v5228_v20, %v4560_v48 }
 0x41c   :  { %3566 = vmatmul.msk.f32.gmra.mxu0 %vm78_vm0, %v2938_v42  ;;  %v3834_v55 = vpop.eup %3833  ;;  %v2384_v42 = vmul.f32 1.442695, %v2341_v62 }
 0x41d   :  { %v1743_v8 = vpop.xlane.xlu1 %1742  ;;  %v1401_v17 = vpop.xlane.xlu2 %1400  ;;  %v1442_v23 = vmul.f32 %v3834_v55, %v5068_v19  ;;  %6429 = vst [vmem:[#allocation15_spill] sm:$0xff] %v5369_v27  ;;  %v2595_v19 = vmul.f32 %v5225_v58, %v4560_v48 }
 0x41e   :  { %v1997_v34 = vpop.f32.mrf.mxu3  ;;  %1820 = vmatmul.f32.gmra.mxu1 %v1784_v29  ;;  %3841 = vrcp.f32 %v1401_v17 }
 0x41f   :  { %v3836_v39 = vpop.eup %3835  ;;  %v2040_v9 = vmul.f32 1.442695, %v1997_v34 }
 0x420   :  { %1482 = vmatmul.f32.gmra.mxu2 %v1442_v23  ;;  %v5377_v14 = vmul.f32 %v5374_v13, %v3836_v39  ;;  %v3838_v16 = vpop.eup %3837  ;;  %v2344_v11 = vpop.f32.mrf.mxu0 }
 0x421   :  { %3843 = vpow2.f32 %v2040_v9  ;;  %v3840_v17 = vpop.eup %3839  ;;  %v1785_v34 = vmul.f32 %v3838_v16, %v5065_v36 }
 0x422   :  { %2428 = vadd.xlane.f32.xlu1 %v5369_v27  ;;  %2086 = vadd.xlane.f32.xlu2 %v5377_v14  ;;  %3845 = vrcp.f32 %v1743_v8  ;;  %v5402_v36 = vmul.f32 %v5374_v13, %v3840_v17 }
 0x423   :  { %v5385_v29 = vpop.f32.mrf.mxu2  ;;  %3550 = vmatmul.msk.f32.gmra.mxu3 %vm78_vm0, %v2595_v19  ;;  %v5388_v55 = vpop.f32.mrf.mxu1  ;;  %3847 = vpow2.f32 %v2384_v42  ;;  %v5396_v19 = vld [vmem:[%s6270_s11 + $0x28] sm:$0xff] }
 0x424   :  { %3567 = vmatmul.msk.f32.gmra.mxu0 %vm78_vm0, %v2939_v52  ;;  %v3842_v62 = vpop.eup %3841  ;;  %6431 = vst [vmem:[#allocation25_spill] sm:$0xff] %v5402_v36 }
 0x425   :  { %v1745_v23 = vpop.xlane.xlu1 %1744  ;;  %v1403_v39 = vpop.xlane.xlu2 %1402  ;;  %v1443_v27 = vmul.f32 %v3842_v62, %v5084_v49  ;;  %v2596_v49 = vmul.f32 %v5225_v58, %v4578_v53 }
 0x426   :  { %v2000_v9 = vpop.f32.mrf.mxu3  ;;  %1823 = vmatmul.f32.gmra.mxu1 %v1785_v34  ;;  %3849 = vrcp.f32 %v1403_v39  ;;  %v2386_v34 = vmul.f32 1.442695, %v2344_v11 }
 0x427   :  { %v3844_v48 = vpop.eup %3843  ;;  %v2042_v8 = vmul.f32 1.442695, %v2000_v9 }
 0x428   :  { %1485 = vmatmul.f32.gmra.mxu2 %v1443_v27  ;;  %v5399_v52 = vmul.f32 %v5396_v19, %v3844_v48  ;;  %v3846_v16 = vpop.eup %3845  ;;  %v2347_v42 = vpop.f32.mrf.mxu0  ;;  %v2940_v27 = vmul.f32 %v5228_v20, %v4578_v53 }
 0x429   :  { %3851 = vpow2.f32 %v2042_v8  ;;  %v3848_v39 = vpop.eup %3847  ;;  %v1786_v9 = vmul.f32 %v3846_v16, %v5081_v35 }
 0x42a   :  { %6430 = vst [vmem:[#allocation24_spill] sm:$0xff] %v5399_v52  ;;  %2088 = vadd.xlane.f32.xlu0 %v5399_v52  ;;  %2430 = vadd.xlane.f32.xlu2 %v5402_v36  ;;  %3853 = vrcp.f32 %v1745_v23  ;;  %v5427_v35 = vmul.f32 %v5396_v19, %v3848_v39 }
 0x42b   :  { %v5410_v62 = vpop.f32.mrf.mxu2  ;;  %3551 = vmatmul.msk.f32.gmra.mxu3 %vm78_vm0, %v2596_v49  ;;  %v5413_v17 = vpop.f32.mrf.mxu1  ;;  %3855 = vpow2.f32 %v2386_v34  ;;  %v5421_v49 = vld [vmem:[%s6270_s11 + $0x30] sm:$0xff] }
 0x42c   :  { %3568 = vmatmul.msk.f32.gmra.mxu0 %vm78_vm0, %v2940_v27  ;;  %v3850_v11 = vpop.eup %3849  ;;  %6433 = vst [vmem:[#allocation5_spill] sm:$0xff] %v5427_v35 }
 0x42d   :  { %v1747_v48 = vpop.xlane.xlu1 %1746  ;;  %v1405_v8 = vpop.xlane.xlu2 %1404  ;;  %v1444_v52 = vmul.f32 %v3850_v11, %v5100_v38  ;;  %v2597_v38 = vmul.f32 %v5225_v58, %v4592_v32 }
 0x42e   :  { %v2003_v36 = vpop.f32.mrf.mxu3  ;;  %1826 = vmatmul.f32.gmra.mxu1 %v1786_v9  ;;  %3857 = vrcp.f32 %v1405_v8  ;;  %v2388_v9 = vmul.f32 1.442695, %v2347_v42 }
 0x42f   :  { %v3852_v53 = vpop.eup %3851  ;;  %v2044_v23 = vmul.f32 1.442695, %v2003_v36 }
 0x430   :  { %1488 = vmatmul.f32.gmra.mxu2 %v1444_v52  ;;  %v5424_v27 = vmul.f32 %v5421_v49, %v3852_v53  ;;  %v3854_v16 = vpop.eup %3853  ;;  %v2350_v34 = vpop.f32.mrf.mxu0  ;;  %v2941_v52 = vmul.f32 %v5228_v20, %v4592_v32 }
 0x431   :  { %3859 = vpow2.f32 %v2044_v23  ;;  %v3856_v11 = vpop.eup %3855  ;;  %v1787_v8 = vmul.f32 %v3854_v16, %v5097_v61 }
 0x432   :  { %6432 = vst [vmem:[#allocation30_spill] sm:$0xff] %v5424_v27  ;;  %2090 = vadd.xlane.f32.xlu1 %v5424_v27  ;;  %2432 = vadd.xlane.f32.xlu0 %v5427_v35  ;;  %3861 = vrcp.f32 %v1747_v48 }
 0x433   :  { %v5435_v36 = vpop.f32.mrf.mxu2  ;;  %3552 = vmatmul.msk.f32.gmra.mxu3 %vm78_vm0, %v2597_v38  ;;  %v5438_v39 = vpop.f32.mrf.mxu1  ;;  %3863 = vpow2.f32 %v2388_v9  ;;  %v5444_v38 = vmul.f32 %v5421_v49, %v3856_v11 }
 0x434   :  { %3569 = vmatmul.msk.f32.gmra.mxu0 %vm78_vm0, %v2941_v52  ;;  %v3858_v42 = vpop.eup %3857  ;;  %v5449_v52 = vld [vmem:[%s6270_s11 + $0x38] sm:$0xff] }
 0x435   :  { %v1749_v53 = vpop.xlane.xlu1 %1748  ;;  %v1407_v23 = vpop.xlane.xlu2 %1406  ;;  %v1445_v27 = vmul.f32 %v3858_v42, %v5116_v3  ;;  %6434 = vst [vmem:[#allocation6_spill] sm:$0xff] %v5444_v38  ;;  %v2598_v3 = vmul.f32 %v5225_v58, %v4604_v59 }
 0x436   :  { %v2006_v35 = vpop.f32.mrf.mxu3  ;;  %1829 = vmatmul.f32.gmra.mxu1 %v1787_v8  ;;  %3865 = vrcp.f32 %v1407_v23  ;;  %v2390_v8 = vmul.f32 1.442695, %v2350_v34 }
 0x437   :  { %v3860_v32 = vpop.eup %3859  ;;  %v2046_v48 = vmul.f32 1.442695, %v2006_v35 }
 0x438   :  { %1491 = vmatmul.f32.gmra.mxu2 %v1445_v27  ;;  %v5452_v61 = vmul.f32 %v5449_v52, %v3860_v32  ;;  %v3862_v16 = vpop.eup %3861  ;;  %v2353_v9 = vpop.f32.mrf.mxu0  ;;  %v2942_v27 = vmul.f32 %v5228_v20, %v4604_v59 }
 0x439   :  { %3867 = vpow2.f32 %v2046_v48  ;;  %v3864_v42 = vpop.eup %3863  ;;  %v1788_v23 = vmul.f32 %v3862_v16, %v5113_v45 }
 0x43a   :  { %6435 = vst [vmem:[#allocation26_spill] sm:$0xff] %v5452_v61  ;;  %2434 = vadd.xlane.f32.xlu1 %v5444_v38  ;;  %2092 = vadd.xlane.f32.xlu2 %v5452_v61  ;;  %3869 = vrcp.f32 %v1749_v53  ;;  %v5477_v45 = vmul.f32 %v5449_v52, %v3864_v42 }
 0x43b   :  { %v5460_v35 = vpop.f32.mrf.mxu2  ;;  %3553 = vmatmul.msk.f32.gmra.mxu3 %vm78_vm0, %v2598_v3  ;;  %v5463_v11 = vpop.f32.mrf.mxu1  ;;  %3871 = vpow2.f32 %v2390_v8  ;;  %v5471_v3 = vld [vmem:[%s6270_s11 + $0x40] sm:$0xff] }
 0x43c   :  { %3570 = vmatmul.msk.f32.gmra.mxu0 %vm78_vm0, %v2942_v27  ;;  %v3866_v34 = vpop.eup %3865  ;;  %6437 = vst [vmem:[#allocation29_spill] sm:$0xff] %v5477_v45 }
 0x43d   :  { %v1751_v32 = vpop.xlane.xlu1 %1750  ;;  %v1409_v48 = vpop.xlane.xlu2 %1408  ;;  %v1446_v61 = vmul.f32 %v3866_v34, %v5132_v47  ;;  %v2599_v47 = vmul.f32 %v5225_v58, %v4612_v51 }
 0x43e   :  { %v2009_v38 = vpop.f32.mrf.mxu3  ;;  %1832 = vmatmul.f32.gmra.mxu1 %v1788_v23  ;;  %3873 = vrcp.f32 %v1409_v48  ;;  %v2392_v23 = vmul.f32 1.442695, %v2353_v9 }
 0x43f   :  { %v3868_v59 = vpop.eup %3867  ;;  %v2048_v53 = vmul.f32 1.442695, %v2009_v38  ;;  %v2943_v38 = vmul.f32 %v5228_v20, %v4612_v51 }
 0x440   :  { %1494 = vmatmul.f32.gmra.mxu2 %v1446_v61  ;;  %v5474_v27 = vmul.f32 %v5471_v3, %v3868_v59  ;;  %v3870_v16 = vpop.eup %3869  ;;  %v2356_v8 = vpop.f32.mrf.mxu0 }
 0x441   :  { %3875 = vpow2.f32 %v2048_v53  ;;  %v3872_v34 = vpop.eup %3871  ;;  %v1789_v48 = vmul.f32 %v3870_v16, %v5129_v57 }
 0x442   :  { %6436 = vst [vmem:[#allocation9_spill] sm:$0xff] %v5474_v27  ;;  %2094 = vadd.xlane.f32.xlu0 %v5474_v27  ;;  %2436 = vadd.xlane.f32.xlu2 %v5477_v45  ;;  %3877 = vrcp.f32 %v1751_v32  ;;  %v5502_v57 = vmul.f32 %v5471_v3, %v3872_v34 }
 0x443   :  { %v5485_v61 = vpop.f32.mrf.mxu2  ;;  %3554 = vmatmul.msk.f32.gmra.mxu3 %vm78_vm0, %v2599_v47  ;;  %v5488_v42 = vpop.f32.mrf.mxu1  ;;  %3879 = vpow2.f32 %v2392_v23  ;;  %v5496_v47 = vld [vmem:[%s6270_s11 + $0x48] sm:$0xff] }
 0x444   :  { %3571 = vmatmul.msk.f32.gmra.mxu0 %vm78_vm0, %v2943_v38  ;;  %v3874_v9 = vpop.eup %3873  ;;  %6439 = vst [vmem:[#allocation10_spill] sm:$0xff] %v5502_v57 }
 0x445   :  { %v1753_v59 = vpop.xlane.xlu1 %1752  ;;  %v1411_v53 = vpop.xlane.xlu2 %1410  ;;  %v1447_v27 = vmul.f32 %v3874_v9, %v5148_v31  ;;  %v2600_v31 = vmul.f32 %v5225_v58, %v6398_v28 }
 0x446   :  { %v2012_v45 = vpop.f32.mrf.mxu3  ;;  %1835 = vmatmul.f32.gmra.mxu1 %v1789_v48  ;;  %3881 = vrcp.f32 %v1411_v53  ;;  %v2394_v48 = vmul.f32 1.442695, %v2356_v8 }
 0x447   :  { %v3876_v51 = vpop.eup %3875  ;;  %v2050_v32 = vmul.f32 1.442695, %v2012_v45 }
 0x448   :  { %1497 = vmatmul.f32.gmra.mxu2 %v1447_v27  ;;  %v5499_v38 = vmul.f32 %v5496_v47, %v3876_v51  ;;  %v3878_v16 = vpop.eup %3877  ;;  %v2359_v23 = vpop.f32.mrf.mxu0  ;;  %v2944_v27 = vmul.f32 %v5228_v20, %v6398_v28 }
 0x449   :  { %3883 = vpow2.f32 %v2050_v32  ;;  %v3880_v9 = vpop.eup %3879  ;;  %v1790_v53 = vmul.f32 %v3878_v16, %v5145_v12 }
 0x44a   :  { %6438 = vst [vmem:[#allocation32_spill] sm:$0xff] %v5499_v38  ;;  %2096 = vadd.xlane.f32.xlu1 %v5499_v38  ;;  %2438 = vadd.xlane.f32.xlu0 %v5502_v57  ;;  %3885 = vrcp.f32 %v1753_v59 }
 0x44b   :  { %v5510_v45 = vpop.f32.mrf.mxu2  ;;  %3555 = vmatmul.msk.f32.gmra.mxu3 %vm78_vm0, %v2600_v31  ;;  %v5513_v34 = vpop.f32.mrf.mxu1  ;;  %3887 = vpow2.f32 %v2394_v48  ;;  %v5519_v31 = vmul.f32 %v5496_v47, %v3880_v9 }
 0x44c   :  { %3572 = vmatmul.msk.f32.gmra.mxu0 %vm78_vm0, %v2944_v27  ;;  %v3882_v8 = vpop.eup %3881  ;;  %v5524_v27 = vld [vmem:[%s6270_s11 + $0x50] sm:$0xff] }
 0x44d   :  { %v1755_v51 = vpop.xlane.xlu1 %1754  ;;  %v1413_v32 = vpop.xlane.xlu2 %1412  ;;  %v1448_v38 = vmul.f32 %v3882_v8, %v5164_v33  ;;  %6440 = vst [vmem:[#allocation31_spill] sm:$0xff] %v5519_v31  ;;  %v2601_v33 = vmul.f32 %v5225_v58, %v6401_v44 }
 0x44e   :  { %v2015_v57 = vpop.f32.mrf.mxu3  ;;  %1838 = vmatmul.f32.gmra.mxu1 %v1790_v53  ;;  %3889 = vrcp.f32 %v1413_v32  ;;  %v2396_v53 = vmul.f32 1.442695, %v2359_v23 }
 0x44f   :  { %v3884_v28 = vpop.eup %3883  ;;  %v2052_v59 = vmul.f32 1.442695, %v2015_v57 }
 0x450   :  { %1500 = vmatmul.f32.gmra.mxu2 %v1448_v38  ;;  %v5527_v12 = vmul.f32 %v5524_v27, %v3884_v28  ;;  %v3886_v16 = vpop.eup %3885  ;;  %v2362_v48 = vpop.f32.mrf.mxu0  ;;  %v2945_v38 = vmul.f32 %v5228_v20, %v6401_v44 }
 0x451   :  { %3891 = vpow2.f32 %v2052_v59  ;;  %v3888_v8 = vpop.eup %3887  ;;  %v1791_v32 = vmul.f32 %v3886_v16, %v5161_v18 }
 0x452   :  { %6441 = vst [vmem:[#allocation11_spill] sm:$0xff] %v5527_v12  ;;  %2440 = vadd.xlane.f32.xlu1 %v5519_v31  ;;  %2098 = vadd.xlane.f32.xlu2 %v5527_v12  ;;  %3893 = vrcp.f32 %v1755_v51  ;;  %v5552_v18 = vmul.f32 %v5524_v27, %v3888_v8 }
 0x453   :  { %v5535_v57 = vpop.f32.mrf.mxu2  ;;  %3556 = vmatmul.msk.f32.gmra.mxu3 %vm78_vm0, %v2601_v33  ;;  %v5538_v9 = vpop.f32.mrf.mxu1  ;;  %3895 = vpow2.f32 %v2396_v53  ;;  %v5546_v33 = vld [vmem:[%s6270_s11 + $0x58] sm:$0xff] }
 0x454   :  { %3573 = vmatmul.msk.f32.gmra.mxu0 %vm78_vm0, %v2945_v38  ;;  %v3890_v23 = vpop.eup %3889  ;;  %6443 = vst [vmem:[#allocation34_spill] sm:$0xff] %v5552_v18 }
 0x455   :  { %v1757_v28 = vpop.xlane.xlu1 %1756  ;;  %v1415_v59 = vpop.xlane.xlu2 %1414  ;;  %v1449_v12 = vmul.f32 %v3890_v23, %v5180_v7  ;;  %v2602_v7 = vmul.f32 %v5225_v58, %v6404_v41 }
 0x456   :  { %v2018_v31 = vpop.f32.mrf.mxu3  ;;  %1841 = vmatmul.f32.gmra.mxu1 %v1791_v32  ;;  %3897 = vrcp.f32 %v1415_v59  ;;  %v2398_v32 = vmul.f32 1.442695, %v2362_v48 }
 0x457   :  { %v3892_v44 = vpop.eup %3891  ;;  %v2054_v51 = vmul.f32 1.442695, %v2018_v31  ;;  %v2946_v31 = vmul.f32 %v5228_v20, %v6404_v41 }
 0x458   :  { %1503 = vmatmul.f32.gmra.mxu2 %v1449_v12  ;;  %v5549_v38 = vmul.f32 %v5546_v33, %v3892_v44  ;;  %v3894_v16 = vpop.eup %3893  ;;  %v2365_v53 = vpop.f32.mrf.mxu0 }
 0x459   :  { %3899 = vpow2.f32 %v2054_v51  ;;  %v3896_v23 = vpop.eup %3895  ;;  %v1792_v59 = vmul.f32 %v3894_v16, %v5177_v1 }
 0x45a   :  { %6442 = vst [vmem:[#allocation33_spill] sm:$0xff] %v5549_v38  ;;  %2100 = vadd.xlane.f32.xlu0 %v5549_v38  ;;  %2442 = vadd.xlane.f32.xlu2 %v5552_v18  ;;  %3901 = vrcp.f32 %v1757_v28  ;;  %v5577_v1 = vmul.f32 %v5546_v33, %v3896_v23 }
 0x45b   :  { %v5560_v12 = vpop.f32.mrf.mxu2  ;;  %3557 = vmatmul.msk.f32.gmra.mxu3 %vm78_vm0, %v2602_v7  ;;  %v5563_v8 = vpop.f32.mrf.mxu1  ;;  %3903 = vpow2.f32 %v2398_v32  ;;  %v5571_v7 = vld [vmem:[%s6270_s11 + $0x60] sm:$0xff] }
 0x45c   :  { %3574 = vmatmul.msk.f32.gmra.mxu0 %vm78_vm0, %v2946_v31  ;;  %v3898_v48 = vpop.eup %3897  ;;  %6444 = vst [vmem:[#allocation35_spill] sm:$0xff] %v5571_v7 }
 0x45d   :  { %v1417_v44 = vpop.xlane.xlu2 %1416  ;;  %v1759_v51 = vpop.xlane.xlu1 %1758  ;;  %v1450_v38 = vmul.f32 %v3898_v48, %v5196_v54  ;;  %6446 = vst [vmem:[#allocation37_spill] sm:$0xff] %v5577_v1  ;;  %v2603_v54 = vmul.f32 %v5225_v58, %v6406_v60 }
 0x45e   :  { %v2021_v18 = vpop.f32.mrf.mxu3  ;;  %1844 = vmatmul.f32.gmra.mxu1 %v1792_v59  ;;  %3905 = vrcp.f32 %v1417_v44  ;;  %v2400_v59 = vmul.f32 1.442695, %v2365_v53 }
 0x45f   :  { %v3900_v41 = vpop.eup %3899  ;;  %v2056_v28 = vmul.f32 1.442695, %v2021_v18 }
 0x460   :  { %1506 = vmatmul.f32.gmra.mxu2 %v1450_v38  ;;  %v5574_v31 = vmul.f32 %v5571_v7, %v3900_v41  ;;  %v3902_v16 = vpop.eup %3901  ;;  %v2368_v32 = vpop.f32.mrf.mxu0  ;;  %v2947_v38 = vmul.f32 %v5228_v20, %v6406_v60 }
 0x461   :  { %3907 = vpow2.f32 %v2056_v28  ;;  %v3904_v48 = vpop.eup %3903  ;;  %v1793_v44 = vmul.f32 %v3902_v16, %v5193_v26 }
 0x462   :  { %6445 = vst [vmem:[#allocation36_spill] sm:$0xff] %v5574_v31  ;;  %2102 = vadd.xlane.f32.xlu1 %v5574_v31  ;;  %2444 = vadd.xlane.f32.xlu0 %v5577_v1  ;;  %3909 = vrcp.f32 %v1759_v51 }
 0x463   :  { %v5585_v18 = vpop.f32.mrf.mxu2  ;;  %3558 = vmatmul.msk.f32.gmra.mxu3 %vm78_vm0, %v2603_v54  ;;  %v5588_v23 = vpop.f32.mrf.mxu1  ;;  %3911 = vpow2.f32 %v2400_v59  ;;  %v5594_v54 = vmul.f32 %v5571_v7, %v3904_v48  ;;  %v6450_v59 = vld [vmem:[#allocation16_spill] sm:$0xff]  ;;  %v6453_v7 = vld [vmem:[#allocation21_spill] sm:$0xff] }
 0x464   :  { %6447 = vst [vmem:[#allocation38_spill] sm:$0xff] %v5585_v18  ;;  %3575 = vmatmul.msk.f32.gmra.mxu0 %vm78_vm0, %v2947_v38  ;;  %v3906_v53 = vpop.eup %3905  ;;  %v5599_v38 = vld [vmem:[%s6270_s11 + $0x68] sm:$0xff] }
 0x465   :  { %v1419_v41 = vpop.xlane.xlu2 %1418  ;;  %v1451_v1 = vmul.f32 %v3906_v53, %v5212_v63  ;;  %v1761_v18 = vpop.xlane.xlu1 %1760  ;;  %6448 = vst [vmem:[#allocation39_spill] sm:$0xff] %v5594_v54  ;;  %v2402_v53 = vmul.f32 1.442695, %v2368_v32 }
 0x466   :  { %v2024_v28 = vpop.f32.mrf.mxu3  ;;  %1847 = vmatmul.f32.gmra.mxu1 %v1793_v44  ;;  %3913 = vrcp.f32 %v1419_v41  ;;  %v2604_v44 = vmul.f32 %v5225_v58, %v6450_v59 }
 0x467   :  { %v3908_v60 = vpop.eup %3907  ;;  %v2058_v51 = vmul.f32 1.442695, %v2024_v28 }
 0x468   :  { %1509 = vmatmul.f32.gmra.mxu2 %v1451_v1  ;;  %v5602_v26 = vmul.f32 %v5599_v38, %v3908_v60  ;;  %v3910_v16 = vpop.eup %3909  ;;  %v2371_v63 = vpop.f32.mrf.mxu0  ;;  %v2948_v1 = vmul.f32 %v5228_v20, %v6450_v59 }
 0x469   :  { %3915 = vpow2.f32 %v2058_v51  ;;  %v2404_v48 = vmul.f32 1.442695, %v2371_v63  ;;  %v3912_v60 = vpop.eup %3911  ;;  %v6452_v51 = vld [vmem:[#allocation12_spill] sm:$0xff] }
 0x46a   :  { %6449 = vst [vmem:[#allocation40_spill] sm:$0xff] %v5602_v26  ;;  %2446 = vadd.xlane.f32.xlu1 %v5594_v54  ;;  %2104 = vadd.xlane.f32.xlu2 %v5602_v26  ;;  %3917 = vrcp.f32 %v1761_v18  ;;  %v1794_v32 = vmul.f32 %v3910_v16, %v6452_v51 }
 0x46b   :  { %v5610_v41 = vpop.f32.mrf.mxu2  ;;  %3559 = vmatmul.msk.f32.gmra.mxu3 %vm78_vm0, %v2604_v44  ;;  %v5613_v28 = vpop.f32.mrf.mxu1  ;;  %3919 = vpow2.f32 %v2402_v53  ;;  %v5621_v44 = vld [vmem:[%s6270_s11 + $0x70] sm:$0xff]  ;;  %v5627_v53 = vmul.f32 %v5599_v38, %v3912_v60 }
 0x46c   :  { %6451 = vst [vmem:[#allocation16_spill] sm:$0xff] %v5610_v41  ;;  %3576 = vmatmul.msk.f32.gmra.mxu0 %vm78_vm0, %v2948_v1  ;;  %v3914_v58 = vpop.eup %3913  ;;  %3921 = vpow2.f32 %v2404_v48  ;;  %v6457_v48 = vld [vmem:[#allocation13_spill] sm:$0xff] }
 0x46d   :  { %v1421_v54 = vpop.xlane.xlu0 %1420  ;;  %v1452_v31 = vmul.f32 %v3914_v58, %v6453_v7  ;;  %v1763_v59 = vpop.xlane.xlu2 %1762  ;;  %6455 = vst [vmem:[#allocation21_spill] sm:$0xff] %v5627_v53 }
 0x46e   :  { %v2027_v26 = vpop.f32.mrf.mxu3  ;;  %1850 = vmatmul.f32.gmra.mxu1 %v1794_v32  ;;  %3923 = vrcp.f32 %v1421_v54  ;;  %v1765_v20 = vpop.xlane.xlu1 %1764 }
 0x46f   :  { %v3916_v18 = vpop.eup %3915  ;;  %v2060_v63 = vmul.f32 1.442695, %v2027_v26 }
 0x470   :  { %1512 = vmatmul.f32.gmra.mxu2 %v1452_v31  ;;  %v5624_v16 = vmul.f32 %v5621_v44, %v3916_v18  ;;  %v3918_v1 = vpop.eup %3917  ;;  %v3014_v58 = vpop.f32.mrf.mxu0 }
 0x471   :  { %3925 = vpow2.f32 %v2060_v63  ;;  %v3920_v54 = vpop.eup %3919  ;;  %v3062_v26 = vmul.f32 1.442695, %v3014_v58  ;;  %v1795_v51 = vmul.f32 %v3918_v1, %v6457_v48 }
 0x472   :  { %6454 = vst [vmem:[#allocation12_spill] sm:$0xff] %v5624_v16  ;;  %2106 = vadd.xlane.f32.xlu0 %v5624_v16  ;;  %2448 = vadd.xlane.f32.xlu2 %v5627_v53  ;;  %3927 = vrcp.f32 %v1763_v59  ;;  %v3922_v32 = vpop.eup %3921  ;;  %v5640_v59 = vld [vmem:[%s6270_s11 + $0x78] sm:$0xff]  ;;  %v5646_v1 = vmul.f32 %v5621_v44, %v3920_v54  ;;  %s4172_s11 = smov 128  }
 0x473   :  { %v5631_v7 = vpop.f32.mrf.mxu2  ;;  %v5633_v31 = vpop.f32.mrf.mxu1  ;;  %6458 = vst [vmem:[#allocation13_spill] sm:$0xff] %v5640_v59 }
 0x474   :  { %6456 = vst [vmem:[#allocation41_spill] sm:$0xff] %v5631_v7  ;;  %v3924_v60 = vpop.eup %3923 }
 0x475   :  { %v2079_v18 = vpop.xlane.xlu0 %2078  ;;  %v1453_v53 = vmul.f32 %v3924_v60, %v5250_v2  ;;  %6460 = vst [vmem:[#allocation43_spill] sm:$0xff] %v5646_v1 }
 0x476   :  { %v2670_v41 = vpop.f32.mrf.mxu3  ;;  %1853 = vmatmul.f32.gmra.mxu1 %v1795_v51  ;;  %3929 = vrcp.f32 %v2079_v18 }
 0x477   :  { %v3926_v63 = vpop.eup %3925  ;;  %v2718_v16 = vmul.f32 1.442695, %v2670_v41  ;;  %3931 = vpow2.f32 %v3062_v26  ;;  %v5649_v41 = vmul.f32 %v5640_v59, %v3922_v32 }
 0x478   :  { %v5643_v58 = vmul.f32 %v5640_v59, %v3926_v63  ;;  %v3928_v48 = vpop.eup %3927  ;;  %1515 = vmatmul.f32.gmra.mxu2 %v1453_v53  ;;  %v3017_v51 = vpop.f32.mrf.mxu0 }
 0x479   :  { %3933 = vpow2.f32 %v2718_v16  ;;  %6461 = vst [vmem:[#allocation44_spill] sm:$0xff] %v5649_v41  ;;  %v1796_v54 = vmul.f32 %v3928_v48, %v5253_v6 }
 0x47a   :  { %6459 = vst [vmem:[#allocation42_spill] sm:$0xff] %v5643_v58  ;;  %2108 = vadd.xlane.f32.xlu1 %v5643_v58  ;;  %2450 = vadd.xlane.f32.xlu0 %v5646_v1  ;;  %3935 = vrcp.f32 %v1765_v20  ;;  %v6463_v1 = vld [vmem:[#allocation8_spill] sm:$0xff] }
 0x47b   :  { %2452 = vadd.xlane.f32.xlu2 %v5649_v41  ;;  %v5654_v2 = vpop.f32.mrf.mxu2  ;;  %v5656_v26 = vpop.f32.mrf.mxu1  ;;  %v1175_v20 = vmul.f32 %v5308_v21, %v6463_v1 }
 0x47c   :  { %6462 = vst [vmem:[#allocation45_spill] sm:$0xff] %v5654_v2  ;;  %v3930_v18 = vpop.eup %3929  ;;  %v2423_v41 = vpop.xlane.xlu1 %2422 }
 0x47d   :  { %v2081_v16 = vpop.xlane.xlu2 %2080  ;;  %v3932_v53 = vpop.eup %3931  ;;  %v2126_v60 = vmul.f32 %v3930_v18, %v5275_v5  ;;  %v6466_v5 = vld [vmem:[#allocation7_spill] sm:$0xff] }
 0x47e   :  { %3937 = vrcp.f32 %v2081_v16  ;;  %v2673_v32 = vpop.f32.mrf.mxu3  ;;  %1856 = vmatmul.f32.gmra.mxu1 %v1796_v54  ;;  %v5666_v48 = vmul.f32 %v5269_v56, %v3932_v53  ;;  %v831_v18 = vmul.f32 %v5278_v22, %v6466_v5  ;;  %v3064_v54 = vmul.f32 1.442695, %v3017_v51 }
 0x47f   :  { %v3934_v63 = vpop.eup %3933  ;;  %v2720_v59 = vmul.f32 1.442695, %v2673_v32 }
 0x480   :  { %v5663_v2 = vmul.f32 %v5269_v56, %v3934_v63  ;;  %v3936_v58 = vpop.eup %3935  ;;  %2158 = vmatmul.f32.vlgmr.msra.gmra.mxu2 %v2126_v60  ;;  %v3020_v6 = vpop.f32.mrf.mxu0  ;;  %6465 = vst [vmem:[#allocation46_spill] sm:$0xff] %v5666_v48  ;;  %v1191_v63 = vadd.f32 %v1175_v20, %v831_v18 }
 0x481   :  { %3939 = vpow2.f32 %v2720_v59  ;;  %v6468_v59 = vld [vmem:[#allocation17_spill] sm:$0xff]  ;;  %v1797_v7 = vmul.f32 %v3936_v58, %v5247_v50 }
 0x482   :  { %6464 = vst [vmem:[#allocation8_spill] sm:$0xff] %v5663_v2  ;;  %2766 = vadd.xlane.f32.xlu1 %v5663_v2  ;;  %3941 = vrcp.f32 %v2423_v41  ;;  %v1176_v2 = vmul.f32 %v5336_v37, %v6463_v1 }
 0x483   :  { %3110 = vadd.xlane.f32.xlu2 %v5666_v48  ;;  %v1471_v21 = vpop.f32.mrf.mxu2  ;;  %v5672_v16 = vpop.f32.mrf.mxu1  ;;  %3943 = vpow2.f32 %v3064_v54 }
 0x484   :  { %6467 = vst [vmem:[#allocation7_spill] sm:$0xff] %v5672_v16  ;;  %v3938_v32 = vpop.eup %3937  ;;  %v1519_v60 = vmul.f32 %v1471_v21, %v6468_v59 }
 0x485   :  { %v2083_v56 = vpop.xlane.xlu0 %2082  ;;  %v2127_v53 = vmul.f32 %v3938_v32, %v5297_v40  ;;  %v2425_v16 = vpop.xlane.xlu2 %2424  ;;  %v6470_v40 = vld [vmem:[#allocation14_spill] sm:$0xff] }
 0x486   :  { %v5677_v22 = vadd.f32 %v1519_v60, %v1191_v63  ;;  %v2676_v51 = vpop.f32.mrf.mxu3  ;;  %1859 = vmatmul.f32.gmra.mxu1 %v1797_v7  ;;  %3945 = vrcp.f32 %v2083_v56  ;;  %v832_v58 = vmul.f32 %v6470_v40, %v6466_v5  ;;  %v3066_v7 = vmul.f32 1.442695, %v3020_v6  ;;  %v6471_v63 = vld [vmem:[#allocation22_spill] sm:$0xff] }
 0x487   :  { %v3940_v41 = vpop.eup %3939  ;;  %v2722_v48 = vmul.f32 1.442695, %v2676_v51 }
 0x488   :  { %v5682_v20 = vmul.f32 %v5294_v15, %v3940_v41  ;;  %v3942_v18 = vpop.eup %3941  ;;  %2161 = vmatmul.f32.gmra.mxu2 %v2127_v53  ;;  %v3023_v50 = vpop.f32.mrf.mxu0  ;;  %v1192_v37 = vadd.f32 %v1176_v2, %v832_v58 }
 0x489   :  { %3947 = vpow2.f32 %v2722_v48  ;;  %v3944_v32 = vpop.eup %3943  ;;  %v2470_v60 = vmul.f32 %v3942_v18, %v6471_v63  ;;  %v3068_v63 = vmul.f32 1.442695, %v3023_v50 }
 0x48a   :  { %6469 = vst [vmem:[#allocation17_spill] sm:$0xff] %v5682_v20  ;;  %2768 = vadd.xlane.f32.xlu0 %v5682_v20  ;;  %3949 = vrcp.f32 %v2425_v16  ;;  %v1177_v20 = vmul.f32 %v5363_v30, %v6463_v1  ;;  %v5700_v58 = vmul.f32 %v5294_v15, %v3944_v32  ;;  %v6472_v32 = vld [vmem:[#allocation23_spill] sm:$0xff] }
 0x48b   :  { %v1474_v54 = vpop.f32.mrf.mxu2  ;;  %v5687_v21 = vpop.f32.mrf.mxu1 }
 0x48c   :  { %v1520_v56 = vmul.f32 %v1474_v54, %v6468_v59  ;;  %v3946_v51 = vpop.eup %3945 }
 0x48d   :  { %v2085_v48 = vpop.xlane.xlu1 %2084  ;;  %v2128_v40 = vmul.f32 %v3946_v51, %v5321_v25  ;;  %v2427_v2 = vpop.xlane.xlu0 %2426  ;;  %v833_v25 = vmul.f32 %v5328_v43, %v6466_v5 }
 0x48e   :  { %v5691_v53 = vadd.f32 %v1520_v56, %v1192_v37  ;;  %3951 = vrcp.f32 %v2085_v48  ;;  %v2679_v41 = vpop.f32.mrf.mxu3  ;;  %2502 = vmatmul.f32.vlgmr.msrb.gmra.mxu1 %v2470_v60 }
 0x48f   :  { %v3948_v6 = vpop.eup %3947  ;;  %3953 = vpow2.f32 %v3066_v7  ;;  %v2724_v16 = vmul.f32 1.442695, %v2679_v41  ;;  %v1193_v56 = vadd.f32 %v1177_v20, %v833_v25 }
 0x490   :  { %v5697_v18 = vmul.f32 %v5318_v0, %v3948_v6  ;;  %v3950_v54 = vpop.eup %3949  ;;  %2164 = vmatmul.f32.gmra.mxu2 %v2128_v40 }
 0x491   :  { %3955 = vpow2.f32 %v2724_v16  ;;  %v3026_v37 = vpop.f32.mrf.mxu0  ;;  %v2471_v51 = vmul.f32 %v3950_v54, %v6472_v32 }
 0x492   :  { %2770 = vadd.xlane.f32.xlu1 %v5697_v18  ;;  %3112 = vadd.xlane.f32.xlu0 %v5700_v58  ;;  %3957 = vrcp.f32 %v2427_v2  ;;  %v1178_v2 = vmul.f32 %v5388_v55, %v6463_v1 }
 0x493   :  { %v1477_v30 = vpop.f32.mrf.mxu2  ;;  %v5706_v7 = vpop.f32.mrf.mxu1  ;;  %3959 = vpow2.f32 %v3068_v63  ;;  %v834_v63 = vmul.f32 %v5355_v24, %v6466_v5 }
 0x494   :  { %v3952_v60 = vpop.eup %3951  ;;  %v1521_v15 = vmul.f32 %v1477_v30, %v6468_v59 }
 0x495   :  { %v3954_v48 = vpop.eup %3953  ;;  %v2087_v41 = vpop.xlane.xlu2 %2086  ;;  %v2129_v40 = vmul.f32 %v3952_v60, %v5348_v10  ;;  %v3070_v60 = vmul.f32 1.442695, %v3026_v37 }
 0x496   :  { %v5711_v43 = vadd.f32 %v1521_v15, %v1193_v56  ;;  %v2682_v50 = vpop.f32.mrf.mxu3  ;;  %2505 = vmatmul.f32.gmra.mxu1 %v2471_v51  ;;  %3961 = vrcp.f32 %v2087_v41  ;;  %v2429_v20 = vpop.xlane.xlu1 %2428  ;;  %v5716_v25 = vmul.f32 %v5318_v0, %v3954_v48  ;;  %v1194_v15 = vadd.f32 %v1178_v2, %v834_v63 }
 0x497   :  { %v3956_v6 = vpop.eup %3955  ;;  %v2726_v16 = vmul.f32 1.442695, %v2682_v50 }
 0x498   :  { %v5719_v54 = vmul.f32 %v5345_v46, %v3956_v6  ;;  %v3958_v30 = vpop.eup %3957  ;;  %2167 = vmatmul.f32.gmra.mxu2 %v2129_v40 }
 0x499   :  { %3963 = vpow2.f32 %v2726_v16  ;;  %v3029_v10 = vpop.f32.mrf.mxu0  ;;  %v3960_v0 = vpop.eup %3959  ;;  %v2472_v51 = vmul.f32 %v3958_v30, %v5351_v4  ;;  %v1179_v16 = vmul.f32 %v5413_v17, %v6463_v1 }
 0x49a   :  { %3114 = vadd.xlane.f32.xlu1 %v5716_v25  ;;  %2772 = vadd.xlane.f32.xlu2 %v5719_v54  ;;  %3965 = vrcp.f32 %v2429_v20  ;;  %v5738_v4 = vmul.f32 %v5345_v46, %v3960_v0  ;;  %v6473_v0 = vld [vmem:[#allocation15_spill] sm:$0xff] }
 0x49b   :  { %v1480_v55 = vpop.f32.mrf.mxu2  ;;  %v5725_v56 = vpop.f32.mrf.mxu1  ;;  %3967 = vpow2.f32 %v3070_v60  ;;  %v3072_v60 = vmul.f32 1.442695, %v3029_v10 }
 0x49c   :  { %v1522_v32 = vmul.f32 %v1480_v55, %v6468_v59  ;;  %v3962_v48 = vpop.eup %3961 }
 0x49d   :  { %v2089_v41 = vpop.xlane.xlu0 %2088  ;;  %v2130_v37 = vmul.f32 %v3962_v48, %v5377_v14  ;;  %v2431_v2 = vpop.xlane.xlu2 %2430  ;;  %v835_v14 = vmul.f32 %v5385_v29, %v6466_v5 }
 0x49e   :  { %v5729_v40 = vadd.f32 %v1522_v32, %v1194_v15  ;;  %v2685_v24 = vpop.f32.mrf.mxu3  ;;  %2508 = vmatmul.f32.gmra.mxu1 %v2472_v51  ;;  %3969 = vrcp.f32 %v2089_v41 }
 0x49f   :  { %v3964_v50 = vpop.eup %3963  ;;  %v2728_v6 = vmul.f32 1.442695, %v2685_v24  ;;  %v1195_v32 = vadd.f32 %v1179_v16, %v835_v14 }
 0x4a0   :  { %v5735_v20 = vmul.f32 %v5374_v13, %v3964_v50  ;;  %v3966_v30 = vpop.eup %3965  ;;  %2170 = vmatmul.f32.gmra.mxu2 %v2130_v37  ;;  %v6474_v37 = vld [vmem:[#allocation24_spill] sm:$0xff] }
 0x4a1   :  { %3971 = vpow2.f32 %v2728_v6  ;;  %v3032_v63 = vpop.f32.mrf.mxu0  ;;  %v3968_v15 = vpop.eup %3967  ;;  %v2473_v51 = vmul.f32 %v3966_v30, %v6473_v0 }
 0x4a2   :  { %2774 = vadd.xlane.f32.xlu0 %v5735_v20  ;;  %3116 = vadd.xlane.f32.xlu2 %v5738_v4  ;;  %3973 = vrcp.f32 %v2431_v2  ;;  %v1180_v2 = vmul.f32 %v5438_v39, %v6463_v1  ;;  %v5757_v30 = vmul.f32 %v5374_v13, %v3968_v15  ;;  %v3074_v0 = vmul.f32 1.442695, %v3032_v63  ;;  %v6476_v15 = vld [vmem:[#allocation25_spill] sm:$0xff] }
 0x4a3   :  { %v1483_v17 = vpop.f32.mrf.mxu2  ;;  %v5744_v55 = vpop.f32.mrf.mxu1 }
 0x4a4   :  { %v1523_v46 = vmul.f32 %v1483_v17, %v6468_v59  ;;  %v3970_v48 = vpop.eup %3969  ;;  %6475 = vst [vmem:[#allocation14_spill] sm:$0xff] %v5757_v30 }
 0x4a5   :  { %v2091_v41 = vpop.xlane.xlu1 %2090  ;;  %v2131_v50 = vmul.f32 %v3970_v48, %v6474_v37  ;;  %v2433_v16 = vpop.xlane.xlu0 %2432 }
 0x4a6   :  { %v5748_v24 = vadd.f32 %v1523_v46, %v1195_v32  ;;  %3975 = vrcp.f32 %v2091_v41  ;;  %v2688_v29 = vpop.f32.mrf.mxu3  ;;  %2511 = vmatmul.f32.gmra.mxu1 %v2473_v51  ;;  %v836_v46 = vmul.f32 %v5410_v62, %v6466_v5 }
 0x4a7   :  { %v3972_v10 = vpop.eup %3971  ;;  %3977 = vpow2.f32 %v3072_v60  ;;  %v2730_v6 = vmul.f32 1.442695, %v2688_v29 }
 0x4a8   :  { %v5754_v14 = vmul.f32 %v5396_v19, %v3972_v10  ;;  %v3974_v17 = vpop.eup %3973  ;;  %2173 = vmatmul.f32.gmra.mxu2 %v2131_v50  ;;  %v1196_v48 = vadd.f32 %v1180_v2, %v836_v46  ;;  %v6477_v50 = vld [vmem:[#allocation30_spill] sm:$0xff] }
 0x4a9   :  { %3979 = vpow2.f32 %v2730_v6  ;;  %v3035_v32 = vpop.f32.mrf.mxu0  ;;  %v2474_v41 = vmul.f32 %v3974_v17, %v6476_v15 }
 0x4aa   :  { %2776 = vadd.xlane.f32.xlu1 %v5754_v14  ;;  %3118 = vadd.xlane.f32.xlu0 %v5757_v30  ;;  %3981 = vrcp.f32 %v2433_v16  ;;  %v1181_v30 = vmul.f32 %v5463_v11, %v6463_v1 }
 0x4ab   :  { %v1486_v39 = vpop.f32.mrf.mxu2  ;;  %v5763_v60 = vpop.f32.mrf.mxu1  ;;  %3983 = vpow2.f32 %v3074_v0 }
 0x4ac   :  { %v3976_v51 = vpop.eup %3975  ;;  %v1524_v13 = vmul.f32 %v1486_v39, %v6468_v59 }
 0x4ad   :  { %v3978_v29 = vpop.eup %3977  ;;  %v2093_v37 = vpop.xlane.xlu2 %2092  ;;  %v2132_v10 = vmul.f32 %v3976_v51, %v6477_v50  ;;  %v837_v51 = vmul.f32 %v5435_v36, %v6466_v5 }
 0x4ae   :  { %v5768_v62 = vadd.f32 %v1524_v13, %v1196_v48  ;;  %v2691_v63 = vpop.f32.mrf.mxu3  ;;  %2514 = vmatmul.f32.gmra.mxu1 %v2474_v41  ;;  %3985 = vrcp.f32 %v2093_v37  ;;  %v2435_v2 = vpop.xlane.xlu1 %2434  ;;  %v5773_v46 = vmul.f32 %v5396_v19, %v3978_v29  ;;  %v3076_v48 = vmul.f32 1.442695, %v3035_v32  ;;  %v6479_v29 = vld [vmem:[#allocation5_spill] sm:$0xff]  ;;  %v6480_v32 = vld [vmem:[#allocation26_spill] sm:$0xff] }
 0x4af   :  { %v3980_v6 = vpop.eup %3979  ;;  %v2732_v16 = vmul.f32 1.442695, %v2691_v63  ;;  %v1197_v15 = vadd.f32 %v1181_v30, %v837_v51 }
 0x4b0   :  { %6478 = vst [vmem:[#allocation22_spill] sm:$0xff] %v5773_v46  ;;  %v5776_v17 = vmul.f32 %v5421_v49, %v3980_v6  ;;  %v3982_v39 = vpop.eup %3981  ;;  %2176 = vmatmul.f32.gmra.mxu2 %v2132_v10 }
 0x4b1   :  { %3987 = vpow2.f32 %v2732_v16  ;;  %v3038_v0 = vpop.f32.mrf.mxu0  ;;  %v3984_v19 = vpop.eup %3983  ;;  %v2475_v37 = vmul.f32 %v3982_v39, %v6479_v29 }
 0x4b2   :  { %3120 = vadd.xlane.f32.xlu1 %v5773_v46  ;;  %2778 = vadd.xlane.f32.xlu2 %v5776_v17  ;;  %3989 = vrcp.f32 %v2435_v2  ;;  %v1182_v46 = vmul.f32 %v5488_v42, %v6463_v1  ;;  %v5795_v39 = vmul.f32 %v5421_v49, %v3984_v19  ;;  %v6482_v19 = vld [vmem:[#allocation6_spill] sm:$0xff] }
 0x4b3   :  { %v1489_v11 = vpop.f32.mrf.mxu2  ;;  %v5782_v13 = vpop.f32.mrf.mxu1  ;;  %3991 = vpow2.f32 %v3076_v48 }
 0x4b4   :  { %v1525_v41 = vmul.f32 %v1489_v11, %v6468_v59  ;;  %v3986_v50 = vpop.eup %3985  ;;  %6481 = vst [vmem:[#allocation23_spill] sm:$0xff] %v5795_v39 }
 0x4b5   :  { %v2095_v10 = vpop.xlane.xlu0 %2094  ;;  %v2133_v6 = vmul.f32 %v3986_v50, %v6480_v32  ;;  %v2437_v30 = vpop.xlane.xlu2 %2436 }
 0x4b6   :  { %v5786_v63 = vadd.f32 %v1525_v41, %v1197_v15  ;;  %v2694_v36 = vpop.f32.mrf.mxu3  ;;  %2517 = vmatmul.f32.gmra.mxu1 %v2475_v37  ;;  %3993 = vrcp.f32 %v2095_v10  ;;  %v838_v15 = vmul.f32 %v5460_v35, %v6466_v5  ;;  %v3078_v41 = vmul.f32 1.442695, %v3038_v0 }
 0x4b7   :  { %v3988_v16 = vpop.eup %3987  ;;  %v2734_v2 = vmul.f32 1.442695, %v2694_v36 }
 0x4b8   :  { %v5792_v51 = vmul.f32 %v5449_v52, %v3988_v16  ;;  %v3990_v48 = vpop.eup %3989  ;;  %2179 = vmatmul.f32.gmra.mxu2 %v2133_v6  ;;  %v1198_v50 = vadd.f32 %v1182_v46, %v838_v15  ;;  %v6483_v16 = vld [vmem:[#allocation9_spill] sm:$0xff] }
 0x4b9   :  { %3995 = vpow2.f32 %v2734_v2  ;;  %v3041_v11 = vpop.f32.mrf.mxu0  ;;  %v3992_v37 = vpop.eup %3991  ;;  %v2476_v10 = vmul.f32 %v3990_v48, %v6482_v19 }
 0x4ba   :  { %2780 = vadd.xlane.f32.xlu0 %v5792_v51  ;;  %3122 = vadd.xlane.f32.xlu2 %v5795_v39  ;;  %3997 = vrcp.f32 %v2437_v30  ;;  %v1183_v39 = vmul.f32 %v5513_v34, %v6463_v1  ;;  %v5814_v48 = vmul.f32 %v5449_v52, %v3992_v37  ;;  %v3080_v19 = vmul.f32 1.442695, %v3041_v11  ;;  %v6485_v37 = vld [vmem:[#allocation29_spill] sm:$0xff] }
 0x4bb   :  { %v1492_v42 = vpop.f32.mrf.mxu2  ;;  %v5801_v29 = vpop.f32.mrf.mxu1 }
 0x4bc   :  { %v1526_v49 = vmul.f32 %v1492_v42, %v6468_v59  ;;  %v3994_v36 = vpop.eup %3993  ;;  %6484 = vst [vmem:[#allocation15_spill] sm:$0xff] %v5814_v48 }
 0x4bd   :  { %v2097_v32 = vpop.xlane.xlu1 %2096  ;;  %v2134_v2 = vmul.f32 %v3994_v36, %v6483_v16  ;;  %v2439_v46 = vpop.xlane.xlu0 %2438 }
 0x4be   :  { %v5805_v6 = vadd.f32 %v1526_v49, %v1198_v50  ;;  %3999 = vrcp.f32 %v2097_v32  ;;  %v2697_v35 = vpop.f32.mrf.mxu3  ;;  %2520 = vmatmul.f32.gmra.mxu1 %v2476_v10  ;;  %v839_v49 = vmul.f32 %v5485_v61, %v6466_v5 }
 0x4bf   :  { %v3996_v0 = vpop.eup %3995  ;;  %4001 = vpow2.f32 %v3078_v41  ;;  %v2736_v30 = vmul.f32 1.442695, %v2697_v35 }
 0x4c0   :  { %v5811_v15 = vmul.f32 %v5471_v3, %v3996_v0  ;;  %v3998_v42 = vpop.eup %3997  ;;  %2182 = vmatmul.f32.gmra.mxu2 %v2134_v2  ;;  %v1199_v36 = vadd.f32 %v1183_v39, %v839_v49  ;;  %v6486_v2 = vld [vmem:[#allocation32_spill] sm:$0xff] }
 0x4c1   :  { %4003 = vpow2.f32 %v2736_v30  ;;  %v3044_v50 = vpop.f32.mrf.mxu0  ;;  %v2477_v32 = vmul.f32 %v3998_v42, %v6485_v37 }
 0x4c2   :  { %2782 = vadd.xlane.f32.xlu1 %v5811_v15  ;;  %3124 = vadd.xlane.f32.xlu0 %v5814_v48  ;;  %4005 = vrcp.f32 %v2439_v46  ;;  %v1184_v48 = vmul.f32 %v5538_v9, %v6463_v1 }
 0x4c3   :  { %v1495_v34 = vpop.f32.mrf.mxu2  ;;  %v5820_v41 = vpop.f32.mrf.mxu1  ;;  %4007 = vpow2.f32 %v3080_v19 }
 0x4c4   :  { %v4000_v10 = vpop.eup %3999  ;;  %v1527_v52 = vmul.f32 %v1495_v34, %v6468_v59 }
 0x4c5   :  { %v4002_v35 = vpop.eup %4001  ;;  %v2099_v16 = vpop.xlane.xlu2 %2098  ;;  %v2135_v0 = vmul.f32 %v4000_v10, %v6486_v2  ;;  %v840_v10 = vmul.f32 %v5510_v45, %v6466_v5 }
 0x4c6   :  { %v5825_v61 = vadd.f32 %v1527_v52, %v1199_v36  ;;  %v2700_v11 = vpop.f32.mrf.mxu3  ;;  %2523 = vmatmul.f32.gmra.mxu1 %v2477_v32  ;;  %4009 = vrcp.f32 %v2099_v16  ;;  %v2441_v39 = vpop.xlane.xlu1 %2440  ;;  %v5830_v49 = vmul.f32 %v5471_v3, %v4002_v35  ;;  %v3082_v36 = vmul.f32 1.442695, %v3044_v50  ;;  %v6488_v35 = vld [vmem:[#allocation10_spill] sm:$0xff]  ;;  %v6489_v50 = vld [vmem:[#allocation11_spill] sm:$0xff] }
 0x4c7   :  { %v4004_v30 = vpop.eup %4003  ;;  %v2738_v46 = vmul.f32 1.442695, %v2700_v11  ;;  %v1200_v37 = vadd.f32 %v1184_v48, %v840_v10 }
 0x4c8   :  { %6487 = vst [vmem:[#allocation24_spill] sm:$0xff] %v5830_v49  ;;  %v5833_v42 = vmul.f32 %v5496_v47, %v4004_v30  ;;  %v4006_v34 = vpop.eup %4005  ;;  %2185 = vmatmul.f32.gmra.mxu2 %v2135_v0 }
 0x4c9   :  { %4011 = vpow2.f32 %v2738_v46  ;;  %v3047_v19 = vpop.f32.mrf.mxu0  ;;  %v4008_v3 = vpop.eup %4007  ;;  %v2478_v16 = vmul.f32 %v4006_v34, %v6488_v35 }
 0x4ca   :  { %3126 = vadd.xlane.f32.xlu1 %v5830_v49  ;;  %2784 = vadd.xlane.f32.xlu2 %v5833_v42  ;;  %4013 = vrcp.f32 %v2441_v39  ;;  %v1185_v49 = vmul.f32 %v5563_v8, %v6463_v1  ;;  %v5852_v34 = vmul.f32 %v5496_v47, %v4008_v3  ;;  %v6491_v3 = vld [vmem:[#allocation31_spill] sm:$0xff] }
 0x4cb   :  { %v1498_v9 = vpop.f32.mrf.mxu2  ;;  %v5839_v52 = vpop.f32.mrf.mxu1  ;;  %4015 = vpow2.f32 %v3082_v36 }
 0x4cc   :  { %v1528_v32 = vmul.f32 %v1498_v9, %v6468_v59  ;;  %v4010_v2 = vpop.eup %4009  ;;  %6490 = vst [vmem:[#allocation25_spill] sm:$0xff] %v5852_v34 }
 0x4cd   :  { %v2101_v0 = vpop.xlane.xlu0 %2100  ;;  %v2136_v30 = vmul.f32 %v4010_v2, %v6489_v50  ;;  %v2443_v48 = vpop.xlane.xlu2 %2442 }
 0x4ce   :  { %v5843_v11 = vadd.f32 %v1528_v32, %v1200_v37  ;;  %v2703_v45 = vpop.f32.mrf.mxu3  ;;  %2526 = vmatmul.f32.gmra.mxu1 %v2478_v16  ;;  %4017 = vrcp.f32 %v2101_v0  ;;  %v841_v37 = vmul.f32 %v5535_v57, %v6466_v5  ;;  %v3084_v32 = vmul.f32 1.442695, %v3047_v19 }
 0x4cf   :  { %v4012_v46 = vpop.eup %4011  ;;  %v2740_v39 = vmul.f32 1.442695, %v2703_v45 }
 0x4d0   :  { %v5849_v10 = vmul.f32 %v5524_v27, %v4012_v46  ;;  %v4014_v36 = vpop.eup %4013  ;;  %2188 = vmatmul.f32.gmra.mxu2 %v2136_v30  ;;  %v1201_v2 = vadd.f32 %v1185_v49, %v841_v37  ;;  %v6492_v46 = vld [vmem:[#allocation33_spill] sm:$0xff] }
 0x4d1   :  { %4019 = vpow2.f32 %v2740_v39  ;;  %v3050_v9 = vpop.f32.mrf.mxu0  ;;  %v4016_v16 = vpop.eup %4015  ;;  %v2479_v0 = vmul.f32 %v4014_v36, %v6491_v3 }
 0x4d2   :  { %2786 = vadd.xlane.f32.xlu0 %v5849_v10  ;;  %3128 = vadd.xlane.f32.xlu2 %v5852_v34  ;;  %4021 = vrcp.f32 %v2443_v48  ;;  %v1186_v34 = vmul.f32 %v5588_v23, %v6463_v1  ;;  %v5871_v36 = vmul.f32 %v5524_v27, %v4016_v16  ;;  %v3086_v3 = vmul.f32 1.442695, %v3050_v9  ;;  %v6494_v16 = vld [vmem:[#allocation34_spill] sm:$0xff] }
 0x4d3   :  { %v1501_v8 = vpop.f32.mrf.mxu2  ;;  %v5858_v35 = vpop.f32.mrf.mxu1 }
 0x4d4   :  { %v1529_v47 = vmul.f32 %v1501_v8, %v6468_v59  ;;  %v4018_v45 = vpop.eup %4017  ;;  %6493 = vst [vmem:[#allocation30_spill] sm:$0xff] %v5871_v36 }
 0x4d5   :  { %v2103_v50 = vpop.xlane.xlu1 %2102  ;;  %v2137_v39 = vmul.f32 %v4018_v45, %v6492_v46  ;;  %v2445_v49 = vpop.xlane.xlu0 %2444 }
 0x4d6   :  { %v5862_v30 = vadd.f32 %v1529_v47, %v1201_v2  ;;  %4023 = vrcp.f32 %v2103_v50  ;;  %v2706_v57 = vpop.f32.mrf.mxu3  ;;  %2529 = vmatmul.f32.gmra.mxu1 %v2479_v0  ;;  %v842_v47 = vmul.f32 %v5560_v12, %v6466_v5 }
 0x4d7   :  { %v4020_v19 = vpop.eup %4019  ;;  %4025 = vpow2.f32 %v3084_v32  ;;  %v2742_v48 = vmul.f32 1.442695, %v2706_v57 }
 0x4d8   :  { %v5868_v37 = vmul.f32 %v5546_v33, %v4020_v19  ;;  %v4022_v8 = vpop.eup %4021  ;;  %2191 = vmatmul.f32.gmra.mxu2 %v2137_v39  ;;  %v1202_v45 = vadd.f32 %v1186_v34, %v842_v47  ;;  %v6495_v39 = vld [vmem:[#allocation36_spill] sm:$0xff] }
 0x4d9   :  { %4027 = vpow2.f32 %v2742_v48  ;;  %v3053_v2 = vpop.f32.mrf.mxu0  ;;  %v2480_v50 = vmul.f32 %v4022_v8, %v6494_v16  ;;  %v6498_v8 = vld [vmem:[#allocation35_spill] sm:$0xff] }
 0x4da   :  { %2788 = vadd.xlane.f32.xlu1 %v5868_v37  ;;  %3130 = vadd.xlane.f32.xlu0 %v5871_v36  ;;  %4029 = vrcp.f32 %v2445_v49  ;;  %v1187_v36 = vmul.f32 %v5613_v28, %v6463_v1 }
 0x4db   :  { %v1504_v23 = vpop.f32.mrf.mxu2  ;;  %v5877_v32 = vpop.f32.mrf.mxu1  ;;  %4031 = vpow2.f32 %v3086_v3 }
 0x4dc   :  { %v4024_v0 = vpop.eup %4023  ;;  %v1530_v27 = vmul.f32 %v1504_v23, %v6468_v59 }
 0x4dd   :  { %v4026_v57 = vpop.eup %4025  ;;  %v2105_v46 = vpop.xlane.xlu2 %2104  ;;  %v2138_v19 = vmul.f32 %v4024_v0, %v6495_v39  ;;  %v6500_v0 = vld [vmem:[#allocation38_spill] sm:$0xff]  ;;  %v6501_v39 = vld [vmem:[#allocation37_spill] sm:$0xff] }
 0x4de   :  { %v5882_v12 = vadd.f32 %v1530_v27, %v1202_v45  ;;  %v2709_v9 = vpop.f32.mrf.mxu3  ;;  %2532 = vmatmul.f32.gmra.mxu1 %v2480_v50  ;;  %4033 = vrcp.f32 %v2105_v46  ;;  %v2447_v34 = vpop.xlane.xlu1 %2446  ;;  %v5887_v47 = vmul.f32 %v5546_v33, %v4026_v57  ;;  %v843_v45 = vmul.f32 %v6500_v0, %v6466_v5  ;;  %v6502_v0 = vld [vmem:[#allocation40_spill] sm:$0xff] }
 0x4df   :  { %v4028_v48 = vpop.eup %4027  ;;  %v2744_v49 = vmul.f32 1.442695, %v2709_v9  ;;  %v3088_v27 = vmul.f32 1.442695, %v3053_v2 }
 0x4e0   :  { %6496 = vst [vmem:[#allocation5_spill] sm:$0xff] %v5882_v12  ;;  %v5890_v23 = vmul.f32 %v6498_v8, %v4028_v48  ;;  %v4030_v16 = vpop.eup %4029  ;;  %2194 = vmatmul.f32.gmra.mxu2 %v2138_v19  ;;  %v1203_v57 = vadd.f32 %v1187_v36, %v843_v45  ;;  %v1188_v12 = vmul.f32 %v5633_v31, %v6463_v1 }
 0x4e1   :  { %6497 = vst [vmem:[#allocation26_spill] sm:$0xff] %v5887_v47  ;;  %4035 = vpow2.f32 %v2744_v49  ;;  %v3056_v3 = vpop.f32.mrf.mxu0  ;;  %v4032_v33 = vpop.eup %4031  ;;  %v2481_v9 = vmul.f32 %v4030_v16, %v6501_v39 }
 0x4e2   :  { %6499 = vst [vmem:[#allocation6_spill] sm:$0xff] %v5890_v23  ;;  %3132 = vadd.xlane.f32.xlu1 %v5887_v47  ;;  %2790 = vadd.xlane.f32.xlu2 %v5890_v23  ;;  %4037 = vrcp.f32 %v2447_v34  ;;  %v5909_v16 = vmul.f32 %v6498_v8, %v4032_v33 }
 0x4e3   :  { %v1507_v28 = vpop.f32.mrf.mxu2  ;;  %v5896_v50 = vpop.f32.mrf.mxu1  ;;  %4039 = vpow2.f32 %v3088_v27 }
 0x4e4   :  { %v1531_v46 = vmul.f32 %v1507_v28, %v6468_v59  ;;  %v4034_v19 = vpop.eup %4033  ;;  %6503 = vst [vmem:[#allocation9_spill] sm:$0xff] %v5909_v16  ;;  %v3090_v28 = vmul.f32 1.442695, %v3056_v3  ;;  %v6505_v3 = vld [vmem:[#allocation39_spill] sm:$0xff] }
 0x4e5   :  { %v2107_v48 = vpop.xlane.xlu0 %2106  ;;  %v2139_v47 = vmul.f32 %v4034_v19, %v6502_v0  ;;  %v2449_v36 = vpop.xlane.xlu2 %2448 }
 0x4e6   :  { %v5900_v49 = vadd.f32 %v1531_v46, %v1203_v57  ;;  %v2712_v2 = vpop.f32.mrf.mxu3  ;;  %2535 = vmatmul.f32.gmra.mxu1 %v2481_v9  ;;  %4041 = vrcp.f32 %v2107_v48  ;;  %v6504_v46 = vld [vmem:[#allocation16_spill] sm:$0xff] }
 0x4e7   :  { %v4036_v23 = vpop.eup %4035  ;;  %v2746_v34 = vmul.f32 1.442695, %v2712_v2  ;;  %v844_v39 = vmul.f32 %v6504_v46, %v6466_v5  ;;  %v6507_v46 = vld [vmem:[#allocation12_spill] sm:$0xff] }
 0x4e8   :  { %v5906_v45 = vmul.f32 %v5599_v38, %v4036_v23  ;;  %v4038_v27 = vpop.eup %4037  ;;  %2197 = vmatmul.f32.gmra.mxu2 %v2139_v47 }
 0x4e9   :  { %4043 = vpow2.f32 %v2746_v34  ;;  %v3059_v57 = vpop.f32.mrf.mxu0  ;;  %v4040_v19 = vpop.eup %4039  ;;  %v1204_v8 = vadd.f32 %v1188_v12, %v844_v39  ;;  %v2482_v48 = vmul.f32 %v4038_v27, %v6505_v3  ;;  %v1189_v12 = vmul.f32 %v5656_v26, %v6463_v1 }
 0x4ea   :  { %2792 = vadd.xlane.f32.xlu0 %v5906_v45  ;;  %3134 = vadd.xlane.f32.xlu2 %v5909_v16  ;;  %4045 = vrcp.f32 %v2449_v36  ;;  %v3092_v31 = vmul.f32 1.442695, %v3059_v57  ;;  %v5928_v27 = vmul.f32 %v5599_v38, %v4040_v19  ;;  %v6511_v19 = vld [vmem:[#allocation21_spill] sm:$0xff] }
 0x4eb   :  { %v1510_v9 = vpop.f32.mrf.mxu2  ;;  %v5915_v23 = vpop.f32.mrf.mxu1  ;;  %4047 = vpow2.f32 %v3090_v28 }
 0x4ec   :  { %v1532_v33 = vmul.f32 %v1510_v9, %v6468_v59  ;;  %v4042_v47 = vpop.eup %4041  ;;  %6509 = vst [vmem:[#allocation10_spill] sm:$0xff] %v5928_v27 }
 0x4ed   :  { %v2109_v2 = vpop.xlane.xlu1 %2108  ;;  %v2140_v16 = vmul.f32 %v4042_v47, %v6507_v46  ;;  %v2451_v39 = vpop.xlane.xlu0 %2450  ;;  %v6512_v46 = vld [vmem:[#allocation42_spill] sm:$0xff] }
 0x4ee   :  { %v5919_v0 = vadd.f32 %v1532_v33, %v1204_v8  ;;  %4049 = vrcp.f32 %v2109_v2  ;;  %v2715_v34 = vpop.f32.mrf.mxu3  ;;  %2538 = vmatmul.f32.gmra.mxu1 %v2482_v48  ;;  %v6510_v8 = vld [vmem:[#allocation41_spill] sm:$0xff] }
 0x4ef   :  { %v4044_v36 = vpop.eup %4043  ;;  %4051 = vpow2.f32 %v3092_v31  ;;  %v2748_v57 = vmul.f32 1.442695, %v2715_v34  ;;  %v845_v33 = vmul.f32 %v6510_v8, %v6466_v5 }
 0x4f0   :  { %6506 = vst [vmem:[#allocation29_spill] sm:$0xff] %v5919_v0  ;;  %v5925_v9 = vmul.f32 %v5621_v44, %v4044_v36  ;;  %v4046_v28 = vpop.eup %4045  ;;  %2200 = vmatmul.f32.gmra.mxu2 %v2140_v16 }
 0x4f1   :  { %4053 = vpow2.f32 %v2748_v57  ;;  %v4048_v31 = vpop.eup %4047  ;;  %v1205_v47 = vadd.f32 %v1189_v12, %v845_v33  ;;  %v2483_v2 = vmul.f32 %v4046_v28, %v6511_v19  ;;  %v2453_v57 = vpop.xlane.xlu2 %2452  ;;  %v6514_v33 = vld [vmem:[#allocation7_spill] sm:$0xff] }
 0x4f2   :  { %6508 = vst [vmem:[#allocation32_spill] sm:$0xff] %v5925_v9  ;;  %2794 = vadd.xlane.f32.xlu1 %v5925_v9  ;;  %3136 = vadd.xlane.f32.xlu0 %v5928_v27  ;;  %4055 = vrcp.f32 %v2451_v39  ;;  %v5942_v39 = vmul.f32 %v5621_v44, %v4048_v31  ;;  %v6513_v9 = vld [vmem:[#allocation13_spill] sm:$0xff] }
 0x4f3   :  { %v1513_v26 = vpop.f32.mrf.mxu2  ;;  %v5934_v3 = vpop.f32.mrf.mxu1 }
 0x4f4   :  { %v4050_v48 = vpop.eup %4049  ;;  %v1533_v38 = vmul.f32 %v1513_v26, %v6468_v59  ;;  %v1190_v26 = vmul.f32 %v6514_v33, %v6463_v1 }
 0x4f5   :  { %v4052_v34 = vpop.eup %4051  ;;  %v2767_v16 = vpop.xlane.xlu1 %2766  ;;  %v2141_v36 = vmul.f32 %v4050_v48, %v6512_v46  ;;  %v6515_v48 = vld [vmem:[#allocation45_spill] sm:$0xff] }
 0x4f6   :  { %v5939_v8 = vadd.f32 %v1533_v38, %v1205_v47  ;;  %4057 = vrcp.f32 %v2767_v16  ;;  %2541 = vmatmul.f32.gmra.mxu1 %v2483_v2  ;;  %v5945_v0 = vmul.f32 %v6513_v9, %v4052_v34  ;;  %v846_v47 = vmul.f32 %v6515_v48, %v6466_v5  ;;  %v6517_v2 = vld [vmem:[#allocation8_spill] sm:$0xff] }
 0x4f7   :  { %v4054_v27 = vpop.eup %4053  ;;  %4059 = vrcp.f32 %v2453_v57  ;;  %v6518_v57 = vld [vmem:[#allocation18_spill] sm:$0xff] }
 0x4f8   :  { %v5948_v12 = vmul.f32 %v6513_v9, %v4054_v27  ;;  %v4056_v28 = vpop.eup %4055  ;;  %2203 = vmatmul.f32.gmra.mxu2 %v2141_v36  ;;  %v6516_v27 = vld [vmem:[#allocation43_spill] sm:$0xff]  ;;  %v1206_v19 = vadd.f32 %v1190_v26, %v846_v47  ;;  %v1863_v33 = vmul.f32 %v5687_v21, %v6518_v57  ;;  %v6519_v47 = vld [vmem:[#allocation44_spill] sm:$0xff] }
 0x4f9   :  { %v2484_v38 = vmul.f32 %v4056_v28, %v6516_v27  ;;  %v3111_v5 = vpop.xlane.xlu2 %3110 }
 0x4fa   :  { %3138 = vadd.xlane.f32.xlu1 %v5942_v39  ;;  %3140 = vadd.xlane.f32.xlu0 %v5945_v0 }
 0x4fb   :  { %2796 = vadd.xlane.f32.xlu2 %v5948_v12  ;;  %v5957_v44 = vpop.f32.mrf.mxu1  ;;  %v1516_v9 = vpop.f32.mrf.mxu2 }
 0x4fc   :  { %v4058_v31 = vpop.eup %4057  ;;  %v1534_v34 = vmul.f32 %v1516_v9, %v6468_v59  ;;  %v1879_v59 = vadd.f32 %v1863_v33, %v5677_v22  ;;  %v6520_v9 = vld [vmem:[#allocation27_spill] sm:$0xff]  ;;  %v6522_v33 = vld [vmem:[#allocation46_spill] sm:$0xff] }
 0x4fd   :  { %v2814_v1 = vmul.f32 %v4058_v31, %v6517_v2  ;;  %v2769_v16 = vpop.xlane.xlu0 %2768  ;;  %v4060_v36 = vpop.eup %4059  ;;  %v3277_v22 = vld [vmem:[%s6266_s7 + $0x10] sm:$0xff] }
 0x4fe   :  { %4061 = vrcp.f32 %v2769_v16  ;;  %2544 = vmatmul.f32.gmra.mxu1 %v2484_v38  ;;  %v5962_v46 = vadd.f32 %v1534_v34, %v1206_v19  ;;  %v2485_v31 = vmul.f32 %v4060_v36, %v6519_v47  ;;  %v6521_v19 = vld [vmem:[#allocation17_spill] sm:$0xff]  ;;  %v1864_v16 = vmul.f32 %v5706_v7, %v6518_v57 }
 0x4ff   :  { %4063 = vrcp.f32 %v3111_v5 }
 0x500   :  { %2846 = vmatmul.f32.vlgmr.msrb.gmra.mxu2 %v2814_v1  ;;  %v1880_v47 = vadd.f32 %v1864_v16, %v5691_v53 }
 0x503   :  { %v5966_v48 = vpop.f32.mrf.mxu1  ;;  %v2159_v26 = vpop.f32.mrf.mxu2 }
 0x504   :  { %v4062_v28 = vpop.eup %4061  ;;  %v2207_v27 = vmul.f32 %v2159_v26, %v6520_v9 }
 0x505   :  { %v2771_v38 = vpop.xlane.xlu1 %2770  ;;  %v2815_v2 = vmul.f32 %v4062_v28, %v6521_v19  ;;  %v3113_v21 = vpop.xlane.xlu0 %3112  ;;  %v3275_v19 = vld [vmem:[%s6266_s7] sm:$0xff] }
 0x506   :  { %4065 = vrcp.f32 %v2771_v38  ;;  %2547 = vmatmul.f32.gmra.mxu1 %v2485_v31  ;;  %v5972_v34 = vadd.f32 %v2207_v27, %v1879_v59  ;;  %v4064_v1 = vpop.eup %4063 }
 0x507   :  { %4067 = vrcp.f32 %v3113_v21  ;;  %v3158_v28 = vmul.f32 %v4064_v1, %v6522_v33  ;;  %v1865_v21 = vmul.f32 %v5725_v56, %v6518_v57  ;;  %v3278_v1 = vld [vmem:[%s6266_s7 + $0x18] sm:$0xff] }
 0x508   :  { %2849 = vmatmul.f32.gmra.mxu2 %v2815_v2  ;;  %v3276_v2 = vld [vmem:[%s6266_s7 + $0x8] sm:$0xff] }
 0x509   :  { %v1881_v33 = vadd.f32 %v1865_v21, %v5711_v43 }
 0x50b   :  { %v5976_v5 = vpop.f32.mrf.mxu1  ;;  %v2162_v26 = vpop.f32.mrf.mxu2 }
 0x50c   :  { %v4066_v36 = vpop.eup %4065  ;;  %v2208_v31 = vmul.f32 %v2162_v26, %v6520_v9 }
 0x50d   :  { %v2773_v59 = vpop.xlane.xlu2 %2772  ;;  %v2816_v27 = vmul.f32 %v4066_v36, %v5697_v18  ;;  %v3115_v38 = vpop.xlane.xlu1 %3114 }
 0x50e   :  { %3291 = vperm.xlu0 %3602, %v3277_v22   ;;  %3190 = vmatmul.f32.vlgmr.msra.gmra.mxu1 %v3158_v28  ;;  %v5985_v7 = vadd.f32 %v2208_v31, %v1880_v47  ;;  %4069 = vrcp.f32 %v2773_v59  ;;  %v4068_v53 = vpop.eup %4067 }
 0x50f   :  { %4071 = vrcp.f32 %v3115_v38  ;;  %v3159_v22 = vmul.f32 %v4068_v53, %v5700_v58 }
 0x510   :  { %2852 = vmatmul.f32.gmra.mxu2 %v2816_v27  ;;  %v1866_v27 = vmul.f32 %v5744_v55, %v6518_v57 }
 0x513   :  { %3281 = vperm.xlu2 %3604, %v3275_v19   ;;  %3286 = vperm.xlu1 %3603, %v3276_v2   ;;  %v5995_v18 = vpop.f32.mrf.mxu1  ;;  %v2165_v16 = vpop.f32.mrf.mxu2  ;;  %v1882_v2 = vadd.f32 %v1866_v27, %v5729_v40  ;;  %v1868_v27 = vmul.f32 %v5782_v13, %v6518_v57 }
 0x514   :  { %v4070_v36 = vpop.eup %4069  ;;  %v2209_v28 = vmul.f32 %v2165_v16, %v6520_v9 }
 0x515   :  { %v2775_v26 = vpop.xlane.xlu0 %2774  ;;  %v2817_v56 = vmul.f32 %v4070_v36, %v5719_v54  ;;  %v3117_v31 = vpop.xlane.xlu2 %3116 }
 0x516   :  { %3296 = vperm.xlu0 %3602, %v3278_v1   ;;  %3193 = vmatmul.f32.gmra.mxu1 %v3159_v22  ;;  %v6004_v47 = vadd.f32 %v2209_v28, %v1881_v33  ;;  %4073 = vrcp.f32 %v2775_v26  ;;  %v4072_v59 = vpop.eup %4071  ;;  %v1867_v22 = vmul.f32 %v5763_v60, %v6518_v57 }
 0x517   :  { %4075 = vrcp.f32 %v3117_v31  ;;  %v3160_v38 = vmul.f32 %v4072_v59, %v5716_v25 }
 0x518   :  { %2855 = vmatmul.f32.gmra.mxu2 %v2817_v56  ;;  %v1883_v28 = vadd.f32 %v1867_v22, %v5748_v24  ;;  %v6523_v24 = vld [vmem:[#allocation14_spill] sm:$0xff] }
 0x51b   :  { %v6008_v58 = vpop.f32.mrf.mxu1  ;;  %v2168_v43 = vpop.f32.mrf.mxu2 }
 0x51c   :  { %v4074_v19 = vpop.eup %4073  ;;  %v2210_v54 = vmul.f32 %v2168_v43, %v6520_v9 }
 0x51d   :  { %v2777_v53 = vpop.xlane.xlu1 %2776  ;;  %v2818_v21 = vmul.f32 %v4074_v19, %v5735_v20  ;;  %v3119_v55 = vpop.xlane.xlu0 %3118 }
 0x51e   :  { %4077 = vrcp.f32 %v2777_v53  ;;  %3196 = vmatmul.f32.gmra.mxu1 %v3160_v38  ;;  %v6014_v1 = vadd.f32 %v2210_v54, %v1882_v2  ;;  %v4076_v16 = vpop.eup %4075  ;;  %v1884_v2 = vadd.f32 %v1868_v27, %v5768_v62  ;;  %v6524_v62 = vld [vmem:[#allocation22_spill] sm:$0xff] }
 0x51f   :  { %4079 = vrcp.f32 %v3119_v55  ;;  %v3161_v33 = vmul.f32 %v4076_v16, %v5738_v4  ;;  %v1869_v16 = vmul.f32 %v5801_v29, %v6518_v57 }
 0x520   :  { %2858 = vmatmul.f32.gmra.mxu2 %v2818_v21 }
 0x523   :  { %v6018_v25 = vpop.f32.mrf.mxu1  ;;  %v2171_v40 = vpop.f32.mrf.mxu2 }
 0x524   :  { %v4078_v36 = vpop.eup %4077  ;;  %v2211_v20 = vmul.f32 %v2171_v40, %v6520_v9 }
 0x525   :  { %v2779_v26 = vpop.xlane.xlu2 %2778  ;;  %v2819_v56 = vmul.f32 %v4078_v36, %v5754_v14  ;;  %v3121_v60 = vpop.xlane.xlu1 %3120 }
 0x526   :  { %3199 = vmatmul.f32.gmra.mxu1 %v3161_v33  ;;  %v6024_v31 = vadd.f32 %v2211_v20, %v1883_v28  ;;  %4081 = vrcp.f32 %v2779_v26  ;;  %v4080_v59 = vpop.eup %4079  ;;  %v1885_v28 = vadd.f32 %v1869_v16, %v5786_v63 }
 0x527   :  { %4083 = vrcp.f32 %v3121_v60  ;;  %v3162_v38 = vmul.f32 %v4080_v59, %v6523_v24  ;;  %v1870_v59 = vmul.f32 %v5820_v41, %v6518_v57  ;;  %v6525_v24 = vld [vmem:[#allocation23_spill] sm:$0xff] }
 0x528   :  { %2861 = vmatmul.f32.gmra.mxu2 %v2819_v56 }
 0x52b   :  { %v6028_v43 = vpop.f32.mrf.mxu1  ;;  %v2174_v4 = vpop.f32.mrf.mxu2 }
 0x52c   :  { %v4082_v19 = vpop.eup %4081  ;;  %v2212_v14 = vmul.f32 %v2174_v4, %v6520_v9 }
 0x52d   :  { %v2781_v54 = vpop.xlane.xlu0 %2780  ;;  %v2820_v53 = vmul.f32 %v4082_v19, %v5776_v17  ;;  %v3123_v13 = vpop.xlane.xlu2 %3122  ;;  %v1886_v19 = vadd.f32 %v1870_v59, %v5805_v6  ;;  %v6526_v6 = vld [vmem:[#allocation15_spill] sm:$0xff]  ;;  %v6527_v59 = vld [vmem:[#allocation28_spill] sm:$0xff] }
 0x52e   :  { %3202 = vmatmul.f32.gmra.mxu1 %v3162_v38  ;;  %v6034_v21 = vadd.f32 %v2212_v14, %v1884_v2  ;;  %4085 = vrcp.f32 %v2781_v54  ;;  %v4084_v55 = vpop.eup %4083 }
 0x52f   :  { %4087 = vrcp.f32 %v3123_v13  ;;  %v3163_v40 = vmul.f32 %v4084_v55, %v6524_v62  ;;  %v1871_v13 = vmul.f32 %v5839_v52, %v6518_v57 }
 0x530   :  { %2864 = vmatmul.f32.gmra.mxu2 %v2820_v53 }
 0x533   :  { %v6038_v22 = vpop.f32.mrf.mxu1  ;;  %v2177_v36 = vpop.f32.mrf.mxu2 }
 0x534   :  { %v4086_v33 = vpop.eup %4085  ;;  %v2213_v17 = vmul.f32 %v2177_v36, %v6520_v9 }
 0x535   :  { %v2783_v20 = vpop.xlane.xlu1 %2782  ;;  %v2821_v26 = vmul.f32 %v4086_v33, %v5792_v51  ;;  %v3125_v29 = vpop.xlane.xlu0 %3124 }
 0x536   :  { %4089 = vrcp.f32 %v2783_v20  ;;  %3205 = vmatmul.f32.gmra.mxu1 %v3163_v40  ;;  %v6044_v56 = vadd.f32 %v2213_v17, %v1885_v28  ;;  %v4088_v60 = vpop.eup %4087  ;;  %v1887_v40 = vadd.f32 %v1871_v13, %v5825_v61  ;;  %v6528_v61 = vld [vmem:[#allocation24_spill] sm:$0xff] }
 0x537   :  { %4091 = vrcp.f32 %v3125_v29  ;;  %v3164_v38 = vmul.f32 %v4088_v60, %v6525_v24 }
 0x538   :  { %2867 = vmatmul.f32.gmra.mxu2 %v2821_v26  ;;  %v1872_v26 = vmul.f32 %v5858_v35, %v6518_v57 }
 0x53b   :  { %v6048_v27 = vpop.f32.mrf.mxu1  ;;  %v2180_v63 = vpop.f32.mrf.mxu2 }
 0x53c   :  { %v4090_v4 = vpop.eup %4089  ;;  %v2214_v51 = vmul.f32 %v2180_v63, %v6520_v9 }
 0x53d   :  { %v2785_v2 = vpop.xlane.xlu2 %2784  ;;  %v2822_v14 = vmul.f32 %v4090_v4, %v5811_v15  ;;  %v3127_v41 = vpop.xlane.xlu1 %3126 }
 0x53e   :  { %3208 = vmatmul.f32.gmra.mxu1 %v3164_v38  ;;  %v6054_v54 = vadd.f32 %v2214_v51, %v1886_v19  ;;  %4093 = vrcp.f32 %v2785_v2  ;;  %v4092_v53 = vpop.eup %4091  ;;  %v1888_v38 = vadd.f32 %v1872_v26, %v5843_v11 }
 0x53f   :  { %4095 = vrcp.f32 %v3127_v41  ;;  %v3165_v36 = vmul.f32 %v4092_v53, %v6526_v6  ;;  %v1873_v53 = vmul.f32 %v5877_v32, %v6518_v57 }
 0x540   :  { %2870 = vmatmul.f32.gmra.mxu2 %v2822_v14 }
 0x543   :  { %v6058_v55 = vpop.f32.mrf.mxu1  ;;  %v2183_v16 = vpop.f32.mrf.mxu2 }
 0x544   :  { %v4094_v62 = vpop.eup %4093  ;;  %v2215_v15 = vmul.f32 %v2183_v16, %v6520_v9 }
 0x545   :  { %v2787_v33 = vpop.xlane.xlu0 %2786  ;;  %v2823_v28 = vmul.f32 %v4094_v62, %v5833_v42  ;;  %v3129_v20 = vpop.xlane.xlu2 %3128 }
 0x546   :  { %3211 = vmatmul.f32.gmra.mxu1 %v3165_v36  ;;  %v2231_v17 = vadd.f32 %v2215_v15, %v1887_v40  ;;  %4097 = vrcp.f32 %v2787_v33  ;;  %v4096_v52 = vpop.eup %4095  ;;  %v6529_v36 = vld [vmem:[#allocation25_spill] sm:$0xff]  ;;  %v1889_v40 = vadd.f32 %v1873_v53, %v5862_v30 }
 0x547   :  { %4099 = vrcp.f32 %v3129_v20  ;;  %v3166_v63 = vmul.f32 %v4096_v52, %v6528_v61  ;;  %v1874_v52 = vmul.f32 %v5896_v50, %v6518_v57 }
 0x548   :  { %2873 = vmatmul.f32.gmra.mxu2 %v2823_v28 }
 0x54b   :  { %v2527_v29 = vpop.f32.mrf.mxu1  ;;  %v2186_v60 = vpop.f32.mrf.mxu2 }
 0x54c   :  { %v2559_v4 = vmul.f32 %v2527_v29, %v6527_v59  ;;  %v4098_v24 = vpop.eup %4097  ;;  %v2216_v42 = vmul.f32 %v2186_v60, %v6520_v9  ;;  %v6530_v60 = vld [vmem:[#allocation30_spill] sm:$0xff] }
 0x54d   :  { %v2789_v19 = vpop.xlane.xlu1 %2788  ;;  %v2824_v2 = vmul.f32 %v4098_v24, %v5849_v10  ;;  %v3131_v14 = vpop.xlane.xlu0 %3130 }
 0x54e   :  { %v6070_v51 = vadd.f32 %v2559_v4, %v2231_v17  ;;  %4101 = vrcp.f32 %v2789_v19  ;;  %3214 = vmatmul.f32.gmra.mxu1 %v3166_v63  ;;  %v2232_v35 = vadd.f32 %v2216_v42, %v1888_v38  ;;  %v4100_v41 = vpop.eup %4099  ;;  %v6532_v19 = vld [vmem:[#allocation6_spill] sm:$0xff] }
 0x54f   :  { %4103 = vrcp.f32 %v3131_v14  ;;  %v3167_v62 = vmul.f32 %v4100_v41, %v6529_v36  ;;  %v1875_v41 = vmul.f32 %v5915_v23, %v6518_v57 }
 0x550   :  { %2876 = vmatmul.f32.gmra.mxu2 %v2824_v2 }
 0x553   :  { %v2530_v13 = vpop.f32.mrf.mxu1  ;;  %v2189_v11 = vpop.f32.mrf.mxu2 }
 0x554   :  { %v4102_v16 = vpop.eup %4101  ;;  %v2560_v6 = vmul.f32 %v2530_v13, %v6527_v59  ;;  %v2217_v10 = vmul.f32 %v2189_v11, %v6520_v9  ;;  %v6533_v11 = vld [vmem:[#allocation26_spill] sm:$0xff] }
 0x555   :  { %v2791_v15 = vpop.xlane.xlu2 %2790  ;;  %v2825_v33 = vmul.f32 %v4102_v16, %v5868_v37  ;;  %v3133_v17 = vpop.xlane.xlu1 %3132  ;;  %v6531_v37 = vld [vmem:[#allocation5_spill] sm:$0xff] }
 0x556   :  { %v6080_v28 = vadd.f32 %v2560_v6, %v2232_v35  ;;  %3217 = vmatmul.f32.gmra.mxu1 %v3167_v62  ;;  %v2233_v32 = vadd.f32 %v2217_v10, %v1889_v40  ;;  %4105 = vrcp.f32 %v2791_v15  ;;  %v4104_v20 = vpop.eup %4103  ;;  %v1890_v63 = vadd.f32 %v1874_v52, %v6531_v37  ;;  %v6536_v37 = vld [vmem:[#allocation32_spill] sm:$0xff] }
 0x557   :  { %4107 = vrcp.f32 %v3133_v17  ;;  %v3168_v4 = vmul.f32 %v4104_v20, %v6530_v60  ;;  %v1891_v62 = vadd.f32 %v1875_v41, %v5900_v49  ;;  %v1876_v20 = vmul.f32 %v5934_v3, %v6518_v57 }
 0x558   :  { %2879 = vmatmul.f32.gmra.mxu2 %v2825_v33 }
 0x55b   :  { %v2533_v26 = vpop.f32.mrf.mxu1  ;;  %v2192_v29 = vpop.f32.mrf.mxu2 }
 0x55c   :  { %v2561_v30 = vmul.f32 %v2533_v26, %v6527_v59  ;;  %v4106_v61 = vpop.eup %4105  ;;  %v2218_v24 = vmul.f32 %v2192_v29, %v6520_v9 }
 0x55d   :  { %v2793_v38 = vpop.xlane.xlu0 %2792  ;;  %v2826_v2 = vmul.f32 %v4106_v61, %v6532_v19  ;;  %v3135_v35 = vpop.xlane.xlu2 %3134 }
 0x55e   :  { %v6088_v42 = vadd.f32 %v2561_v30, %v2233_v32  ;;  %3220 = vmatmul.f32.gmra.mxu1 %v3168_v4  ;;  %v2234_v50 = vadd.f32 %v2218_v24, %v1890_v63  ;;  %4109 = vrcp.f32 %v2793_v38  ;;  %v4108_v14 = vpop.eup %4107  ;;  %v6534_v30 = vld [vmem:[#allocation9_spill] sm:$0xff] }
 0x55f   :  { %4111 = vrcp.f32 %v3135_v35  ;;  %v3169_v6 = vmul.f32 %v4108_v14, %v6533_v11  ;;  %v6535_v4 = vld [vmem:[#allocation29_spill] sm:$0xff] }
 0x560   :  { %2882 = vmatmul.f32.gmra.mxu2 %v2826_v2  ;;  %v1892_v61 = vadd.f32 %v1876_v20, %v6535_v4  ;;  %v6538_v4 = vld [vmem:[#allocation19_spill] sm:$0xff] }
 0x563   :  { %v2536_v53 = vpop.f32.mrf.mxu1  ;;  %v2195_v13 = vpop.f32.mrf.mxu2 }
 0x564   :  { %v2562_v16 = vmul.f32 %v2536_v53, %v6527_v59  ;;  %v4110_v36 = vpop.eup %4109  ;;  %v2219_v40 = vmul.f32 %v2195_v13, %v6520_v9  ;;  %v6537_v53 = vld [vmem:[#allocation10_spill] sm:$0xff] }
 0x565   :  { %v2795_v10 = vpop.xlane.xlu1 %2794  ;;  %v2827_v33 = vmul.f32 %v4110_v36, %v5906_v45  ;;  %v3137_v32 = vpop.xlane.xlu0 %3136 }
 0x566   :  { %v6097_v15 = vadd.f32 %v2562_v16, %v2234_v50  ;;  %4113 = vrcp.f32 %v2795_v10  ;;  %3223 = vmatmul.f32.gmra.mxu1 %v3169_v6  ;;  %v2235_v23 = vadd.f32 %v2219_v40, %v1891_v62  ;;  %v4112_v17 = vpop.eup %4111  ;;  %v1877_v50 = vmul.f32 %v5957_v44, %v6518_v57 }
 0x567   :  { %4115 = vrcp.f32 %v3137_v32  ;;  %v3170_v60 = vmul.f32 %v4112_v17, %v6534_v30 }
 0x568   :  { %2885 = vmatmul.f32.gmra.mxu2 %v2827_v33  ;;  %v1893_v11 = vadd.f32 %v1877_v50, %v5939_v8  ;;  %v1878_v33 = vmul.f32 %v5966_v48, %v6518_v57  ;;  %v2551_v57 = vmul.f32 %v5976_v5, %v6527_v59  ;;  %v6539_v5 = vld [vmem:[#allocation20_spill] sm:$0xff] }
 0x56a   :  { %v1894_v20 = vadd.f32 %v1878_v33, %v5962_v46 }
 0x56b   :  { %v2539_v52 = vpop.f32.mrf.mxu1  ;;  %v2198_v49 = vpop.f32.mrf.mxu2 }
 0x56c   :  { %v4114_v26 = vpop.eup %4113  ;;  %v2563_v29 = vmul.f32 %v2539_v52, %v6527_v59  ;;  %v2220_v45 = vmul.f32 %v2198_v49, %v6520_v9 }
 0x56d   :  { %v2828_v63 = vmul.f32 %v4114_v26, %v6536_v37  ;;  %v3139_v19 = vpop.xlane.xlu1 %3138  ;;  %v4116_v2 = vpop.eup %4115 }
 0x56e   :  { %v6107_v24 = vadd.f32 %v2563_v29, %v2235_v23  ;;  %v2797_v38 = vpop.xlane.xlu2 %2796  ;;  %3226 = vmatmul.f32.gmra.mxu1 %v3170_v60  ;;  %v2236_v3 = vadd.f32 %v2220_v45, %v1892_v61  ;;  %v3171_v13 = vmul.f32 %v4116_v2, %v6537_v53  ;;  %v3141_v44 = vpop.xlane.xlu0 %3140  ;;  %v2552_v45 = vmul.f32 %v5995_v18, %v6527_v59 }
 0x56f   :  { %4117 = vrcp.f32 %v2797_v38  ;;  %v2553_v2 = vmul.f32 %v6008_v58, %v6527_v59 }
 0x570   :  { %2888 = vmatmul.f32.gmra.mxu2 %v2828_v63  ;;  %4119 = vrcp.f32 %v3139_v19 }
 0x571   :  { %4121 = vrcp.f32 %v3141_v44  ;;  %v2569_v18 = vadd.f32 %v2553_v2, %v6004_v47  ;;  %v2555_v47 = vmul.f32 %v6028_v43, %v6527_v59 }
 0x573   :  { %v2542_v35 = vpop.f32.mrf.mxu1  ;;  %v2201_v14 = vpop.f32.mrf.mxu2 }
 0x574   :  { %v2564_v41 = vmul.f32 %v2542_v35, %v6527_v59  ;;  %v2221_v6 = vmul.f32 %v2201_v14, %v6520_v9 }
 0x575   :  { %v4118_v16 = vpop.eup %4117 }
 0x576   :  { %v6115_v36 = vadd.f32 %v2564_v41, %v2236_v3  ;;  %v2829_v62 = vmul.f32 %v4118_v16, %v5948_v12  ;;  %3229 = vmatmul.f32.gmra.mxu1 %v3171_v13  ;;  %v2237_v40 = vadd.f32 %v2221_v6, %v1893_v11  ;;  %v4120_v10 = vpop.eup %4119  ;;  %v2568_v3 = vadd.f32 %v2552_v45, %v5985_v7 }
 0x577   :  { %v3172_v8 = vmul.f32 %v4120_v10, %v5942_v39  ;;  %v4122_v49 = vpop.eup %4121  ;;  %v2567_v39 = vadd.f32 %v2551_v57, %v5972_v34  ;;  %v2554_v7 = vmul.f32 %v6018_v25, %v6527_v59  ;;  %v2571_v25 = vadd.f32 %v2555_v47, %v6024_v31 }
 0x578   :  { %2891 = vmatmul.f32.gmra.mxu2 %v2829_v62  ;;  %v3173_v60 = vmul.f32 %v4122_v49, %v5945_v0  ;;  %v2557_v31 = vmul.f32 %v6048_v27, %v6527_v59 }
 0x579   :  { %v2570_v58 = vadd.f32 %v2554_v7, %v6014_v1  ;;  %v2556_v1 = vmul.f32 %v6038_v22, %v6527_v59 }
 0x57a   :  { %v2573_v22 = vadd.f32 %v2557_v31, %v6044_v56 }
 0x57b   :  { %v2545_v23 = vpop.f32.mrf.mxu1  ;;  %v2204_v32 = vpop.f32.mrf.mxu2  ;;  %v2572_v43 = vadd.f32 %v2556_v1, %v6034_v21  ;;  %v2558_v21 = vmul.f32 %v6058_v55, %v6527_v59 }
 0x57c   :  { %v2565_v17 = vmul.f32 %v2545_v23, %v6527_v59  ;;  %v2222_v52 = vmul.f32 %v2204_v32, %v6520_v9 }
 0x57d   :  { %v2574_v27 = vadd.f32 %v2558_v21, %v6054_v54 }
 0x57e   :  { %v6124_v12 = vadd.f32 %v2565_v17, %v2237_v40  ;;  %3232 = vmatmul.f32.gmra.mxu1 %v3172_v8  ;;  %v2238_v26 = vadd.f32 %v2222_v52, %v1894_v20 }
 0x583   :  { %v2548_v48 = vpop.f32.mrf.mxu1  ;;  %v2847_v29 = vpop.f32.mrf.mxu2 }
 0x584   :  { %v2566_v30 = vmul.f32 %v2548_v48, %v6527_v59  ;;  %v2895_v46 = vmul.f32 %v2847_v29, %v6538_v4 }
 0x586   :  { %v6132_v61 = vadd.f32 %v2566_v30, %v2238_v26  ;;  %3235 = vmatmul.f32.gmra.mxu1 %v3173_v60  ;;  %v2911_v9 = vadd.f32 %v2895_v46, %v2567_v39 }
 0x58b   :  { %v3191_v37 = vpop.f32.mrf.mxu1  ;;  %v2850_v63 = vpop.f32.mrf.mxu2 }
 0x58c   :  { %v3239_v38 = vmul.f32 %v3191_v37, %v6539_v5  ;;  %v2896_v19 = vmul.f32 %v2850_v63, %v6538_v4 }
 0x58e   :  { %v6139_v0 = vadd.f32 %v3239_v38, %v2911_v9  ;;  %v2912_v34 = vadd.f32 %v2896_v19, %v2568_v3 }
 0x593   :  { %v3194_v50 = vpop.f32.mrf.mxu1  ;;  %v2853_v35 = vpop.f32.mrf.mxu2 }
 0x594   :  { %v3240_v14 = vmul.f32 %v3194_v50, %v6539_v5  ;;  %v2897_v41 = vmul.f32 %v2853_v35, %v6538_v4 }
 0x596   :  { %v6146_v53 = vadd.f32 %v3240_v14, %v2912_v34  ;;  %v2913_v13 = vadd.f32 %v2897_v41, %v2569_v18 }
 0x59b   :  { %v3197_v16 = vpop.f32.mrf.mxu1  ;;  %v2856_v11 = vpop.f32.mrf.mxu2 }
 0x59c   :  { %v3241_v6 = vmul.f32 %v3197_v16, %v6539_v5  ;;  %v2898_v62 = vmul.f32 %v2856_v11, %v6538_v4 }
 0x59e   :  { %v6153_v40 = vadd.f32 %v3241_v6, %v2913_v13  ;;  %v2914_v44 = vadd.f32 %v2898_v62, %v2570_v58 }
 0x5a3   :  { %v3200_v10 = vpop.f32.mrf.mxu1  ;;  %v2859_v33 = vpop.f32.mrf.mxu2 }
 0x5a4   :  { %v3242_v23 = vmul.f32 %v3200_v10, %v6539_v5  ;;  %v2899_v32 = vmul.f32 %v2859_v33, %v6538_v4 }
 0x5a6   :  { %v6160_v17 = vadd.f32 %v3242_v23, %v2914_v44  ;;  %v2915_v8 = vadd.f32 %v2899_v32, %v2571_v25 }
 0x5ab   :  { %v3203_v20 = vpop.f32.mrf.mxu1  ;;  %v2862_v52 = vpop.f32.mrf.mxu2 }
 0x5ac   :  { %v3243_v26 = vmul.f32 %v3203_v20, %v6539_v5  ;;  %v2900_v49 = vmul.f32 %v2862_v52, %v6538_v4 }
 0x5ae   :  { %v6167_v57 = vadd.f32 %v3243_v26, %v2915_v8  ;;  %v2916_v48 = vadd.f32 %v2900_v49, %v2572_v43 }
 0x5b3   :  { %v3206_v29 = vpop.f32.mrf.mxu1  ;;  %v2865_v30 = vpop.f32.mrf.mxu2 }
 0x5b4   :  { %v3244_v60 = vmul.f32 %v3206_v29, %v6539_v5  ;;  %v2901_v39 = vmul.f32 %v2865_v30, %v6538_v4 }
 0x5b6   :  { %v6174_v46 = vadd.f32 %v3244_v60, %v2916_v48  ;;  %v2917_v9 = vadd.f32 %v2901_v39, %v2573_v22 }
 0x5bb   :  { %v3209_v45 = vpop.f32.mrf.mxu1  ;;  %v2868_v37 = vpop.f32.mrf.mxu2 }
 0x5bc   :  { %v3245_v63 = vmul.f32 %v3209_v45, %v6539_v5  ;;  %v2902_v38 = vmul.f32 %v2868_v37, %v6538_v4 }
 0x5be   :  { %v3261_v3 = vadd.f32 %v3245_v63, %v2917_v9  ;;  %v2918_v19 = vadd.f32 %v2902_v38, %v2574_v27 }
 0x5c3   :  { %v3212_v34 = vpop.f32.mrf.mxu1  ;;  %v2871_v56 = vpop.f32.mrf.mxu2 }
 0x5c4   :  { %v3246_v2 = vmul.f32 %v3212_v34, %v6539_v5  ;;  %v2903_v50 = vmul.f32 %v2871_v56, %v6538_v4  ;;  %v3292_v56 = vpop.permute.xlu0 %3291 }
 0x5c6   :  { %v3262_v35 = vadd.f32 %v3246_v2, %v2918_v19  ;;  %v2919_v14 = vadd.f32 %v2903_v50, %v6070_v51  ;;  %v4140_v19 = vld [vmem:[%s6260_s1 + $0x8] sm:$0xff] }
 0x5cb   :  { %v3215_v55 = vpop.f32.mrf.mxu1  ;;  %v2874_v59 = vpop.f32.mrf.mxu2 }
 0x5cc   :  { %v3247_v18 = vmul.f32 %v3215_v55, %v6539_v5  ;;  %v2904_v41 = vmul.f32 %v2874_v59, %v6538_v4  ;;  %v3297_v55 = vpop.permute.xlu0 %3296 }
 0x5ce   :  { %v3263_v54 = vadd.f32 %v3247_v18, %v2919_v14  ;;  %v2920_v13 = vadd.f32 %v2904_v41, %v6080_v28  ;;  %v4142_v41 = vld [vmem:[%s6260_s1 + $0x18] sm:$0xff] }
 0x5d3   :  { %v3218_v7 = vpop.f32.mrf.mxu1  ;;  %v2877_v16 = vpop.f32.mrf.mxu2 }
 0x5d4   :  { %v3248_v11 = vmul.f32 %v3218_v7, %v6539_v5  ;;  %v2905_v45 = vmul.f32 %v2877_v16, %v6538_v4 }
 0x5d6   :  { %v3264_v6 = vadd.f32 %v3248_v11, %v2920_v13  ;;  %v2921_v27 = vadd.f32 %v2905_v45, %v6088_v42  ;;  %v3271_v42 = vld [vmem:[%s6265_s6] sm:$0xff] }
 0x5db   :  { %v3221_v58 = vpop.f32.mrf.mxu1  ;;  %v2880_v62 = vpop.f32.mrf.mxu2 }
 0x5dc   :  { %v2906_v39 = vmul.f32 %v2880_v62, %v6538_v4 }
 0x5de   :  { %v2922_v37 = vadd.f32 %v2906_v39, %v6097_v15  ;;  %v3272_v15 = vld [vmem:[%s6265_s6 + $0x8] sm:$0xff] }
 0x5e3   :  { %v3224_v44 = vpop.f32.mrf.mxu1  ;;  %v2883_v47 = vpop.f32.mrf.mxu2 }
 0x5e4   :  { %v2907_v30 = vmul.f32 %v2883_v47, %v6538_v4 }
 0x5e6   :  { %v2923_v9 = vadd.f32 %v2907_v30, %v6107_v24  ;;  %v3273_v24 = vld [vmem:[%s6265_s6 + $0x10] sm:$0xff] }
 0x5eb   :  { %v3227_v10 = vpop.f32.mrf.mxu1  ;;  %v2886_v51 = vpop.f32.mrf.mxu2 }
 0x5ec   :  { %v2908_v49 = vmul.f32 %v2886_v51, %v6538_v4 }
 0x5ee   :  { %v2924_v60 = vadd.f32 %v2908_v49, %v6115_v36  ;;  %v3249_v36 = vmul.f32 %v3221_v58, %v6539_v5 }
 0x5f0   :  { %v3265_v38 = vadd.f32 %v3249_v36, %v2921_v27 }
 0x5f3   :  { %v3230_v33 = vpop.f32.mrf.mxu1  ;;  %v2889_v23 = vpop.f32.mrf.mxu2 }
 0x5f4   :  { %v2909_v28 = vmul.f32 %v2889_v23, %v6538_v4  ;;  %v3252_v31 = vmul.f32 %v3230_v33, %v6539_v5 }
 0x5f6   :  { %v2925_v48 = vadd.f32 %v2909_v28, %v6124_v12  ;;  %v3268_v22 = vadd.f32 %v3252_v31, %v2924_v60  ;;  %v3250_v12 = vmul.f32 %v3224_v44, %v6539_v5 }
 0x5f8   :  { %v3266_v63 = vadd.f32 %v3250_v12, %v2922_v37 }
 0x5fb   :  { %v3233_v25 = vpop.f32.mrf.mxu1  ;;  %v2892_v32 = vpop.f32.mrf.mxu2 }
 0x5fc   :  { %v2910_v8 = vmul.f32 %v2892_v32, %v6538_v4  ;;  %v3253_v26 = vmul.f32 %v3233_v25, %v6539_v5  ;;  %v3274_v4 = vld [vmem:[%s6265_s6 + $0x18] sm:$0xff] }
 0x5fe   :  { %v2926_v20 = vadd.f32 %v2910_v8, %v6132_v61  ;;  %v3269_v29 = vadd.f32 %v3253_v26, %v2925_v48  ;;  %v3251_v61 = vmul.f32 %v3227_v10, %v6539_v5 }
 0x600   :  { %v3267_v21 = vadd.f32 %v3251_v61, %v2923_v9 }
 0x603   :  { %v3236_v1 = vpop.f32.mrf.mxu1 }
 0x604   :  { %v3254_v52 = vmul.f32 %v3236_v1, %v6539_v5  ;;  %v3282_v5 = vpop.permute.xlu2 %3281 }
 0x606   :  { %v3270_v43 = vadd.f32 %v3254_v52, %v2926_v20 }
 0x608   :  { %3577 = vmatpush.xpose.msk.msrb.mxu3 %vm78_vm0, %v3270_v43 }
 0x60c   :  { %3578 = vmatpush.xpose.msk.msrb.mxu3 %vm78_vm0, %v3269_v29 }
 0x610   :  { %3579 = vmatpush.xpose.msk.msrb.mxu3 %vm78_vm0, %v3268_v22 }
 0x614   :  { %3580 = vmatpush.xpose.msk.msrb.mxu3 %vm78_vm0, %v3267_v21 }
 0x618   :  { %3581 = vmatpush.xpose.msk.msrb.mxu3 %vm78_vm0, %v3266_v63 }
 0x61c   :  { %3582 = vmatpush.xpose.msk.msrb.mxu3 %vm78_vm0, %v3265_v38 }
 0x620   :  { %3583 = vmatpush.xpose.msk.msrb.mxu3 %vm78_vm0, %v3264_v6 }
 0x624   :  { %3584 = vmatpush.xpose.msk.msrb.mxu3 %vm78_vm0, %v3263_v54 }
 0x628   :  { %3585 = vmatpush.xpose.msk.msrb.mxu3 %vm78_vm0, %v3262_v35  ;;  %v4141_v35 = vld [vmem:[%s6260_s1 + $0x10] sm:$0xff] }
 0x62c   :  { %3586 = vmatpush.xpose.msk.msrb.mxu3 %vm78_vm0, %v3261_v3 }
 0x630   :  { %3587 = vmatpush.xpose.msk.msrb.mxu3 %vm78_vm0, %v6174_v46 }
 0x634   :  { %3588 = vmatpush.xpose.msk.msrb.mxu3 %vm78_vm0, %v6167_v57  ;;  %v3287_v57 = vpop.permute.xlu1 %3286 }
 0x638   :  { %3589 = vmatpush.xpose.msk.msrb.mxu3 %vm78_vm0, %v6160_v17 }
 0x63c   :  { %3590 = vmatpush.xpose.msk.msrb.mxu3 %vm78_vm0, %v6153_v40  ;;  %v4139_v40 = vld [vmem:[%s6260_s1] sm:$0xff] }
 0x640   :  { %3591 = vmatpush.xpose.msk.msrb.mxu3 %vm78_vm0, %v6146_v53 }
 0x644   :  { %3592 = vmatpush.xpose.msk.msrb.mxu3 %vm78_vm0, %v6139_v0 }
 0x647   :  { %3593 = vmatmul.msk.f32.vlgmr.msrb.gmra.mxu3 %vm78_vm0, %v3271_v42 }
 0x64f   :  { %3594 = vmatmul.msk.f32.gmra.mxu3 %vm78_vm0, %v3272_v15 }
 0x657   :  { %3595 = vmatmul.msk.f32.gmra.mxu3 %vm78_vm0, %v3273_v24 }
 0x65f   :  { %3596 = vmatmul.msk.f32.gmra.mxu3 %vm78_vm0, %v3274_v4 }
 0x6ca   :  { %v3376_v0 = vpop.f32.mrf.mxu3 }
 0x6cb   :  { %v3377_v53 = vadd.f32 %v3376_v0, %v3282_v5 }
 0x6cd   :  { %v3388_v17 = vadd.f32 %v4139_v40, %v3377_v53 }
 0x6cf   :  { %3392 = vst [vmem:[#allocation2] sm:$0xff] %v3388_v17 }
 0x6d2   :  { %v3379_v46 = vpop.f32.mrf.mxu3 }
 0x6d3   :  { %v3380_v3 = vadd.f32 %v3379_v46, %v3287_v57 }
 0x6d5   :  { %v3389_v34 = vadd.f32 %v4140_v19, %v3380_v3 }
 0x6d7   :  { %3393 = vst [vmem:[#allocation2 + $0x8] sm:$0xff] %v3389_v34 }
 0x6da   :  { %v3382_v2 = vpop.f32.mrf.mxu3 }
 0x6db   :  { %v3383_v50 = vadd.f32 %v3382_v2, %v3292_v56 }
 0x6dd   :  { %v3390_v14 = vadd.f32 %v4141_v35, %v3383_v50 }
 0x6df   :  { %3394 = vst [vmem:[#allocation2 + $0x10] sm:$0xff] %v3390_v14 }
 0x6e2   :  { %v3385_v59 = vpop.f32.mrf.mxu3 }
 0x6e3   :  { %v3386_v18 = vadd.f32 %v3385_v59, %v3297_v55 }
 0x6e5   :  { %v3391_v54 = vadd.f32 %v4142_v41, %v3386_v18 }
 0x6e7   :  { %3395 = vst [vmem:[#allocation2 + $0x18] sm:$0xff] %v3391_v54 }
 0x6e8   :  { %3408 = dma.vmem_to_hbm [thread:$0]  %s3401_s3, 512, %s3403_s21, [#allocation3], %s4172_s11, %s4172_s11, %s4173_s24  }
 0x6e9   :  { %4167 = dma.done.wait [#allocation3], 512  }
 0x6ea   :  { %4168 = vsyncadd [#allocation3], 4294966784 }
 0x6eb   :  { %3413 = vsyncpa [#allocation3], 1 }

</bundles_post_ra>
